<compile_context>
chip_gen: v6e
topology: v6e:2x2x1
jax: 0.10.0
libtpu: 0.0.40
codegen_flags: <defaults>
</compile_context>

<pallas_src>
import functools

import jax
import jax.numpy as jnp
from jax.experimental import pallas as pl
from jax.experimental.pallas import tpu as pltpu

# ----------------------------- config ---------------------------------------
B = 2          # batch
T = 8          # sequence length
D_IN = 128     # input feature size   (module uses 512)
H = 128        # hidden size          (module uses num_features=512)
NUM_LAYERS = 2
NUM_CLASSES = 12
FC_PAD = 128   # fc output padded to a full lane width (>=128)


# ----------------------- input projection kernel ----------------------------
def _input_proj_kernel(x_ref, w_ref, b_ref, gi_ref):
    # x: (T*B, D), w: (D, 3H), b: (1, 3H) -> gi: (T*B, 3H); one big MXU matmul.
    gi_ref[...] = (jnp.dot(x_ref[...], w_ref[...],
                           preferred_element_type=jnp.float32) + b_ref[...])


def gru_input_projection(x_flat, wih_t, b_ih):
    """x_flat: (T*B, D).  wih_t: (2, D, 3H).  b_ih: (2, 1, 3H).
    Returns gi for both directions: (2, T*B, 3H)."""
    TB, Dn = x_flat.shape
    threeH = wih_t.shape[-1]
    return pl.pallas_call(
        _input_proj_kernel,
        out_shape=jax.ShapeDtypeStruct((2, TB, threeH), jnp.float32),
        grid_spec=pltpu.PrefetchScalarGridSpec(
            num_scalar_prefetch=0,
            grid=(2,),  # direction
            in_specs=[
                pl.BlockSpec((TB, Dn), lambda d: (0, 0)),            # x (shared)
                pl.BlockSpec((None, Dn, threeH), lambda d: (d, 0, 0)),  # W_ih^T[d]
                pl.BlockSpec((None, 1, threeH), lambda d: (d, 0, 0)),   # b_ih[d]
            ],
            out_specs=pl.BlockSpec((None, TB, threeH), lambda d: (d, 0, 0)),
        ),
        compiler_params=pltpu.CompilerParams(
            dimension_semantics=("parallel",)),
    )(x_flat, wih_t, b_ih)


# ----------------------- recurrent (h-projection) kernel ---------------------
def _gru_recurrent_kernel(*refs, seq_len, hidden, with_fc):
    if with_fc:
        gi_ref, whh_ref, bhh_ref, wfc_ref, out_ref, fc_ref, h_scr = refs
    else:
        gi_ref, whh_ref, bhh_ref, out_ref, h_scr = refs
        wfc_ref = fc_ref = None

    d = pl.program_id(0)                 # direction: 0 = forward, 1 = backward
    h_scr[...] = jnp.zeros_like(h_scr)   # h0 == 0, no HBM input needed
    whh = whh_ref[...]                   # (H, 3H), resident in VMEM
    b_hh = bhh_ref[...]                  # (1, 3H)

    def step(t, carry):
        # backward direction walks time in reverse; output written at the true
        # time index so no flips are needed outside the kernel.
        idx = jnp.where(d == 0, t, seq_len - 1 - t)
        gi = gi_ref[idx]                 # (B, 3H) precomputed input projection
        h = h_scr[...]                   # (B, H)
        gh = jnp.dot(h, whh, preferred_element_type=jnp.float32) + b_hh

        r = jax.nn.sigmoid(gi[:, :hidden] + gh[:, :hidden])
        z = jax.nn.sigmoid(gi[:, hidden:2 * hidden] + gh[:, hidden:2 * hidden])
        n = jnp.tanh(gi[:, 2 * hidden:] + r * gh[:, 2 * hidden:])
        h_new = (1.0 - z) * n + z * h

        h_scr[...] = h_new
        out_ref[idx] = h_new             # whole (T,B,H) block stays in VMEM
        return carry

    jax.lax.fori_loop(0, seq_len, step, 0, unroll=True)

    if with_fc:
        # Fused fc epilogue: this direction's hidden at time T-1 times its half
        # of the (lane-padded) fc weight.  Halves + bias are summed outside.
        last = out_ref[seq_len - 1]                      # (B, H)
        fc_ref[...] = jnp.dot(last, wfc_ref[...],
                              preferred_element_type=jnp.float32)


def gru_recurrent(gi, whh_t, b_hh, wfc_dir=None):
    """gi: (2, T, B, 3H).  whh_t: (2, H, 3H).  b_hh: (2, 1, 3H).
    wfc_dir (optional): (2, H, FC_PAD) fc weight halves (fused epilogue).
    Returns out (2, T, B, H) [, fc_parts (2, B, FC_PAD)]."""
    _, Tn, Bn, threeH = gi.shape
    Hn = whh_t.shape[1]
    with_fc = wfc_dir is not None
    kernel = functools.partial(_gru_recurrent_kernel,
                               seq_len=Tn, hidden=Hn, with_fc=with_fc)

    in_specs = [
        pl.BlockSpec((None, Tn, Bn, threeH), lambda d: (d, 0, 0, 0)),  # gi[d]
        pl.BlockSpec((None, Hn, threeH), lambda d: (d, 0, 0)),         # W_hh^T[d]
        pl.BlockSpec((None, 1, threeH), lambda d: (d, 0, 0)),          # b_hh[d]
    ]
    args = [gi, whh_t, b_hh]
    out_spec_hidden = pl.BlockSpec((None, Tn, Bn, Hn), lambda d: (d, 0, 0, 0))
    out_shape_hidden = jax.ShapeDtypeStruct((2, Tn, Bn, Hn), jnp.float32)

    if with_fc:
        Fn = wfc_dir.shape[-1]
        in_specs.append(pl.BlockSpec((None, Hn, Fn), lambda d: (d, 0, 0)))
        args.append(wfc_dir)
        out_shape = (out_shape_hidden,
                     jax.ShapeDtypeStruct((2, Bn, Fn), jnp.float32))
        out_specs = (out_spec_hidden,
                     pl.BlockSpec((None, Bn, Fn), lambda d: (d, 0, 0)))
    else:
        out_shape = out_shape_hidden
        out_specs = out_spec_hidden

    return pl.pallas_call(
        kernel,
        out_shape=out_shape,
        grid_spec=pltpu.PrefetchScalarGridSpec(
            num_scalar_prefetch=0,
            grid=(2,),  # direction axis; independent -> parallel (2 TCs on v7x)
            in_specs=in_specs,
            out_specs=out_specs,
            scratch_shapes=[pltpu.VMEM((Bn, Hn), jnp.float32)],  # hidden state
        ),
        compiler_params=pltpu.CompilerParams(
            dimension_semantics=("parallel",)),
    )(*args)


# ----------------------------- full module forward ---------------------------
def gru_module_forward(x_btd, kparams):
    """Equivalent of GRU.forward: bidirectional 2-layer GRU -> fc2 on last step."""
    Bn, Tn, _ = x_btd.shape
    x = jnp.transpose(x_btd, (1, 0, 2))          # (T, B, D) time-major
    fc_parts = None
    for l in range(NUM_LAYERS):
        lp = kparams["layers"][l]
        Dl = x.shape[-1]
        x_flat = x.reshape(Tn * Bn, Dl)          # view: (T*B, D)
        gi = gru_input_projection(x_flat, lp["wih_t"], lp["b_ih"])   # (2,T*B,3H)
        gi = gi.reshape(2, Tn, Bn, gi.shape[-1])                     # view
        if l == NUM_LAYERS - 1:
            _, fc_parts = gru_recurrent(gi, lp["whh_t"], lp["b_hh"],
                                        wfc_dir=kparams["wfc_dir"])
        else:
            out = gru_recurrent(gi, lp["whh_t"], lp["b_hh"])         # (2,T,B,H)
            x = jnp.concatenate([out[0], out[1]], axis=-1)           # (T,B,2H)
    logits = (fc_parts[0] + fc_parts[1])[:, :NUM_CLASSES] + kparams["b_fc"]
    return logits


# ----------------------------- pure-JAX reference ----------------------------
def _gru_cell_ref(x_t, h, w_ih, w_hh, b_ih, b_hh):
    gi = x_t @ w_ih.T + b_ih
    gh = h @ w_hh.T + b_hh
    Hn = h.shape[-1]
    r = jax.nn.sigmoid(gi[:, :Hn] + gh[:, :Hn])
    z = jax.nn.sigmoid(gi[:, Hn:2 * Hn] + gh[:, Hn:2 * Hn])
    n = jnp.tanh(gi[:, 2 * Hn:] + r * gh[:, 2 * Hn:])
    return (1.0 - z) * n + z * h


def _gru_layer_ref(x_tbd, w_ih, w_hh, b_ih, b_hh):
    Hn = w_hh.shape[1]
    h = jnp.zeros((x_tbd.shape[1], Hn), jnp.float32)

    def step(h, x_t):
        h_new = _gru_cell_ref(x_t, h, w_ih, w_hh, b_ih, b_hh)
        return h_new, h_new

    _, outs = jax.lax.scan(step, h, x_tbd)
    return outs


def gru_module_forward_ref(x_btd, raw):
    x = jnp.transpose(x_btd, (1, 0, 2))
    for l in range(NUM_LAYERS):
        out_f = _gru_layer_ref(x, *raw[f"l{l}_fwd"])
        out_b = jnp.flip(_gru_layer_ref(jnp.flip(x, axis=0), *raw[f"l{l}_bwd"]),
                         axis=0)
        x = jnp.concatenate([out_f, out_b], axis=-1)
    w_fc, b_fc = raw["fc2"]
    return x[-1] @ w_fc.T + b_fc


# ----------------------------- parameter init --------------------------------
def init_raw_params(key):
    params = {}
    k_gru = 1.0 / jnp.sqrt(H)
    for l in range(NUM_LAYERS):
        in_size = D_IN if l == 0 else 2 * H
        for direc in ("fwd", "bwd"):
            key, k1, k2, k3, k4 = jax.random.split(key, 5)
            w_ih = jax.random.uniform(k1, (3 * H, in_size), jnp.float32,
                                      -k_gru, k_gru)
            w_hh = jax.random.uniform(k2, (3 * H, H), jnp.float32, -k_gru, k_gru)
            b_ih = jax.random.uniform(k3, (3 * H,), jnp.float32, -k_gru, k_gru)
            b_hh = jax.random.uniform(k4, (3 * H,), jnp.float32, -k_gru, k_gru)
            params[f"l{l}_{direc}"] = (w_ih, w_hh, b_ih, b_hh)
    key, k1, k2 = jax.random.split(key, 3)
    k_fc = 1.0 / jnp.sqrt(2 * H)
    w_fc = jax.random.uniform(k1, (NUM_CLASSES, 2 * H), jnp.float32, -k_fc, k_fc)
    b_fc = jax.random.uniform(k2, (NUM_CLASSES,), jnp.float32, -k_fc, k_fc)
    params["fc2"] = (w_fc, b_fc)
    return params


def prepare_kernel_params(raw):
    """Stack / transpose PyTorch-layout weights into the kernel layout (done once)."""
    kparams = {"layers": []}
    for l in range(NUM_LAYERS):
        w_ih_f, w_hh_f, b_ih_f, b_hh_f = raw[f"l{l}_fwd"]
        w_ih_b, w_hh_b, b_ih_b, b_hh_b = raw[f"l{l}_bwd"]
        kparams["layers"].append({
            "wih_t": jnp.stack([w_ih_f.T, w_ih_b.T], axis=0),          # (2, D, 3H)
            "whh_t": jnp.stack([w_hh_f.T, w_hh_b.T], axis=0),          # (2, H, 3H)
            "b_ih": jnp.stack([b_ih_f, b_ih_b], axis=0)[:, None, :],   # (2, 1, 3H)
            "b_hh": jnp.stack([b_hh_f, b_hh_b], axis=0)[:, None, :],   # (2, 1, 3H)
        })
    w_fc, b_fc = raw["fc2"]                       # (12, 2H), (12,)
    w_fc_t = jnp.transpose(w_fc)                  # (2H, 12)
    w_fc_pad = jnp.zeros((2 * H, FC_PAD), jnp.float32).at[:, :NUM_CLASSES].set(w_fc_t)
    # split by direction: concat(h_f, h_b) @ W^T == h_f @ W_t[:H] + h_b @ W_t[H:]
    kparams["wfc_dir"] = jnp.stack([w_fc_pad[:H], w_fc_pad[H:]], axis=0)  # (2,H,128)
    kparams["b_fc"] = b_fc
    return kparams


# ----------------------------- main -----------------------------------------
if __name__ == "__main__":
    key = jax.random.PRNGKey(0)
    key, kx = jax.random.split(key)
    x = jax.random.normal(kx, (B, T, D_IN), jnp.float32)   # (batch, seq, feat)
    raw = init_raw_params(key)
    kparams = prepare_kernel_params(raw)

    fwd = jax.jit(gru_module_forward)
    out = jax.block_until_ready(fwd(x, kparams))
    assert out.shape == (B, NUM_CLASSES), out.shape

    ref = jax.block_until_ready(gru_module_forward_ref(x, raw))
    if not jnp.allclose(out, ref, atol=1e-3, rtol=1e-3):
        raise AssertionError(f"mismatch: max abs err {jnp.max(jnp.abs(out - ref))}")

    print("KERNEL_OK")
</pallas_src>

<mosaic_0001>
module attributes {stable_mosaic.version = 11 : i64} {
  func.func @_input_proj_kernel(%arg0: i32, %arg1: memref<16x128xf32, #tpu.memory_space<vmem>>, %arg2: memref<1x128x384xf32, #tpu.memory_space<vmem>>, %arg3: memref<1x1x384xf32, #tpu.memory_space<vmem>>, %arg4: memref<1x16x384xf32, #tpu.memory_space<vmem>>) attributes {dimension_semantics = [#tpu.dimension_semantics<parallel>], iteration_bounds = array<i64: 2>, scalar_prefetch = 0 : i64, scratch_operands = 0 : i64, tpu.core_type = #tpu.core_type<tc>, window_params = [{pipeline_mode = #tpu.pipeline_mode<synchronous>, transform_indices = @transform_0, window_bounds = array<i64: 16, 128>}, {transform_indices = @transform_1, window_bounds = array<i64: 1, 128, 384>}, {transform_indices = @transform_2, window_bounds = array<i64: 1, 1, 384>}, {transform_indices = @transform_3, window_bounds = array<i64: 1, 16, 384>}]} {
    %c0 = arith.constant 0 : index
    %c0_0 = arith.constant 0 : index
    %0 = vector.load %arg1[%c0, %c0_0] : memref<16x128xf32, #tpu.memory_space<vmem>>, vector<16x128xf32>
    %c0_1 = arith.constant 0 : index
    %c0_2 = arith.constant 0 : index
    %c0_3 = arith.constant 0 : index
    %1 = vector.load %arg2[%c0_1, %c0_2, %c0_3] : memref<1x128x384xf32, #tpu.memory_space<vmem>>, vector<1x128x384xf32>
    %2 = vector.shape_cast %1 : vector<1x128x384xf32> to vector<128x384xf32>
    %cst = arith.constant dense<0.000000e+00> : vector<16x384xf32>
    %3 = tpu.matmul %0, %2, %cst {dimension_numbers = #tpu.dot_dimension_numbers<[1], [0], [0], [1], [0, 0, 1, 1], [], []>} : vector<16x128xf32>, vector<128x384xf32>, vector<16x384xf32> -> vector<16x384xf32>
    %c0_4 = arith.constant 0 : index
    %c0_5 = arith.constant 0 : index
    %c0_6 = arith.constant 0 : index
    %4 = vector.load %arg3[%c0_4, %c0_5, %c0_6] : memref<1x1x384xf32, #tpu.memory_space<vmem>>, vector<1x1x384xf32>
    %5 = vector.shape_cast %4 : vector<1x1x384xf32> to vector<1x384xf32>
    %6 = vector.broadcast %5 : vector<1x384xf32> to vector<16x384xf32>
    %7 = arith.addf %3, %6 : vector<16x384xf32>
    %c0_7 = arith.constant 0 : index
    %c0_8 = arith.constant 0 : index
    %c0_9 = arith.constant 0 : index
    %8 = vector.load %arg4[%c0_7, %c0_8, %c0_9] : memref<1x16x384xf32, #tpu.memory_space<vmem>>, vector<1x16x384xf32>
    %9 = vector.shape_cast %8 : vector<1x16x384xf32> to vector<16x384xf32>
    %10 = vector.shape_cast %7 : vector<16x384xf32> to vector<1x16x384xf32>
    tpu.vector_store %arg4[%c0_7, %c0_8, %c0_9], %10 {strides = array<i32>} : memref<1x16x384xf32, #tpu.memory_space<vmem>>, vector<1x16x384xf32>,
    return
  }
  func.func @transform_0(%arg0: i32) -> (i32, i32) {
    %c0_i32 = arith.constant 0 : i32
    %c0_i32_0 = arith.constant 0 : i32
    %c0_i32_1 = arith.constant 0 : i32
    return %c0_i32, %c0_i32_0 : i32, i32
  }
  func.func @transform_1(%arg0: i32) -> (i32, i32, i32) {
    %c0_i32 = arith.constant 0 : i32
    %c0_i32_0 = arith.constant 0 : i32
    %c0_i32_1 = arith.constant 0 : i32
    return %arg0, %c0_i32, %c0_i32_0 : i32, i32, i32
  }
  func.func @transform_2(%arg0: i32) -> (i32, i32, i32) {
    %c0_i32 = arith.constant 0 : i32
    %c0_i32_0 = arith.constant 0 : i32
    %c0_i32_1 = arith.constant 0 : i32
    return %arg0, %c0_i32, %c0_i32_0 : i32, i32, i32
  }
  func.func @transform_3(%arg0: i32) -> (i32, i32, i32) {
    %c0_i32 = arith.constant 0 : i32
    %c0_i32_0 = arith.constant 0 : i32
    %c0_i32_1 = arith.constant 0 : i32
    return %arg0, %c0_i32, %c0_i32_0 : i32, i32, i32
  }
}

module attributes {stable_mosaic.version = 11 : i64} {
  func.func @_gru_recurrent_kernel(%arg0: i32, %arg1: memref<1x8x2x384xf32, #tpu.memory_space<vmem>>, %arg2: memref<1x128x384xf32, #tpu.memory_space<vmem>>, %arg3: memref<1x1x384xf32, #tpu.memory_space<vmem>>, %arg4: memref<1x8x2x128xf32, #tpu.memory_space<vmem>>, %arg5: memref<2x128xf32, #tpu.memory_space<vmem>>) attributes {dimension_semantics = [#tpu.dimension_semantics<parallel>], iteration_bounds = array<i64: 2>, scalar_prefetch = 0 : i64, scratch_operands = 1 : i64, tpu.core_type = #tpu.core_type<tc>, window_params = [{transform_indices = @transform_0, window_bounds = array<i64: 1, 8, 2, 384>}, {transform_indices = @transform_1, window_bounds = array<i64: 1, 128, 384>}, {transform_indices = @transform_2, window_bounds = array<i64: 1, 1, 384>}, {transform_indices = @transform_3, window_bounds = array<i64: 1, 8, 2, 128>}]} {
    %cst = arith.constant 0.000000e+00 : f32
    %0 = vector.broadcast %cst : f32 to vector<2x128xf32>
    %c0 = arith.constant 0 : index
    %c0_0 = arith.constant 0 : index
    %1 = vector.load %arg5[%c0, %c0_0] : memref<2x128xf32, #tpu.memory_space<vmem>>, vector<2x128xf32>
    tpu.vector_store %arg5[%c0, %c0_0], %0 {strides = array<i32>} : memref<2x128xf32, #tpu.memory_space<vmem>>, vector<2x128xf32>,
    %c0_1 = arith.constant 0 : index
    %c0_2 = arith.constant 0 : index
    %c0_3 = arith.constant 0 : index
    %2 = vector.load %arg2[%c0_1, %c0_2, %c0_3] : memref<1x128x384xf32, #tpu.memory_space<vmem>>, vector<1x128x384xf32>
    %3 = vector.shape_cast %2 : vector<1x128x384xf32> to vector<128x384xf32>
    %c0_4 = arith.constant 0 : index
    %c0_5 = arith.constant 0 : index
    %c0_6 = arith.constant 0 : index
    %4 = vector.load %arg3[%c0_4, %c0_5, %c0_6] : memref<1x1x384xf32, #tpu.memory_space<vmem>>, vector<1x1x384xf32>
    %5 = vector.shape_cast %4 : vector<1x1x384xf32> to vector<1x384xf32>
    %c0_i32 = arith.constant 0 : i32
    %c0_i32_7 = arith.constant 0 : i32
    %6 = arith.cmpi eq, %arg0, %c0_i32_7 : i32
    %c7_i32 = arith.constant 7 : i32
    %7 = arith.subi %c7_i32, %c0_i32 : i32
    %8 = arith.select %6, %c0_i32, %7 : i32
    %c0_8 = arith.constant 0 : index
    %9 = arith.index_cast %8 : i32 to index
    %c0_9 = arith.constant 0 : index
    %c0_10 = arith.constant 0 : index
    %10 = vector.load %arg1[%c0_8, %9, %c0_9, %c0_10] : memref<1x8x2x384xf32, #tpu.memory_space<vmem>>, vector<1x1x2x384xf32>
    %11 = vector.shape_cast %10 : vector<1x1x2x384xf32> to vector<2x384xf32>
    %c0_11 = arith.constant 0 : index
    %c0_12 = arith.constant 0 : index
    %12 = vector.load %arg5[%c0_11, %c0_12] : memref<2x128xf32, #tpu.memory_space<vmem>>, vector<2x128xf32>
    %cst_13 = arith.constant dense<0.000000e+00> : vector<2x384xf32>
    %13 = tpu.matmul %12, %3, %cst_13 {dimension_numbers = #tpu.dot_dimension_numbers<[1], [0], [0], [1], [0, 0, 1, 1], [], []>} : vector<2x128xf32>, vector<128x384xf32>, vector<2x384xf32> -> vector<2x384xf32>
    %14 = vector.broadcast %5 : vector<1x384xf32> to vector<2x384xf32>
    %15 = arith.addf %13, %14 : vector<2x384xf32>
    %16 = vector.extract_strided_slice %11 {offsets = [0, 0], sizes = [2, 128], strides = [1, 1]} : vector<2x384xf32> to vector<2x128xf32>
    %17 = vector.extract_strided_slice %15 {offsets = [0, 0], sizes = [2, 128], strides = [1, 1]} : vector<2x384xf32> to vector<2x128xf32>
    %18 = arith.addf %16, %17 : vector<2x128xf32>
    %19 = arith.negf %18 : vector<2x128xf32>
    %20 = math.exp %19 : vector<2x128xf32>
    %cst_14 = arith.constant 1.000000e+00 : f32
    %21 = vector.broadcast %cst_14 : f32 to vector<2x128xf32>
    %22 = arith.addf %21, %20 : vector<2x128xf32>
    %23 = arith.divf %21, %22 : vector<2x128xf32>
    %24 = vector.extract_strided_slice %11 {offsets = [0, 128], sizes = [2, 128], strides = [1, 1]} : vector<2x384xf32> to vector<2x128xf32>
    %25 = vector.extract_strided_slice %15 {offsets = [0, 128], sizes = [2, 128], strides = [1, 1]} : vector<2x384xf32> to vector<2x128xf32>
    %26 = arith.addf %24, %25 : vector<2x128xf32>
    %27 = arith.negf %26 : vector<2x128xf32>
    %28 = math.exp %27 : vector<2x128xf32>
    %cst_15 = arith.constant 1.000000e+00 : f32
    %29 = vector.broadcast %cst_15 : f32 to vector<2x128xf32>
    %30 = arith.addf %29, %28 : vector<2x128xf32>
    %31 = arith.divf %29, %30 : vector<2x128xf32>
    %32 = vector.extract_strided_slice %11 {offsets = [0, 256], sizes = [2, 128], strides = [1, 1]} : vector<2x384xf32> to vector<2x128xf32>
    %33 = vector.extract_strided_slice %15 {offsets = [0, 256], sizes = [2, 128], strides = [1, 1]} : vector<2x384xf32> to vector<2x128xf32>
    %34 = arith.mulf %23, %33 : vector<2x128xf32>
    %35 = arith.addf %32, %34 : vector<2x128xf32>
    %36 = math.tanh %35 : vector<2x128xf32>
    %cst_16 = arith.constant 1.000000e+00 : f32
    %37 = vector.broadcast %cst_16 : f32 to vector<2x128xf32>
    %38 = arith.subf %37, %31 : vector<2x128xf32>
    %39 = arith.mulf %38, %36 : vector<2x128xf32>
    %40 = arith.mulf %31, %12 : vector<2x128xf32>
    %41 = arith.addf %39, %40 : vector<2x128xf32>
    %c0_17 = arith.constant 0 : index
    %c0_18 = arith.constant 0 : index
    %42 = vector.load %arg5[%c0_17, %c0_18] : memref<2x128xf32, #tpu.memory_space<vmem>>, vector<2x128xf32>
    tpu.vector_store %arg5[%c0_17, %c0_18], %41 {strides = array<i32>} : memref<2x128xf32, #tpu.memory_space<vmem>>, vector<2x128xf32>,
    %c0_19 = arith.constant 0 : index
    %43 = arith.index_cast %8 : i32 to index
    %c0_20 = arith.constant 0 : index
    %c0_21 = arith.constant 0 : index
    %44 = vector.load %arg4[%c0_19, %43, %c0_20, %c0_21] : memref<1x8x2x128xf32, #tpu.memory_space<vmem>>, vector<1x1x2x128xf32>
    %45 = vector.shape_cast %44 : vector<1x1x2x128xf32> to vector<2x128xf32>
    %46 = vector.shape_cast %41 : vector<2x128xf32> to vector<1x1x2x128xf32>
    tpu.vector_store %arg4[%c0_19, %43, %c0_20, %c0_21], %46 {strides = array<i32>} : memref<1x8x2x128xf32, #tpu.memory_space<vmem>>, vector<1x1x2x128xf32>,
    %c1_i32 = arith.constant 1 : i32
    %c0_i32_22 = arith.constant 0 : i32
    %47 = arith.cmpi eq, %arg0, %c0_i32_22 : i32
    %c7_i32_23 = arith.constant 7 : i32
    %48 = arith.subi %c7_i32_23, %c1_i32 : i32
    %49 = arith.select %47, %c1_i32, %48 : i32
    %c0_24 = arith.constant 0 : index
    %50 = arith.index_cast %49 : i32 to index
    %c0_25 = arith.constant 0 : index
    %c0_26 = arith.constant 0 : index
    %51 = vector.load %arg1[%c0_24, %50, %c0_25, %c0_26] : memref<1x8x2x384xf32, #tpu.memory_space<vmem>>, vector<1x1x2x384xf32>
    %52 = vector.shape_cast %51 : vector<1x1x2x384xf32> to vector<2x384xf32>
    %c0_27 = arith.constant 0 : index
    %c0_28 = arith.constant 0 : index
    %53 = vector.load %arg5[%c0_27, %c0_28] : memref<2x128xf32, #tpu.memory_space<vmem>>, vector<2x128xf32>
    %cst_29 = arith.constant dense<0.000000e+00> : vector<2x384xf32>
    %54 = tpu.matmul %53, %3, %cst_29 {dimension_numbers = #tpu.dot_dimension_numbers<[1], [0], [0], [1], [0, 0, 1, 1], [], []>} : vector<2x128xf32>, vector<128x384xf32>, vector<2x384xf32> -> vector<2x384xf32>
    %55 = vector.broadcast %5 : vector<1x384xf32> to vector<2x384xf32>
    %56 = arith.addf %54, %55 : vector<2x384xf32>
    %57 = vector.extract_strided_slice %52 {offsets = [0, 0], sizes = [2, 128], strides = [1, 1]} : vector<2x384xf32> to vector<2x128xf32>
    %58 = vector.extract_strided_slice %56 {offsets = [0, 0], sizes = [2, 128], strides = [1, 1]} : vector<2x384xf32> to vector<2x128xf32>
    %59 = arith.addf %57, %58 : vector<2x128xf32>
    %60 = arith.negf %59 : vector<2x128xf32>
    %61 = math.exp %60 : vector<2x128xf32>
    %cst_30 = arith.constant 1.000000e+00 : f32
    %62 = vector.broadcast %cst_30 : f32 to vector<2x128xf32>
    %63 = arith.addf %62, %61 : vector<2x128xf32>
    %64 = arith.divf %62, %63 : vector<2x128xf32>
    %65 = vector.extract_strided_slice %52 {offsets = [0, 128], sizes = [2, 128], strides = [1, 1]} : vector<2x384xf32> to vector<2x128xf32>
    %66 = vector.extract_strided_slice %56 {offsets = [0, 128], sizes = [2, 128], strides = [1, 1]} : vector<2x384xf32> to vector<2x128xf32>
    %67 = arith.addf %65, %66 : vector<2x128xf32>
    %68 = arith.negf %67 : vector<2x128xf32>
    %69 = math.exp %68 : vector<2x128xf32>
    %cst_31 = arith.constant 1.000000e+00 : f32
    %70 = vector.broadcast %cst_31 : f32 to vector<2x128xf32>
    %71 = arith.addf %70, %69 : vector<2x128xf32>
    %72 = arith.divf %70, %71 : vector<2x128xf32>
    %73 = vector.extract_strided_slice %52 {offsets = [0, 256], sizes = [2, 128], strides = [1, 1]} : vector<2x384xf32> to vector<2x128xf32>
    %74 = vector.extract_strided_slice %56 {offsets = [0, 256], sizes = [2, 128], strides = [1, 1]} : vector<2x384xf32> to vector<2x128xf32>
    %75 = arith.mulf %64, %74 : vector<2x128xf32>
    %76 = arith.addf %73, %75 : vector<2x128xf32>
    %77 = math.tanh %76 : vector<2x128xf32>
    %cst_32 = arith.constant 1.000000e+00 : f32
    %78 = vector.broadcast %cst_32 : f32 to vector<2x128xf32>
    %79 = arith.subf %78, %72 : vector<2x128xf32>
    %80 = arith.mulf %79, %77 : vector<2x128xf32>
    %81 = arith.mulf %72, %53 : vector<2x128xf32>
    %82 = arith.addf %80, %81 : vector<2x128xf32>
    %c0_33 = arith.constant 0 : index
    %c0_34 = arith.constant 0 : index
    %83 = vector.load %arg5[%c0_33, %c0_34] : memref<2x128xf32, #tpu.memory_space<vmem>>, vector<2x128xf32>
    tpu.vector_store %arg5[%c0_33, %c0_34], %82 {strides = array<i32>} : memref<2x128xf32, #tpu.memory_space<vmem>>, vector<2x128xf32>,
    %c0_35 = arith.constant 0 : index
    %84 = arith.index_cast %49 : i32 to index
    %c0_36 = arith.constant 0 : index
    %c0_37 = arith.constant 0 : index
    %85 = vector.load %arg4[%c0_35, %84, %c0_36, %c0_37] : memref<1x8x2x128xf32, #tpu.memory_space<vmem>>, vector<1x1x2x128xf32>
    %86 = vector.shape_cast %85 : vector<1x1x2x128xf32> to vector<2x128xf32>
    %87 = vector.shape_cast %82 : vector<2x128xf32> to vector<1x1x2x128xf32>
    tpu.vector_store %arg4[%c0_35, %84, %c0_36, %c0_37], %87 {strides = array<i32>} : memref<1x8x2x128xf32, #tpu.memory_space<vmem>>, vector<1x1x2x128xf32>,
    %c2_i32 = arith.constant 2 : i32
    %c0_i32_38 = arith.constant 0 : i32
    %88 = arith.cmpi eq, %arg0, %c0_i32_38 : i32
    %c7_i32_39 = arith.constant 7 : i32
    %89 = arith.subi %c7_i32_39, %c2_i32 : i32
    %90 = arith.select %88, %c2_i32, %89 : i32
    %c0_40 = arith.constant 0 : index
    %91 = arith.index_cast %90 : i32 to index
    %c0_41 = arith.constant 0 : index
    %c0_42 = arith.constant 0 : index
    %92 = vector.load %arg1[%c0_40, %91, %c0_41, %c0_42] : memref<1x8x2x384xf32, #tpu.memory_space<vmem>>, vector<1x1x2x384xf32>
    %93 = vector.shape_cast %92 : vector<1x1x2x384xf32> to vector<2x384xf32>
    %c0_43 = arith.constant 0 : index
    %c0_44 = arith.constant 0 : index
    %94 = vector.load %arg5[%c0_43, %c0_44] : memref<2x128xf32, #tpu.memory_space<vmem>>, vector<2x128xf32>
    %cst_45 = arith.constant dense<0.000000e+00> : vector<2x384xf32>
    %95 = tpu.matmul %94, %3, %cst_45 {dimension_numbers = #tpu.dot_dimension_numbers<[1], [0], [0], [1], [0, 0, 1, 1], [], []>} : vector<2x128xf32>, vector<128x384xf32>, vector<2x384xf32> -> vector<2x384xf32>
    %96 = vector.broadcast %5 : vector<1x384xf32> to vector<2x384xf32>
    %97 = arith.addf %95, %96 : vector<2x384xf32>
    %98 = vector.extract_strided_slice %93 {offsets = [0, 0], sizes = [2, 128], strides = [1, 1]} : vector<2x384xf32> to vector<2x128xf32>
    %99 = vector.extract_strided_slice %97 {offsets = [0, 0], sizes = [2, 128], strides = [1, 1]} : vector<2x384xf32> to vector<2x128xf32>
    %100 = arith.addf %98, %99 : vector<2x128xf32>
    %101 = arith.negf %100 : vector<2x128xf32>
    %102 = math.exp %101 : vector<2x128xf32>
    %cst_46 = arith.constant 1.000000e+00 : f32
    %103 = vector.broadcast %cst_46 : f32 to vector<2x128xf32>
    %104 = arith.addf %103, %102 : vector<2x128xf32>
    %105 = arith.divf %103, %104 : vector<2x128xf32>
    %106 = vector.extract_strided_slice %93 {offsets = [0, 128], sizes = [2, 128], strides = [1, 1]} : vector<2x384xf32> to vector<2x128xf32>
    %107 = vector.extract_strided_slice %97 {offsets = [0, 128], sizes = [2, 128], strides = [1, 1]} : vector<2x384xf32> to vector<2x128xf32>
    %108 = arith.addf %106, %107 : vector<2x128xf32>
    %109 = arith.negf %108 : vector<2x128xf32>
    %110 = math.exp %109 : vector<2x128xf32>
    %cst_47 = arith.constant 1.000000e+00 : f32
    %111 = vector.broadcast %cst_47 : f32 to vector<2x128xf32>
    %112 = arith.addf %111, %110 : vector<2x128xf32>
    %113 = arith.divf %111, %112 : vector<2x128xf32>
    %114 = vector.extract_strided_slice %93 {offsets = [0, 256], sizes = [2, 128], strides = [1, 1]} : vector<2x384xf32> to vector<2x128xf32>
    %115 = vector.extract_strided_slice %97 {offsets = [0, 256], sizes = [2, 128], strides = [1, 1]} : vector<2x384xf32> to vector<2x128xf32>
    %116 = arith.mulf %105, %115 : vector<2x128xf32>
    %117 = arith.addf %114, %116 : vector<2x128xf32>
    %118 = math.tanh %117 : vector<2x128xf32>
    %cst_48 = arith.constant 1.000000e+00 : f32
    %119 = vector.broadcast %cst_48 : f32 to vector<2x128xf32>
    %120 = arith.subf %119, %113 : vector<2x128xf32>
    %121 = arith.mulf %120, %118 : vector<2x128xf32>
    %122 = arith.mulf %113, %94 : vector<2x128xf32>
    %123 = arith.addf %121, %122 : vector<2x128xf32>
    %c0_49 = arith.constant 0 : index
    %c0_50 = arith.constant 0 : index
    %124 = vector.load %arg5[%c0_49, %c0_50] : memref<2x128xf32, #tpu.memory_space<vmem>>, vector<2x128xf32>
    tpu.vector_store %arg5[%c0_49, %c0_50], %123 {strides = array<i32>} : memref<2x128xf32, #tpu.memory_space<vmem>>, vector<2x128xf32>,
    %c0_51 = arith.constant 0 : index
    %125 = arith.index_cast %90 : i32 to index
    %c0_52 = arith.constant 0 : index
    %c0_53 = arith.constant 0 : index
    %126 = vector.load %arg4[%c0_51, %125, %c0_52, %c0_53] : memref<1x8x2x128xf32, #tpu.memory_space<vmem>>, vector<1x1x2x128xf32>
    %127 = vector.shape_cast %126 : vector<1x1x2x128xf32> to vector<2x128xf32>
    %128 = vector.shape_cast %123 : vector<2x128xf32> to vector<1x1x2x128xf32>
    tpu.vector_store %arg4[%c0_51, %125, %c0_52, %c0_53], %128 {strides = array<i32>} : memref<1x8x2x128xf32, #tpu.memory_space<vmem>>, vector<1x1x2x128xf32>,
    %c3_i32 = arith.constant 3 : i32
    %c0_i32_54 = arith.constant 0 : i32
    %129 = arith.cmpi eq, %arg0, %c0_i32_54 : i32
    %c7_i32_55 = arith.constant 7 : i32
    %130 = arith.subi %c7_i32_55, %c3_i32 : i32
    %131 = arith.select %129, %c3_i32, %130 : i32
    %c0_56 = arith.constant 0 : index
    %132 = arith.index_cast %131 : i32 to index
    %c0_57 = arith.constant 0 : index
    %c0_58 = arith.constant 0 : index
    %133 = vector.load %arg1[%c0_56, %132, %c0_57, %c0_58] : memref<1x8x2x384xf32, #tpu.memory_space<vmem>>, vector<1x1x2x384xf32>
    %134 = vector.shape_cast %133 : vector<1x1x2x384xf32> to vector<2x384xf32>
    %c0_59 = arith.constant 0 : index
    %c0_60 = arith.constant 0 : index
    %135 = vector.load %arg5[%c0_59, %c0_60] : memref<2x128xf32, #tpu.memory_space<vmem>>, vector<2x128xf32>
    %cst_61 = arith.constant dense<0.000000e+00> : vector<2x384xf32>
    %136 = tpu.matmul %135, %3, %cst_61 {dimension_numbers = #tpu.dot_dimension_numbers<[1], [0], [0], [1], [0, 0, 1, 1], [], []>} : vector<2x128xf32>, vector<128x384xf32>, vector<2x384xf32> -> vector<2x384xf32>
    %137 = vector.broadcast %5 : vector<1x384xf32> to vector<2x384xf32>
    %138 = arith.addf %136, %137 : vector<2x384xf32>
    %139 = vector.extract_strided_slice %134 {offsets = [0, 0], sizes = [2, 128], strides = [1, 1]} : vector<2x384xf32> to vector<2x128xf32>
    %140 = vector.extract_strided_slice %138 {offsets = [0, 0], sizes = [2, 128], strides = [1, 1]} : vector<2x384xf32> to vector<2x128xf32>
    %141 = arith.addf %139, %140 : vector<2x128xf32>
    %142 = arith.negf %141 : vector<2x128xf32>
    %143 = math.exp %142 : vector<2x128xf32>
    %cst_62 = arith.constant 1.000000e+00 : f32
    %144 = vector.broadcast %cst_62 : f32 to vector<2x128xf32>
    %145 = arith.addf %144, %143 : vector<2x128xf32>
    %146 = arith.divf %144, %145 : vector<2x128xf32>
    %147 = vector.extract_strided_slice %134 {offsets = [0, 128], sizes = [2, 128], strides = [1, 1]} : vector<2x384xf32> to vector<2x128xf32>
    %148 = vector.extract_strided_slice %138 {offsets = [0, 128], sizes = [2, 128], strides = [1, 1]} : vector<2x384xf32> to vector<2x128xf32>
    %149 = arith.addf %147, %148 : vector<2x128xf32>
    %150 = arith.negf %149 : vector<2x128xf32>
    %151 = math.exp %150 : vector<2x128xf32>
    %cst_63 = arith.constant 1.000000e+00 : f32
    %152 = vector.broadcast %cst_63 : f32 to vector<2x128xf32>
    %153 = arith.addf %152, %151 : vector<2x128xf32>
    %154 = arith.divf %152, %153 : vector<2x128xf32>
    %155 = vector.extract_strided_slice %134 {offsets = [0, 256], sizes = [2, 128], strides = [1, 1]} : vector<2x384xf32> to vector<2x128xf32>
    %156 = vector.extract_strided_slice %138 {offsets = [0, 256], sizes = [2, 128], strides = [1, 1]} : vector<2x384xf32> to vector<2x128xf32>
    %157 = arith.mulf %146, %156 : vector<2x128xf32>
    %158 = arith.addf %155, %157 : vector<2x128xf32>
    %159 = math.tanh %158 : vector<2x128xf32>
    %cst_64 = arith.constant 1.000000e+00 : f32
    %160 = vector.broadcast %cst_64 : f32 to vector<2x128xf32>
    %161 = arith.subf %160, %154 : vector<2x128xf32>
    %162 = arith.mulf %161, %159 : vector<2x128xf32>
    %163 = arith.mulf %154, %135 : vector<2x128xf32>
    %164 = arith.addf %162, %163 : vector<2x128xf32>
    %c0_65 = arith.constant 0 : index
    %c0_66 = arith.constant 0 : index
    %165 = vector.load %arg5[%c0_65, %c0_66] : memref<2x128xf32, #tpu.memory_space<vmem>>, vector<2x128xf32>
    tpu.vector_store %arg5[%c0_65, %c0_66], %164 {strides = array<i32>} : memref<2x128xf32, #tpu.memory_space<vmem>>, vector<2x128xf32>,
    %c0_67 = arith.constant 0 : index
    %166 = arith.index_cast %131 : i32 to index
    %c0_68 = arith.constant 0 : index
    %c0_69 = arith.constant 0 : index
    %167 = vector.load %arg4[%c0_67, %166, %c0_68, %c0_69] : memref<1x8x2x128xf32, #tpu.memory_space<vmem>>, vector<1x1x2x128xf32>
    %168 = vector.shape_cast %167 : vector<1x1x2x128xf32> to vector<2x128xf32>
    %169 = vector.shape_cast %164 : vector<2x128xf32> to vector<1x1x2x128xf32>
    tpu.vector_store %arg4[%c0_67, %166, %c0_68, %c0_69], %169 {strides = array<i32>} : memref<1x8x2x128xf32, #tpu.memory_space<vmem>>, vector<1x1x2x128xf32>,
    %c4_i32 = arith.constant 4 : i32
    %c0_i32_70 = arith.constant 0 : i32
    %170 = arith.cmpi eq, %arg0, %c0_i32_70 : i32
    %c7_i32_71 = arith.constant 7 : i32
    %171 = arith.subi %c7_i32_71, %c4_i32 : i32
    %172 = arith.select %170, %c4_i32, %171 : i32
    %c0_72 = arith.constant 0 : index
    %173 = arith.index_cast %172 : i32 to index
    %c0_73 = arith.constant 0 : index
    %c0_74 = arith.constant 0 : index
    %174 = vector.load %arg1[%c0_72, %173, %c0_73, %c0_74] : memref<1x8x2x384xf32, #tpu.memory_space<vmem>>, vector<1x1x2x384xf32>
    %175 = vector.shape_cast %174 : vector<1x1x2x384xf32> to vector<2x384xf32>
    %c0_75 = arith.constant 0 : index
    %c0_76 = arith.constant 0 : index
    %176 = vector.load %arg5[%c0_75, %c0_76] : memref<2x128xf32, #tpu.memory_space<vmem>>, vector<2x128xf32>
    %cst_77 = arith.constant dense<0.000000e+00> : vector<2x384xf32>
    %177 = tpu.matmul %176, %3, %cst_77 {dimension_numbers = #tpu.dot_dimension_numbers<[1], [0], [0], [1], [0, 0, 1, 1], [], []>} : vector<2x128xf32>, vector<128x384xf32>, vector<2x384xf32> -> vector<2x384xf32>
    %178 = vector.broadcast %5 : vector<1x384xf32> to vector<2x384xf32>
    %179 = arith.addf %177, %178 : vector<2x384xf32>
    %180 = vector.extract_strided_slice %175 {offsets = [0, 0], sizes = [2, 128], strides = [1, 1]} : vector<2x384xf32> to vector<2x128xf32>
    %181 = vector.extract_strided_slice %179 {offsets = [0, 0], sizes = [2, 128], strides = [1, 1]} : vector<2x384xf32> to vector<2x128xf32>
    %182 = arith.addf %180, %181 : vector<2x128xf32>
    %183 = arith.negf %182 : vector<2x128xf32>
    %184 = math.exp %183 : vector<2x128xf32>
    %cst_78 = arith.constant 1.000000e+00 : f32
    %185 = vector.broadcast %cst_78 : f32 to vector<2x128xf32>
    %186 = arith.addf %185, %184 : vector<2x128xf32>
    %187 = arith.divf %185, %186 : vector<2x128xf32>
    %188 = vector.extract_strided_slice %175 {offsets = [0, 128], sizes = [2, 128], strides = [1, 1]} : vector<2x384xf32> to vector<2x128xf32>
    %189 = vector.extract_strided_slice %179 {offsets = [0, 128], sizes = [2, 128], strides = [1, 1]} : vector<2x384xf32> to vector<2x128xf32>
    %190 = arith.addf %188, %189 : vector<2x128xf32>
    %191 = arith.negf %190 : vector<2x128xf32>
    %192 = math.exp %191 : vector<2x128xf32>
    %cst_79 = arith.constant 1.000000e+00 : f32
    %193 = vector.broadcast %cst_79 : f32 to vector<2x128xf32>
    %194 = arith.addf %193, %192 : vector<2x128xf32>
    %195 = arith.divf %193, %194 : vector<2x128xf32>
    %196 = vector.extract_strided_slice %175 {offsets = [0, 256], sizes = [2, 128], strides = [1, 1]} : vector<2x384xf32> to vector<2x128xf32>
    %197 = vector.extract_strided_slice %179 {offsets = [0, 256], sizes = [2, 128], strides = [1, 1]} : vector<2x384xf32> to vector<2x128xf32>
    %198 = arith.mulf %187, %197 : vector<2x128xf32>
    %199 = arith.addf %196, %198 : vector<2x128xf32>
    %200 = math.tanh %199 : vector<2x128xf32>
    %cst_80 = arith.constant 1.000000e+00 : f32
    %201 = vector.broadcast %cst_80 : f32 to vector<2x128xf32>
    %202 = arith.subf %201, %195 : vector<2x128xf32>
    %203 = arith.mulf %202, %200 : vector<2x128xf32>
    %204 = arith.mulf %195, %176 : vector<2x128xf32>
    %205 = arith.addf %203, %204 : vector<2x128xf32>
    %c0_81 = arith.constant 0 : index
    %c0_82 = arith.constant 0 : index
    %206 = vector.load %arg5[%c0_81, %c0_82] : memref<2x128xf32, #tpu.memory_space<vmem>>, vector<2x128xf32>
    tpu.vector_store %arg5[%c0_81, %c0_82], %205 {strides = array<i32>} : memref<2x128xf32, #tpu.memory_space<vmem>>, vector<2x128xf32>,
    %c0_83 = arith.constant 0 : index
    %207 = arith.index_cast %172 : i32 to index
    %c0_84 = arith.constant 0 : index
    %c0_85 = arith.constant 0 : index
    %208 = vector.load %arg4[%c0_83, %207, %c0_84, %c0_85] : memref<1x8x2x128xf32, #tpu.memory_space<vmem>>, vector<1x1x2x128xf32>
    %209 = vector.shape_cast %208 : vector<1x1x2x128xf32> to vector<2x128xf32>
    %210 = vector.shape_cast %205 : vector<2x128xf32> to vector<1x1x2x128xf32>
    tpu.vector_store %arg4[%c0_83, %207, %c0_84, %c0_85], %210 {strides = array<i32>} : memref<1x8x2x128xf32, #tpu.memory_space<vmem>>, vector<1x1x2x128xf32>,
    %c5_i32 = arith.constant 5 : i32
    %c0_i32_86 = arith.constant 0 : i32
    %211 = arith.cmpi eq, %arg0, %c0_i32_86 : i32
    %c7_i32_87 = arith.constant 7 : i32
    %212 = arith.subi %c7_i32_87, %c5_i32 : i32
    %213 = arith.select %211, %c5_i32, %212 : i32
    %c0_88 = arith.constant 0 : index
    %214 = arith.index_cast %213 : i32 to index
    %c0_89 = arith.constant 0 : index
    %c0_90 = arith.constant 0 : index
    %215 = vector.load %arg1[%c0_88, %214, %c0_89, %c0_90] : memref<1x8x2x384xf32, #tpu.memory_space<vmem>>, vector<1x1x2x384xf32>
    %216 = vector.shape_cast %215 : vector<1x1x2x384xf32> to vector<2x384xf32>
    %c0_91 = arith.constant 0 : index
    %c0_92 = arith.constant 0 : index
    %217 = vector.load %arg5[%c0_91, %c0_92] : memref<2x128xf32, #tpu.memory_space<vmem>>, vector<2x128xf32>
    %cst_93 = arith.constant dense<0.000000e+00> : vector<2x384xf32>
    %218 = tpu.matmul %217, %3, %cst_93 {dimension_numbers = #tpu.dot_dimension_numbers<[1], [0], [0], [1], [0, 0, 1, 1], [], []>} : vector<2x128xf32>, vector<128x384xf32>, vector<2x384xf32> -> vector<2x384xf32>
    %219 = vector.broadcast %5 : vector<1x384xf32> to vector<2x384xf32>
    %220 = arith.addf %218, %219 : vector<2x384xf32>
    %221 = vector.extract_strided_slice %216 {offsets = [0, 0], sizes = [2, 128], strides = [1, 1]} : vector<2x384xf32> to vector<2x128xf32>
    %222 = vector.extract_strided_slice %220 {offsets = [0, 0], sizes = [2, 128], strides = [1, 1]} : vector<2x384xf32> to vector<2x128xf32>
    %223 = arith.addf %221, %222 : vector<2x128xf32>
    %224 = arith.negf %223 : vector<2x128xf32>
    %225 = math.exp %224 : vector<2x128xf32>
    %cst_94 = arith.constant 1.000000e+00 : f32
    %226 = vector.broadcast %cst_94 : f32 to vector<2x128xf32>
    %227 = arith.addf %226, %225 : vector<2x128xf32>
    %228 = arith.divf %226, %227 : vector<2x128xf32>
    %229 = vector.extract_strided_slice %216 {offsets = [0, 128], sizes = [2, 128], strides = [1, 1]} : vector<2x384xf32> to vector<2x128xf32>
    %230 = vector.extract_strided_slice %220 {offsets = [0, 128], sizes = [2, 128], strides = [1, 1]} : vector<2x384xf32> to vector<2x128xf32>
    %231 = arith.addf %229, %230 : vector<2x128xf32>
    %232 = arith.negf %231 : vector<2x128xf32>
    %233 = math.exp %232 : vector<2x128xf32>
    %cst_95 = arith.constant 1.000000e+00 : f32
    %234 = vector.broadcast %cst_95 : f32 to vector<2x128xf32>
    %235 = arith.addf %234, %233 : vector<2x128xf32>
    %236 = arith.divf %234, %235 : vector<2x128xf32>
    %237 = vector.extract_strided_slice %216 {offsets = [0, 256], sizes = [2, 128], strides = [1, 1]} : vector<2x384xf32> to vector<2x128xf32>
    %238 = vector.extract_strided_slice %220 {offsets = [0, 256], sizes = [2, 128], strides = [1, 1]} : vector<2x384xf32> to vector<2x128xf32>
    %239 = arith.mulf %228, %238 : vector<2x128xf32>
    %240 = arith.addf %237, %239 : vector<2x128xf32>
    %241 = math.tanh %240 : vector<2x128xf32>
    %cst_96 = arith.constant 1.000000e+00 : f32
    %242 = vector.broadcast %cst_96 : f32 to vector<2x128xf32>
    %243 = arith.subf %242, %236 : vector<2x128xf32>
    %244 = arith.mulf %243, %241 : vector<2x128xf32>
    %245 = arith.mulf %236, %217 : vector<2x128xf32>
    %246 = arith.addf %244, %245 : vector<2x128xf32>
    %c0_97 = arith.constant 0 : index
    %c0_98 = arith.constant 0 : index
    %247 = vector.load %arg5[%c0_97, %c0_98] : memref<2x128xf32, #tpu.memory_space<vmem>>, vector<2x128xf32>
    tpu.vector_store %arg5[%c0_97, %c0_98], %246 {strides = array<i32>} : memref<2x128xf32, #tpu.memory_space<vmem>>, vector<2x128xf32>,
    %c0_99 = arith.constant 0 : index
    %248 = arith.index_cast %213 : i32 to index
    %c0_100 = arith.constant 0 : index
    %c0_101 = arith.constant 0 : index
    %249 = vector.load %arg4[%c0_99, %248, %c0_100, %c0_101] : memref<1x8x2x128xf32, #tpu.memory_space<vmem>>, vector<1x1x2x128xf32>
    %250 = vector.shape_cast %249 : vector<1x1x2x128xf32> to vector<2x128xf32>
    %251 = vector.shape_cast %246 : vector<2x128xf32> to vector<1x1x2x128xf32>
    tpu.vector_store %arg4[%c0_99, %248, %c0_100, %c0_101], %251 {strides = array<i32>} : memref<1x8x2x128xf32, #tpu.memory_space<vmem>>, vector<1x1x2x128xf32>,
    %c6_i32 = arith.constant 6 : i32
    %c0_i32_102 = arith.constant 0 : i32
    %252 = arith.cmpi eq, %arg0, %c0_i32_102 : i32
    %c7_i32_103 = arith.constant 7 : i32
    %253 = arith.subi %c7_i32_103, %c6_i32 : i32
    %254 = arith.select %252, %c6_i32, %253 : i32
    %c0_104 = arith.constant 0 : index
    %255 = arith.index_cast %254 : i32 to index
    %c0_105 = arith.constant 0 : index
    %c0_106 = arith.constant 0 : index
    %256 = vector.load %arg1[%c0_104, %255, %c0_105, %c0_106] : memref<1x8x2x384xf32, #tpu.memory_space<vmem>>, vector<1x1x2x384xf32>
    %257 = vector.shape_cast %256 : vector<1x1x2x384xf32> to vector<2x384xf32>
    %c0_107 = arith.constant 0 : index
    %c0_108 = arith.constant 0 : index
    %258 = vector.load %arg5[%c0_107, %c0_108] : memref<2x128xf32, #tpu.memory_space<vmem>>, vector<2x128xf32>
    %cst_109 = arith.constant dense<0.000000e+00> : vector<2x384xf32>
    %259 = tpu.matmul %258, %3, %cst_109 {dimension_numbers = #tpu.dot_dimension_numbers<[1], [0], [0], [1], [0, 0, 1, 1], [], []>} : vector<2x128xf32>, vector<128x384xf32>, vector<2x384xf32> -> vector<2x384xf32>
    %260 = vector.broadcast %5 : vector<1x384xf32> to vector<2x384xf32>
    %261 = arith.addf %259, %260 : vector<2x384xf32>
    %262 = vector.extract_strided_slice %257 {offsets = [0, 0], sizes = [2, 128], strides = [1, 1]} : vector<2x384xf32> to vector<2x128xf32>
    %263 = vector.extract_strided_slice %261 {offsets = [0, 0], sizes = [2, 128], strides = [1, 1]} : vector<2x384xf32> to vector<2x128xf32>
    %264 = arith.addf %262, %263 : vector<2x128xf32>
    %265 = arith.negf %264 : vector<2x128xf32>
    %266 = math.exp %265 : vector<2x128xf32>
    %cst_110 = arith.constant 1.000000e+00 : f32
    %267 = vector.broadcast %cst_110 : f32 to vector<2x128xf32>
    %268 = arith.addf %267, %266 : vector<2x128xf32>
    %269 = arith.divf %267, %268 : vector<2x128xf32>
    %270 = vector.extract_strided_slice %257 {offsets = [0, 128], sizes = [2, 128], strides = [1, 1]} : vector<2x384xf32> to vector<2x128xf32>
    %271 = vector.extract_strided_slice %261 {offsets = [0, 128], sizes = [2, 128], strides = [1, 1]} : vector<2x384xf32> to vector<2x128xf32>
    %272 = arith.addf %270, %271 : vector<2x128xf32>
    %273 = arith.negf %272 : vector<2x128xf32>
    %274 = math.exp %273 : vector<2x128xf32>
    %cst_111 = arith.constant 1.000000e+00 : f32
    %275 = vector.broadcast %cst_111 : f32 to vector<2x128xf32>
    %276 = arith.addf %275, %274 : vector<2x128xf32>
    %277 = arith.divf %275, %276 : vector<2x128xf32>
    %278 = vector.extract_strided_slice %257 {offsets = [0, 256], sizes = [2, 128], strides = [1, 1]} : vector<2x384xf32> to vector<2x128xf32>
    %279 = vector.extract_strided_slice %261 {offsets = [0, 256], sizes = [2, 128], strides = [1, 1]} : vector<2x384xf32> to vector<2x128xf32>
    %280 = arith.mulf %269, %279 : vector<2x128xf32>
    %281 = arith.addf %278, %280 : vector<2x128xf32>
    %282 = math.tanh %281 : vector<2x128xf32>
    %cst_112 = arith.constant 1.000000e+00 : f32
    %283 = vector.broadcast %cst_112 : f32 to vector<2x128xf32>
    %284 = arith.subf %283, %277 : vector<2x128xf32>
    %285 = arith.mulf %284, %282 : vector<2x128xf32>
    %286 = arith.mulf %277, %258 : vector<2x128xf32>
    %287 = arith.addf %285, %286 : vector<2x128xf32>
    %c0_113 = arith.constant 0 : index
    %c0_114 = arith.constant 0 : index
    %288 = vector.load %arg5[%c0_113, %c0_114] : memref<2x128xf32, #tpu.memory_space<vmem>>, vector<2x128xf32>
    tpu.vector_store %arg5[%c0_113, %c0_114], %287 {strides = array<i32>} : memref<2x128xf32, #tpu.memory_space<vmem>>, vector<2x128xf32>,
    %c0_115 = arith.constant 0 : index
    %289 = arith.index_cast %254 : i32 to index
    %c0_116 = arith.constant 0 : index
    %c0_117 = arith.constant 0 : index
    %290 = vector.load %arg4[%c0_115, %289, %c0_116, %c0_117] : memref<1x8x2x128xf32, #tpu.memory_space<vmem>>, vector<1x1x2x128xf32>
    %291 = vector.shape_cast %290 : vector<1x1x2x128xf32> to vector<2x128xf32>
    %292 = vector.shape_cast %287 : vector<2x128xf32> to vector<1x1x2x128xf32>
    tpu.vector_store %arg4[%c0_115, %289, %c0_116, %c0_117], %292 {strides = array<i32>} : memref<1x8x2x128xf32, #tpu.memory_space<vmem>>, vector<1x1x2x128xf32>,
    %c7_i32_118 = arith.constant 7 : i32
    %c0_i32_119 = arith.constant 0 : i32
    %293 = arith.cmpi eq, %arg0, %c0_i32_119 : i32
    %c7_i32_120 = arith.constant 7 : i32
    %294 = arith.subi %c7_i32_120, %c7_i32_118 : i32
    %295 = arith.select %293, %c7_i32_118, %294 : i32
    %c0_121 = arith.constant 0 : index
    %296 = arith.index_cast %295 : i32 to index
    %c0_122 = arith.constant 0 : index
    %c0_123 = arith.constant 0 : index
    %297 = vector.load %arg1[%c0_121, %296, %c0_122, %c0_123] : memref<1x8x2x384xf32, #tpu.memory_space<vmem>>, vector<1x1x2x384xf32>
    %298 = vector.shape_cast %297 : vector<1x1x2x384xf32> to vector<2x384xf32>
    %c0_124 = arith.constant 0 : index
    %c0_125 = arith.constant 0 : index
    %299 = vector.load %arg5[%c0_124, %c0_125] : memref<2x128xf32, #tpu.memory_space<vmem>>, vector<2x128xf32>
    %cst_126 = arith.constant dense<0.000000e+00> : vector<2x384xf32>
    %300 = tpu.matmul %299, %3, %cst_126 {dimension_numbers = #tpu.dot_dimension_numbers<[1], [0], [0], [1], [0, 0, 1, 1], [], []>} : vector<2x128xf32>, vector<128x384xf32>, vector<2x384xf32> -> vector<2x384xf32>
    %301 = vector.broadcast %5 : vector<1x384xf32> to vector<2x384xf32>
    %302 = arith.addf %300, %301 : vector<2x384xf32>
    %303 = vector.extract_strided_slice %298 {offsets = [0, 0], sizes = [2, 128], strides = [1, 1]} : vector<2x384xf32> to vector<2x128xf32>
    %304 = vector.extract_strided_slice %302 {offsets = [0, 0], sizes = [2, 128], strides = [1, 1]} : vector<2x384xf32> to vector<2x128xf32>
    %305 = arith.addf %303, %304 : vector<2x128xf32>
    %306 = arith.negf %305 : vector<2x128xf32>
    %307 = math.exp %306 : vector<2x128xf32>
    %cst_127 = arith.constant 1.000000e+00 : f32
    %308 = vector.broadcast %cst_127 : f32 to vector<2x128xf32>
    %309 = arith.addf %308, %307 : vector<2x128xf32>
    %310 = arith.divf %308, %309 : vector<2x128xf32>
    %311 = vector.extract_strided_slice %298 {offsets = [0, 128], sizes = [2, 128], strides = [1, 1]} : vector<2x384xf32> to vector<2x128xf32>
    %312 = vector.extract_strided_slice %302 {offsets = [0, 128], sizes = [2, 128], strides = [1, 1]} : vector<2x384xf32> to vector<2x128xf32>
    %313 = arith.addf %311, %312 : vector<2x128xf32>
    %314 = arith.negf %313 : vector<2x128xf32>
    %315 = math.exp %314 : vector<2x128xf32>
    %cst_128 = arith.constant 1.000000e+00 : f32
    %316 = vector.broadcast %cst_128 : f32 to vector<2x128xf32>
    %317 = arith.addf %316, %315 : vector<2x128xf32>
    %318 = arith.divf %316, %317 : vector<2x128xf32>
    %319 = vector.extract_strided_slice %298 {offsets = [0, 256], sizes = [2, 128], strides = [1, 1]} : vector<2x384xf32> to vector<2x128xf32>
    %320 = vector.extract_strided_slice %302 {offsets = [0, 256], sizes = [2, 128], strides = [1, 1]} : vector<2x384xf32> to vector<2x128xf32>
    %321 = arith.mulf %310, %320 : vector<2x128xf32>
    %322 = arith.addf %319, %321 : vector<2x128xf32>
    %323 = math.tanh %322 : vector<2x128xf32>
    %cst_129 = arith.constant 1.000000e+00 : f32
    %324 = vector.broadcast %cst_129 : f32 to vector<2x128xf32>
    %325 = arith.subf %324, %318 : vector<2x128xf32>
    %326 = arith.mulf %325, %323 : vector<2x128xf32>
    %327 = arith.mulf %318, %299 : vector<2x128xf32>
    %328 = arith.addf %326, %327 : vector<2x128xf32>
    %c0_130 = arith.constant 0 : index
    %c0_131 = arith.constant 0 : index
    %329 = vector.load %arg5[%c0_130, %c0_131] : memref<2x128xf32, #tpu.memory_space<vmem>>, vector<2x128xf32>
    tpu.vector_store %arg5[%c0_130, %c0_131], %328 {strides = array<i32>} : memref<2x128xf32, #tpu.memory_space<vmem>>, vector<2x128xf32>,
    %c0_132 = arith.constant 0 : index
    %330 = arith.index_cast %295 : i32 to index
    %c0_133 = arith.constant 0 : index
    %c0_134 = arith.constant 0 : index
    %331 = vector.load %arg4[%c0_132, %330, %c0_133, %c0_134] : memref<1x8x2x128xf32, #tpu.memory_space<vmem>>, vector<1x1x2x128xf32>
    %332 = vector.shape_cast %331 : vector<1x1x2x128xf32> to vector<2x128xf32>
    %333 = vector.shape_cast %328 : vector<2x128xf32> to vector<1x1x2x128xf32>
    tpu.vector_store %arg4[%c0_132, %330, %c0_133, %c0_134], %333 {strides = array<i32>} : memref<1x8x2x128xf32, #tpu.memory_space<vmem>>, vector<1x1x2x128xf32>,
    %c8_i32 = arith.constant 8 : i32
    return
  }
  func.func @transform_0(%arg0: i32) -> (i32, i32, i32, i32) {
    %c0_i32 = arith.constant 0 : i32
    %c0_i32_0 = arith.constant 0 : i32
    %c0_i32_1 = arith.constant 0 : i32
    %c0_i32_2 = arith.constant 0 : i32
    return %arg0, %c0_i32, %c0_i32_0, %c0_i32_1 : i32, i32, i32, i32
  }
  func.func @transform_1(%arg0: i32) -> (i32, i32, i32) {
    %c0_i32 = arith.constant 0 : i32
    %c0_i32_0 = arith.constant 0 : i32
    %c0_i32_1 = arith.constant 0 : i32
    return %arg0, %c0_i32, %c0_i32_0 : i32, i32, i32
  }
  func.func @transform_2(%arg0: i32) -> (i32, i32, i32) {
    %c0_i32 = arith.constant 0 : i32
    %c0_i32_0 = arith.constant 0 : i32
    %c0_i32_1 = arith.constant 0 : i32
    return %arg0, %c0_i32, %c0_i32_0 : i32, i32, i32
  }
  func.func @transform_3(%arg0: i32) -> (i32, i32, i32, i32) {
    %c0_i32 = arith.constant 0 : i32
    %c0_i32_0 = arith.constant 0 : i32
    %c0_i32_1 = arith.constant 0 : i32
    %c0_i32_2 = arith.constant 0 : i32
    return %arg0, %c0_i32, %c0_i32_0, %c0_i32_1 : i32, i32, i32, i32
  }
}

module attributes {stable_mosaic.version = 11 : i64} {
  func.func @_input_proj_kernel(%arg0: i32, %arg1: memref<16x256xf32, #tpu.memory_space<vmem>>, %arg2: memref<1x256x384xf32, #tpu.memory_space<vmem>>, %arg3: memref<1x1x384xf32, #tpu.memory_space<vmem>>, %arg4: memref<1x16x384xf32, #tpu.memory_space<vmem>>) attributes {dimension_semantics = [#tpu.dimension_semantics<parallel>], iteration_bounds = array<i64: 2>, scalar_prefetch = 0 : i64, scratch_operands = 0 : i64, tpu.core_type = #tpu.core_type<tc>, window_params = [{pipeline_mode = #tpu.pipeline_mode<synchronous>, transform_indices = @transform_0, window_bounds = array<i64: 16, 256>}, {transform_indices = @transform_1, window_bounds = array<i64: 1, 256, 384>}, {transform_indices = @transform_2, window_bounds = array<i64: 1, 1, 384>}, {transform_indices = @transform_3, window_bounds = array<i64: 1, 16, 384>}]} {
    %c0 = arith.constant 0 : index
    %c0_0 = arith.constant 0 : index
    %0 = vector.load %arg1[%c0, %c0_0] : memref<16x256xf32, #tpu.memory_space<vmem>>, vector<16x256xf32>
    %c0_1 = arith.constant 0 : index
    %c0_2 = arith.constant 0 : index
    %c0_3 = arith.constant 0 : index
    %1 = vector.load %arg2[%c0_1, %c0_2, %c0_3] : memref<1x256x384xf32, #tpu.memory_space<vmem>>, vector<1x256x384xf32>
    %2 = vector.shape_cast %1 : vector<1x256x384xf32> to vector<256x384xf32>
    %cst = arith.constant dense<0.000000e+00> : vector<16x384xf32>
    %3 = tpu.matmul %0, %2, %cst {dimension_numbers = #tpu.dot_dimension_numbers<[1], [0], [0], [1], [0, 0, 1, 1], [], []>} : vector<16x256xf32>, vector<256x384xf32>, vector<16x384xf32> -> vector<16x384xf32>
    %c0_4 = arith.constant 0 : index
    %c0_5 = arith.constant 0 : index
    %c0_6 = arith.constant 0 : index
    %4 = vector.load %arg3[%c0_4, %c0_5, %c0_6] : memref<1x1x384xf32, #tpu.memory_space<vmem>>, vector<1x1x384xf32>
    %5 = vector.shape_cast %4 : vector<1x1x384xf32> to vector<1x384xf32>
    %6 = vector.broadcast %5 : vector<1x384xf32> to vector<16x384xf32>
    %7 = arith.addf %3, %6 : vector<16x384xf32>
    %c0_7 = arith.constant 0 : index
    %c0_8 = arith.constant 0 : index
    %c0_9 = arith.constant 0 : index
    %8 = vector.load %arg4[%c0_7, %c0_8, %c0_9] : memref<1x16x384xf32, #tpu.memory_space<vmem>>, vector<1x16x384xf32>
    %9 = vector.shape_cast %8 : vector<1x16x384xf32> to vector<16x384xf32>
    %10 = vector.shape_cast %7 : vector<16x384xf32> to vector<1x16x384xf32>
    tpu.vector_store %arg4[%c0_7, %c0_8, %c0_9], %10 {strides = array<i32>} : memref<1x16x384xf32, #tpu.memory_space<vmem>>, vector<1x16x384xf32>,
    return
  }
  func.func @transform_0(%arg0: i32) -> (i32, i32) {
    %c0_i32 = arith.constant 0 : i32
    %c0_i32_0 = arith.constant 0 : i32
    %c0_i32_1 = arith.constant 0 : i32
    return %c0_i32, %c0_i32_0 : i32, i32
  }
  func.func @transform_1(%arg0: i32) -> (i32, i32, i32) {
    %c0_i32 = arith.constant 0 : i32
    %c0_i32_0 = arith.constant 0 : i32
    %c0_i32_1 = arith.constant 0 : i32
    return %arg0, %c0_i32, %c0_i32_0 : i32, i32, i32
  }
  func.func @transform_2(%arg0: i32) -> (i32, i32, i32) {
    %c0_i32 = arith.constant 0 : i32
    %c0_i32_0 = arith.constant 0 : i32
    %c0_i32_1 = arith.constant 0 : i32
    return %arg0, %c0_i32, %c0_i32_0 : i32, i32, i32
  }
  func.func @transform_3(%arg0: i32) -> (i32, i32, i32) {
    %c0_i32 = arith.constant 0 : i32
    %c0_i32_0 = arith.constant 0 : i32
    %c0_i32_1 = arith.constant 0 : i32
    return %arg0, %c0_i32, %c0_i32_0 : i32, i32, i32
  }
}

module attributes {stable_mosaic.version = 11 : i64} {
  func.func @_gru_recurrent_kernel(%arg0: i32, %arg1: memref<1x8x2x384xf32, #tpu.memory_space<vmem>>, %arg2: memref<1x128x384xf32, #tpu.memory_space<vmem>>, %arg3: memref<1x1x384xf32, #tpu.memory_space<vmem>>, %arg4: memref<1x128x128xf32, #tpu.memory_space<vmem>>, %arg5: memref<1x8x2x128xf32, #tpu.memory_space<vmem>>, %arg6: memref<1x2x128xf32, #tpu.memory_space<vmem>>, %arg7: memref<2x128xf32, #tpu.memory_space<vmem>>) attributes {dimension_semantics = [#tpu.dimension_semantics<parallel>], iteration_bounds = array<i64: 2>, scalar_prefetch = 0 : i64, scratch_operands = 1 : i64, tpu.core_type = #tpu.core_type<tc>, window_params = [{transform_indices = @transform_0, window_bounds = array<i64: 1, 8, 2, 384>}, {transform_indices = @transform_1, window_bounds = array<i64: 1, 128, 384>}, {transform_indices = @transform_2, window_bounds = array<i64: 1, 1, 384>}, {transform_indices = @transform_3, window_bounds = array<i64: 1, 128, 128>}, {transform_indices = @transform_4, window_bounds = array<i64: 1, 8, 2, 128>}, {transform_indices = @transform_5, window_bounds = array<i64: 1, 2, 128>}]} {
    %cst = arith.constant 0.000000e+00 : f32
    %0 = vector.broadcast %cst : f32 to vector<2x128xf32>
    %c0 = arith.constant 0 : index
    %c0_0 = arith.constant 0 : index
    %1 = vector.load %arg7[%c0, %c0_0] : memref<2x128xf32, #tpu.memory_space<vmem>>, vector<2x128xf32>
    tpu.vector_store %arg7[%c0, %c0_0], %0 {strides = array<i32>} : memref<2x128xf32, #tpu.memory_space<vmem>>, vector<2x128xf32>,
    %c0_1 = arith.constant 0 : index
    %c0_2 = arith.constant 0 : index
    %c0_3 = arith.constant 0 : index
    %2 = vector.load %arg2[%c0_1, %c0_2, %c0_3] : memref<1x128x384xf32, #tpu.memory_space<vmem>>, vector<1x128x384xf32>
    %3 = vector.shape_cast %2 : vector<1x128x384xf32> to vector<128x384xf32>
    %c0_4 = arith.constant 0 : index
    %c0_5 = arith.constant 0 : index
    %c0_6 = arith.constant 0 : index
    %4 = vector.load %arg3[%c0_4, %c0_5, %c0_6] : memref<1x1x384xf32, #tpu.memory_space<vmem>>, vector<1x1x384xf32>
    %5 = vector.shape_cast %4 : vector<1x1x384xf32> to vector<1x384xf32>
    %c0_i32 = arith.constant 0 : i32
    %c0_i32_7 = arith.constant 0 : i32
    %6 = arith.cmpi eq, %arg0, %c0_i32_7 : i32
    %c7_i32 = arith.constant 7 : i32
    %7 = arith.subi %c7_i32, %c0_i32 : i32
    %8 = arith.select %6, %c0_i32, %7 : i32
    %c0_8 = arith.constant 0 : index
    %9 = arith.index_cast %8 : i32 to index
    %c0_9 = arith.constant 0 : index
    %c0_10 = arith.constant 0 : index
    %10 = vector.load %arg1[%c0_8, %9, %c0_9, %c0_10] : memref<1x8x2x384xf32, #tpu.memory_space<vmem>>, vector<1x1x2x384xf32>
    %11 = vector.shape_cast %10 : vector<1x1x2x384xf32> to vector<2x384xf32>
    %c0_11 = arith.constant 0 : index
    %c0_12 = arith.constant 0 : index
    %12 = vector.load %arg7[%c0_11, %c0_12] : memref<2x128xf32, #tpu.memory_space<vmem>>, vector<2x128xf32>
    %cst_13 = arith.constant dense<0.000000e+00> : vector<2x384xf32>
    %13 = tpu.matmul %12, %3, %cst_13 {dimension_numbers = #tpu.dot_dimension_numbers<[1], [0], [0], [1], [0, 0, 1, 1], [], []>} : vector<2x128xf32>, vector<128x384xf32>, vector<2x384xf32> -> vector<2x384xf32>
    %14 = vector.broadcast %5 : vector<1x384xf32> to vector<2x384xf32>
    %15 = arith.addf %13, %14 : vector<2x384xf32>
    %16 = vector.extract_strided_slice %11 {offsets = [0, 0], sizes = [2, 128], strides = [1, 1]} : vector<2x384xf32> to vector<2x128xf32>
    %17 = vector.extract_strided_slice %15 {offsets = [0, 0], sizes = [2, 128], strides = [1, 1]} : vector<2x384xf32> to vector<2x128xf32>
    %18 = arith.addf %16, %17 : vector<2x128xf32>
    %19 = arith.negf %18 : vector<2x128xf32>
    %20 = math.exp %19 : vector<2x128xf32>
    %cst_14 = arith.constant 1.000000e+00 : f32
    %21 = vector.broadcast %cst_14 : f32 to vector<2x128xf32>
    %22 = arith.addf %21, %20 : vector<2x128xf32>
    %23 = arith.divf %21, %22 : vector<2x128xf32>
    %24 = vector.extract_strided_slice %11 {offsets = [0, 128], sizes = [2, 128], strides = [1, 1]} : vector<2x384xf32> to vector<2x128xf32>
    %25 = vector.extract_strided_slice %15 {offsets = [0, 128], sizes = [2, 128], strides = [1, 1]} : vector<2x384xf32> to vector<2x128xf32>
    %26 = arith.addf %24, %25 : vector<2x128xf32>
    %27 = arith.negf %26 : vector<2x128xf32>
    %28 = math.exp %27 : vector<2x128xf32>
    %cst_15 = arith.constant 1.000000e+00 : f32
    %29 = vector.broadcast %cst_15 : f32 to vector<2x128xf32>
    %30 = arith.addf %29, %28 : vector<2x128xf32>
    %31 = arith.divf %29, %30 : vector<2x128xf32>
    %32 = vector.extract_strided_slice %11 {offsets = [0, 256], sizes = [2, 128], strides = [1, 1]} : vector<2x384xf32> to vector<2x128xf32>
    %33 = vector.extract_strided_slice %15 {offsets = [0, 256], sizes = [2, 128], strides = [1, 1]} : vector<2x384xf32> to vector<2x128xf32>
    %34 = arith.mulf %23, %33 : vector<2x128xf32>
    %35 = arith.addf %32, %34 : vector<2x128xf32>
    %36 = math.tanh %35 : vector<2x128xf32>
    %cst_16 = arith.constant 1.000000e+00 : f32
    %37 = vector.broadcast %cst_16 : f32 to vector<2x128xf32>
    %38 = arith.subf %37, %31 : vector<2x128xf32>
    %39 = arith.mulf %38, %36 : vector<2x128xf32>
    %40 = arith.mulf %31, %12 : vector<2x128xf32>
    %41 = arith.addf %39, %40 : vector<2x128xf32>
    %c0_17 = arith.constant 0 : index
    %c0_18 = arith.constant 0 : index
    %42 = vector.load %arg7[%c0_17, %c0_18] : memref<2x128xf32, #tpu.memory_space<vmem>>, vector<2x128xf32>
    tpu.vector_store %arg7[%c0_17, %c0_18], %41 {strides = array<i32>} : memref<2x128xf32, #tpu.memory_space<vmem>>, vector<2x128xf32>,
    %c0_19 = arith.constant 0 : index
    %43 = arith.index_cast %8 : i32 to index
    %c0_20 = arith.constant 0 : index
    %c0_21 = arith.constant 0 : index
    %44 = vector.load %arg5[%c0_19, %43, %c0_20, %c0_21] : memref<1x8x2x128xf32, #tpu.memory_space<vmem>>, vector<1x1x2x128xf32>
    %45 = vector.shape_cast %44 : vector<1x1x2x128xf32> to vector<2x128xf32>
    %46 = vector.shape_cast %41 : vector<2x128xf32> to vector<1x1x2x128xf32>
    tpu.vector_store %arg5[%c0_19, %43, %c0_20, %c0_21], %46 {strides = array<i32>} : memref<1x8x2x128xf32, #tpu.memory_space<vmem>>, vector<1x1x2x128xf32>,
    %c1_i32 = arith.constant 1 : i32
    %c0_i32_22 = arith.constant 0 : i32
    %47 = arith.cmpi eq, %arg0, %c0_i32_22 : i32
    %c7_i32_23 = arith.constant 7 : i32
    %48 = arith.subi %c7_i32_23, %c1_i32 : i32
    %49 = arith.select %47, %c1_i32, %48 : i32
    %c0_24 = arith.constant 0 : index
    %50 = arith.index_cast %49 : i32 to index
    %c0_25 = arith.constant 0 : index
    %c0_26 = arith.constant 0 : index
    %51 = vector.load %arg1[%c0_24, %50, %c0_25, %c0_26] : memref<1x8x2x384xf32, #tpu.memory_space<vmem>>, vector<1x1x2x384xf32>
    %52 = vector.shape_cast %51 : vector<1x1x2x384xf32> to vector<2x384xf32>
    %c0_27 = arith.constant 0 : index
    %c0_28 = arith.constant 0 : index
    %53 = vector.load %arg7[%c0_27, %c0_28] : memref<2x128xf32, #tpu.memory_space<vmem>>, vector<2x128xf32>
    %cst_29 = arith.constant dense<0.000000e+00> : vector<2x384xf32>
    %54 = tpu.matmul %53, %3, %cst_29 {dimension_numbers = #tpu.dot_dimension_numbers<[1], [0], [0], [1], [0, 0, 1, 1], [], []>} : vector<2x128xf32>, vector<128x384xf32>, vector<2x384xf32> -> vector<2x384xf32>
    %55 = vector.broadcast %5 : vector<1x384xf32> to vector<2x384xf32>
    %56 = arith.addf %54, %55 : vector<2x384xf32>
    %57 = vector.extract_strided_slice %52 {offsets = [0, 0], sizes = [2, 128], strides = [1, 1]} : vector<2x384xf32> to vector<2x128xf32>
    %58 = vector.extract_strided_slice %56 {offsets = [0, 0], sizes = [2, 128], strides = [1, 1]} : vector<2x384xf32> to vector<2x128xf32>
    %59 = arith.addf %57, %58 : vector<2x128xf32>
    %60 = arith.negf %59 : vector<2x128xf32>
    %61 = math.exp %60 : vector<2x128xf32>
    %cst_30 = arith.constant 1.000000e+00 : f32
    %62 = vector.broadcast %cst_30 : f32 to vector<2x128xf32>
    %63 = arith.addf %62, %61 : vector<2x128xf32>
    %64 = arith.divf %62, %63 : vector<2x128xf32>
    %65 = vector.extract_strided_slice %52 {offsets = [0, 128], sizes = [2, 128], strides = [1, 1]} : vector<2x384xf32> to vector<2x128xf32>
    %66 = vector.extract_strided_slice %56 {offsets = [0, 128], sizes = [2, 128], strides = [1, 1]} : vector<2x384xf32> to vector<2x128xf32>
    %67 = arith.addf %65, %66 : vector<2x128xf32>
    %68 = arith.negf %67 : vector<2x128xf32>
    %69 = math.exp %68 : vector<2x128xf32>
    %cst_31 = arith.constant 1.000000e+00 : f32
    %70 = vector.broadcast %cst_31 : f32 to vector<2x128xf32>
    %71 = arith.addf %70, %69 : vector<2x128xf32>
    %72 = arith.divf %70, %71 : vector<2x128xf32>
    %73 = vector.extract_strided_slice %52 {offsets = [0, 256], sizes = [2, 128], strides = [1, 1]} : vector<2x384xf32> to vector<2x128xf32>
    %74 = vector.extract_strided_slice %56 {offsets = [0, 256], sizes = [2, 128], strides = [1, 1]} : vector<2x384xf32> to vector<2x128xf32>
    %75 = arith.mulf %64, %74 : vector<2x128xf32>
    %76 = arith.addf %73, %75 : vector<2x128xf32>
    %77 = math.tanh %76 : vector<2x128xf32>
    %cst_32 = arith.constant 1.000000e+00 : f32
    %78 = vector.broadcast %cst_32 : f32 to vector<2x128xf32>
    %79 = arith.subf %78, %72 : vector<2x128xf32>
    %80 = arith.mulf %79, %77 : vector<2x128xf32>
    %81 = arith.mulf %72, %53 : vector<2x128xf32>
    %82 = arith.addf %80, %81 : vector<2x128xf32>
    %c0_33 = arith.constant 0 : index
    %c0_34 = arith.constant 0 : index
    %83 = vector.load %arg7[%c0_33, %c0_34] : memref<2x128xf32, #tpu.memory_space<vmem>>, vector<2x128xf32>
    tpu.vector_store %arg7[%c0_33, %c0_34], %82 {strides = array<i32>} : memref<2x128xf32, #tpu.memory_space<vmem>>, vector<2x128xf32>,
    %c0_35 = arith.constant 0 : index
    %84 = arith.index_cast %49 : i32 to index
    %c0_36 = arith.constant 0 : index
    %c0_37 = arith.constant 0 : index
    %85 = vector.load %arg5[%c0_35, %84, %c0_36, %c0_37] : memref<1x8x2x128xf32, #tpu.memory_space<vmem>>, vector<1x1x2x128xf32>
    %86 = vector.shape_cast %85 : vector<1x1x2x128xf32> to vector<2x128xf32>
    %87 = vector.shape_cast %82 : vector<2x128xf32> to vector<1x1x2x128xf32>
    tpu.vector_store %arg5[%c0_35, %84, %c0_36, %c0_37], %87 {strides = array<i32>} : memref<1x8x2x128xf32, #tpu.memory_space<vmem>>, vector<1x1x2x128xf32>,
    %c2_i32 = arith.constant 2 : i32
    %c0_i32_38 = arith.constant 0 : i32
    %88 = arith.cmpi eq, %arg0, %c0_i32_38 : i32
    %c7_i32_39 = arith.constant 7 : i32
    %89 = arith.subi %c7_i32_39, %c2_i32 : i32
    %90 = arith.select %88, %c2_i32, %89 : i32
    %c0_40 = arith.constant 0 : index
    %91 = arith.index_cast %90 : i32 to index
    %c0_41 = arith.constant 0 : index
    %c0_42 = arith.constant 0 : index
    %92 = vector.load %arg1[%c0_40, %91, %c0_41, %c0_42] : memref<1x8x2x384xf32, #tpu.memory_space<vmem>>, vector<1x1x2x384xf32>
    %93 = vector.shape_cast %92 : vector<1x1x2x384xf32> to vector<2x384xf32>
    %c0_43 = arith.constant 0 : index
    %c0_44 = arith.constant 0 : index
    %94 = vector.load %arg7[%c0_43, %c0_44] : memref<2x128xf32, #tpu.memory_space<vmem>>, vector<2x128xf32>
    %cst_45 = arith.constant dense<0.000000e+00> : vector<2x384xf32>
    %95 = tpu.matmul %94, %3, %cst_45 {dimension_numbers = #tpu.dot_dimension_numbers<[1], [0], [0], [1], [0, 0, 1, 1], [], []>} : vector<2x128xf32>, vector<128x384xf32>, vector<2x384xf32> -> vector<2x384xf32>
    %96 = vector.broadcast %5 : vector<1x384xf32> to vector<2x384xf32>
    %97 = arith.addf %95, %96 : vector<2x384xf32>
    %98 = vector.extract_strided_slice %93 {offsets = [0, 0], sizes = [2, 128], strides = [1, 1]} : vector<2x384xf32> to vector<2x128xf32>
    %99 = vector.extract_strided_slice %97 {offsets = [0, 0], sizes = [2, 128], strides = [1, 1]} : vector<2x384xf32> to vector<2x128xf32>
    %100 = arith.addf %98, %99 : vector<2x128xf32>
    %101 = arith.negf %100 : vector<2x128xf32>
    %102 = math.exp %101 : vector<2x128xf32>
    %cst_46 = arith.constant 1.000000e+00 : f32
    %103 = vector.broadcast %cst_46 : f32 to vector<2x128xf32>
    %104 = arith.addf %103, %102 : vector<2x128xf32>
    %105 = arith.divf %103, %104 : vector<2x128xf32>
    %106 = vector.extract_strided_slice %93 {offsets = [0, 128], sizes = [2, 128], strides = [1, 1]} : vector<2x384xf32> to vector<2x128xf32>
    %107 = vector.extract_strided_slice %97 {offsets = [0, 128], sizes = [2, 128], strides = [1, 1]} : vector<2x384xf32> to vector<2x128xf32>
    %108 = arith.addf %106, %107 : vector<2x128xf32>
    %109 = arith.negf %108 : vector<2x128xf32>
    %110 = math.exp %109 : vector<2x128xf32>
    %cst_47 = arith.constant 1.000000e+00 : f32
    %111 = vector.broadcast %cst_47 : f32 to vector<2x128xf32>
    %112 = arith.addf %111, %110 : vector<2x128xf32>
    %113 = arith.divf %111, %112 : vector<2x128xf32>
    %114 = vector.extract_strided_slice %93 {offsets = [0, 256], sizes = [2, 128], strides = [1, 1]} : vector<2x384xf32> to vector<2x128xf32>
    %115 = vector.extract_strided_slice %97 {offsets = [0, 256], sizes = [2, 128], strides = [1, 1]} : vector<2x384xf32> to vector<2x128xf32>
    %116 = arith.mulf %105, %115 : vector<2x128xf32>
    %117 = arith.addf %114, %116 : vector<2x128xf32>
    %118 = math.tanh %117 : vector<2x128xf32>
    %cst_48 = arith.constant 1.000000e+00 : f32
    %119 = vector.broadcast %cst_48 : f32 to vector<2x128xf32>
    %120 = arith.subf %119, %113 : vector<2x128xf32>
    %121 = arith.mulf %120, %118 : vector<2x128xf32>
    %122 = arith.mulf %113, %94 : vector<2x128xf32>
    %123 = arith.addf %121, %122 : vector<2x128xf32>
    %c0_49 = arith.constant 0 : index
    %c0_50 = arith.constant 0 : index
    %124 = vector.load %arg7[%c0_49, %c0_50] : memref<2x128xf32, #tpu.memory_space<vmem>>, vector<2x128xf32>
    tpu.vector_store %arg7[%c0_49, %c0_50], %123 {strides = array<i32>} : memref<2x128xf32, #tpu.memory_space<vmem>>, vector<2x128xf32>,
    %c0_51 = arith.constant 0 : index
    %125 = arith.index_cast %90 : i32 to index
    %c0_52 = arith.constant 0 : index
    %c0_53 = arith.constant 0 : index
    %126 = vector.load %arg5[%c0_51, %125, %c0_52, %c0_53] : memref<1x8x2x128xf32, #tpu.memory_space<vmem>>, vector<1x1x2x128xf32>
    %127 = vector.shape_cast %126 : vector<1x1x2x128xf32> to vector<2x128xf32>
    %128 = vector.shape_cast %123 : vector<2x128xf32> to vector<1x1x2x128xf32>
    tpu.vector_store %arg5[%c0_51, %125, %c0_52, %c0_53], %128 {strides = array<i32>} : memref<1x8x2x128xf32, #tpu.memory_space<vmem>>, vector<1x1x2x128xf32>,
    %c3_i32 = arith.constant 3 : i32
    %c0_i32_54 = arith.constant 0 : i32
    %129 = arith.cmpi eq, %arg0, %c0_i32_54 : i32
    %c7_i32_55 = arith.constant 7 : i32
    %130 = arith.subi %c7_i32_55, %c3_i32 : i32
    %131 = arith.select %129, %c3_i32, %130 : i32
    %c0_56 = arith.constant 0 : index
    %132 = arith.index_cast %131 : i32 to index
    %c0_57 = arith.constant 0 : index
    %c0_58 = arith.constant 0 : index
    %133 = vector.load %arg1[%c0_56, %132, %c0_57, %c0_58] : memref<1x8x2x384xf32, #tpu.memory_space<vmem>>, vector<1x1x2x384xf32>
    %134 = vector.shape_cast %133 : vector<1x1x2x384xf32> to vector<2x384xf32>
    %c0_59 = arith.constant 0 : index
    %c0_60 = arith.constant 0 : index
    %135 = vector.load %arg7[%c0_59, %c0_60] : memref<2x128xf32, #tpu.memory_space<vmem>>, vector<2x128xf32>
    %cst_61 = arith.constant dense<0.000000e+00> : vector<2x384xf32>
    %136 = tpu.matmul %135, %3, %cst_61 {dimension_numbers = #tpu.dot_dimension_numbers<[1], [0], [0], [1], [0, 0, 1, 1], [], []>} : vector<2x128xf32>, vector<128x384xf32>, vector<2x384xf32> -> vector<2x384xf32>
    %137 = vector.broadcast %5 : vector<1x384xf32> to vector<2x384xf32>
    %138 = arith.addf %136, %137 : vector<2x384xf32>
    %139 = vector.extract_strided_slice %134 {offsets = [0, 0], sizes = [2, 128], strides = [1, 1]} : vector<2x384xf32> to vector<2x128xf32>
    %140 = vector.extract_strided_slice %138 {offsets = [0, 0], sizes = [2, 128], strides = [1, 1]} : vector<2x384xf32> to vector<2x128xf32>
    %141 = arith.addf %139, %140 : vector<2x128xf32>
    %142 = arith.negf %141 : vector<2x128xf32>
    %143 = math.exp %142 : vector<2x128xf32>
    %cst_62 = arith.constant 1.000000e+00 : f32
    %144 = vector.broadcast %cst_62 : f32 to vector<2x128xf32>
    %145 = arith.addf %144, %143 : vector<2x128xf32>
    %146 = arith.divf %144, %145 : vector<2x128xf32>
    %147 = vector.extract_strided_slice %134 {offsets = [0, 128], sizes = [2, 128], strides = [1, 1]} : vector<2x384xf32> to vector<2x128xf32>
    %148 = vector.extract_strided_slice %138 {offsets = [0, 128], sizes = [2, 128], strides = [1, 1]} : vector<2x384xf32> to vector<2x128xf32>
    %149 = arith.addf %147, %148 : vector<2x128xf32>
    %150 = arith.negf %149 : vector<2x128xf32>
    %151 = math.exp %150 : vector<2x128xf32>
    %cst_63 = arith.constant 1.000000e+00 : f32
    %152 = vector.broadcast %cst_63 : f32 to vector<2x128xf32>
    %153 = arith.addf %152, %151 : vector<2x128xf32>
    %154 = arith.divf %152, %153 : vector<2x128xf32>
    %155 = vector.extract_strided_slice %134 {offsets = [0, 256], sizes = [2, 128], strides = [1, 1]} : vector<2x384xf32> to vector<2x128xf32>
    %156 = vector.extract_strided_slice %138 {offsets = [0, 256], sizes = [2, 128], strides = [1, 1]} : vector<2x384xf32> to vector<2x128xf32>
    %157 = arith.mulf %146, %156 : vector<2x128xf32>
    %158 = arith.addf %155, %157 : vector<2x128xf32>
    %159 = math.tanh %158 : vector<2x128xf32>
    %cst_64 = arith.constant 1.000000e+00 : f32
    %160 = vector.broadcast %cst_64 : f32 to vector<2x128xf32>
    %161 = arith.subf %160, %154 : vector<2x128xf32>
    %162 = arith.mulf %161, %159 : vector<2x128xf32>
    %163 = arith.mulf %154, %135 : vector<2x128xf32>
    %164 = arith.addf %162, %163 : vector<2x128xf32>
    %c0_65 = arith.constant 0 : index
    %c0_66 = arith.constant 0 : index
    %165 = vector.load %arg7[%c0_65, %c0_66] : memref<2x128xf32, #tpu.memory_space<vmem>>, vector<2x128xf32>
    tpu.vector_store %arg7[%c0_65, %c0_66], %164 {strides = array<i32>} : memref<2x128xf32, #tpu.memory_space<vmem>>, vector<2x128xf32>,
    %c0_67 = arith.constant 0 : index
    %166 = arith.index_cast %131 : i32 to index
    %c0_68 = arith.constant 0 : index
    %c0_69 = arith.constant 0 : index
    %167 = vector.load %arg5[%c0_67, %166, %c0_68, %c0_69] : memref<1x8x2x128xf32, #tpu.memory_space<vmem>>, vector<1x1x2x128xf32>
    %168 = vector.shape_cast %167 : vector<1x1x2x128xf32> to vector<2x128xf32>
    %169 = vector.shape_cast %164 : vector<2x128xf32> to vector<1x1x2x128xf32>
    tpu.vector_store %arg5[%c0_67, %166, %c0_68, %c0_69], %169 {strides = array<i32>} : memref<1x8x2x128xf32, #tpu.memory_space<vmem>>, vector<1x1x2x128xf32>,
    %c4_i32 = arith.constant 4 : i32
    %c0_i32_70 = arith.constant 0 : i32
    %170 = arith.cmpi eq, %arg0, %c0_i32_70 : i32
    %c7_i32_71 = arith.constant 7 : i32
    %171 = arith.subi %c7_i32_71, %c4_i32 : i32
    %172 = arith.select %170, %c4_i32, %171 : i32
    %c0_72 = arith.constant 0 : index
    %173 = arith.index_cast %172 : i32 to index
    %c0_73 = arith.constant 0 : index
    %c0_74 = arith.constant 0 : index
    %174 = vector.load %arg1[%c0_72, %173, %c0_73, %c0_74] : memref<1x8x2x384xf32, #tpu.memory_space<vmem>>, vector<1x1x2x384xf32>
    %175 = vector.shape_cast %174 : vector<1x1x2x384xf32> to vector<2x384xf32>
    %c0_75 = arith.constant 0 : index
    %c0_76 = arith.constant 0 : index
    %176 = vector.load %arg7[%c0_75, %c0_76] : memref<2x128xf32, #tpu.memory_space<vmem>>, vector<2x128xf32>
    %cst_77 = arith.constant dense<0.000000e+00> : vector<2x384xf32>
    %177 = tpu.matmul %176, %3, %cst_77 {dimension_numbers = #tpu.dot_dimension_numbers<[1], [0], [0], [1], [0, 0, 1, 1], [], []>} : vector<2x128xf32>, vector<128x384xf32>, vector<2x384xf32> -> vector<2x384xf32>
    %178 = vector.broadcast %5 : vector<1x384xf32> to vector<2x384xf32>
    %179 = arith.addf %177, %178 : vector<2x384xf32>
    %180 = vector.extract_strided_slice %175 {offsets = [0, 0], sizes = [2, 128], strides = [1, 1]} : vector<2x384xf32> to vector<2x128xf32>
    %181 = vector.extract_strided_slice %179 {offsets = [0, 0], sizes = [2, 128], strides = [1, 1]} : vector<2x384xf32> to vector<2x128xf32>
    %182 = arith.addf %180, %181 : vector<2x128xf32>
    %183 = arith.negf %182 : vector<2x128xf32>
    %184 = math.exp %183 : vector<2x128xf32>
    %cst_78 = arith.constant 1.000000e+00 : f32
    %185 = vector.broadcast %cst_78 : f32 to vector<2x128xf32>
    %186 = arith.addf %185, %184 : vector<2x128xf32>
    %187 = arith.divf %185, %186 : vector<2x128xf32>
    %188 = vector.extract_strided_slice %175 {offsets = [0, 128], sizes = [2, 128], strides = [1, 1]} : vector<2x384xf32> to vector<2x128xf32>
    %189 = vector.extract_strided_slice %179 {offsets = [0, 128], sizes = [2, 128], strides = [1, 1]} : vector<2x384xf32> to vector<2x128xf32>
    %190 = arith.addf %188, %189 : vector<2x128xf32>
    %191 = arith.negf %190 : vector<2x128xf32>
    %192 = math.exp %191 : vector<2x128xf32>
    %cst_79 = arith.constant 1.000000e+00 : f32
    %193 = vector.broadcast %cst_79 : f32 to vector<2x128xf32>
    %194 = arith.addf %193, %192 : vector<2x128xf32>
    %195 = arith.divf %193, %194 : vector<2x128xf32>
    %196 = vector.extract_strided_slice %175 {offsets = [0, 256], sizes = [2, 128], strides = [1, 1]} : vector<2x384xf32> to vector<2x128xf32>
    %197 = vector.extract_strided_slice %179 {offsets = [0, 256], sizes = [2, 128], strides = [1, 1]} : vector<2x384xf32> to vector<2x128xf32>
    %198 = arith.mulf %187, %197 : vector<2x128xf32>
    %199 = arith.addf %196, %198 : vector<2x128xf32>
    %200 = math.tanh %199 : vector<2x128xf32>
    %cst_80 = arith.constant 1.000000e+00 : f32
    %201 = vector.broadcast %cst_80 : f32 to vector<2x128xf32>
    %202 = arith.subf %201, %195 : vector<2x128xf32>
    %203 = arith.mulf %202, %200 : vector<2x128xf32>
    %204 = arith.mulf %195, %176 : vector<2x128xf32>
    %205 = arith.addf %203, %204 : vector<2x128xf32>
    %c0_81 = arith.constant 0 : index
    %c0_82 = arith.constant 0 : index
    %206 = vector.load %arg7[%c0_81, %c0_82] : memref<2x128xf32, #tpu.memory_space<vmem>>, vector<2x128xf32>
    tpu.vector_store %arg7[%c0_81, %c0_82], %205 {strides = array<i32>} : memref<2x128xf32, #tpu.memory_space<vmem>>, vector<2x128xf32>,
    %c0_83 = arith.constant 0 : index
    %207 = arith.index_cast %172 : i32 to index
    %c0_84 = arith.constant 0 : index
    %c0_85 = arith.constant 0 : index
    %208 = vector.load %arg5[%c0_83, %207, %c0_84, %c0_85] : memref<1x8x2x128xf32, #tpu.memory_space<vmem>>, vector<1x1x2x128xf32>
    %209 = vector.shape_cast %208 : vector<1x1x2x128xf32> to vector<2x128xf32>
    %210 = vector.shape_cast %205 : vector<2x128xf32> to vector<1x1x2x128xf32>
    tpu.vector_store %arg5[%c0_83, %207, %c0_84, %c0_85], %210 {strides = array<i32>} : memref<1x8x2x128xf32, #tpu.memory_space<vmem>>, vector<1x1x2x128xf32>,
    %c5_i32 = arith.constant 5 : i32
    %c0_i32_86 = arith.constant 0 : i32
    %211 = arith.cmpi eq, %arg0, %c0_i32_86 : i32
    %c7_i32_87 = arith.constant 7 : i32
    %212 = arith.subi %c7_i32_87, %c5_i32 : i32
    %213 = arith.select %211, %c5_i32, %212 : i32
    %c0_88 = arith.constant 0 : index
    %214 = arith.index_cast %213 : i32 to index
    %c0_89 = arith.constant 0 : index
    %c0_90 = arith.constant 0 : index
    %215 = vector.load %arg1[%c0_88, %214, %c0_89, %c0_90] : memref<1x8x2x384xf32, #tpu.memory_space<vmem>>, vector<1x1x2x384xf32>
    %216 = vector.shape_cast %215 : vector<1x1x2x384xf32> to vector<2x384xf32>
    %c0_91 = arith.constant 0 : index
    %c0_92 = arith.constant 0 : index
    %217 = vector.load %arg7[%c0_91, %c0_92] : memref<2x128xf32, #tpu.memory_space<vmem>>, vector<2x128xf32>
    %cst_93 = arith.constant dense<0.000000e+00> : vector<2x384xf32>
    %218 = tpu.matmul %217, %3, %cst_93 {dimension_numbers = #tpu.dot_dimension_numbers<[1], [0], [0], [1], [0, 0, 1, 1], [], []>} : vector<2x128xf32>, vector<128x384xf32>, vector<2x384xf32> -> vector<2x384xf32>
    %219 = vector.broadcast %5 : vector<1x384xf32> to vector<2x384xf32>
    %220 = arith.addf %218, %219 : vector<2x384xf32>
    %221 = vector.extract_strided_slice %216 {offsets = [0, 0], sizes = [2, 128], strides = [1, 1]} : vector<2x384xf32> to vector<2x128xf32>
    %222 = vector.extract_strided_slice %220 {offsets = [0, 0], sizes = [2, 128], strides = [1, 1]} : vector<2x384xf32> to vector<2x128xf32>
    %223 = arith.addf %221, %222 : vector<2x128xf32>
    %224 = arith.negf %223 : vector<2x128xf32>
    %225 = math.exp %224 : vector<2x128xf32>
    %cst_94 = arith.constant 1.000000e+00 : f32
    %226 = vector.broadcast %cst_94 : f32 to vector<2x128xf32>
    %227 = arith.addf %226, %225 : vector<2x128xf32>
    %228 = arith.divf %226, %227 : vector<2x128xf32>
    %229 = vector.extract_strided_slice %216 {offsets = [0, 128], sizes = [2, 128], strides = [1, 1]} : vector<2x384xf32> to vector<2x128xf32>
    %230 = vector.extract_strided_slice %220 {offsets = [0, 128], sizes = [2, 128], strides = [1, 1]} : vector<2x384xf32> to vector<2x128xf32>
    %231 = arith.addf %229, %230 : vector<2x128xf32>
    %232 = arith.negf %231 : vector<2x128xf32>
    %233 = math.exp %232 : vector<2x128xf32>
    %cst_95 = arith.constant 1.000000e+00 : f32
    %234 = vector.broadcast %cst_95 : f32 to vector<2x128xf32>
    %235 = arith.addf %234, %233 : vector<2x128xf32>
    %236 = arith.divf %234, %235 : vector<2x128xf32>
    %237 = vector.extract_strided_slice %216 {offsets = [0, 256], sizes = [2, 128], strides = [1, 1]} : vector<2x384xf32> to vector<2x128xf32>
    %238 = vector.extract_strided_slice %220 {offsets = [0, 256], sizes = [2, 128], strides = [1, 1]} : vector<2x384xf32> to vector<2x128xf32>
    %239 = arith.mulf %228, %238 : vector<2x128xf32>
    %240 = arith.addf %237, %239 : vector<2x128xf32>
    %241 = math.tanh %240 : vector<2x128xf32>
    %cst_96 = arith.constant 1.000000e+00 : f32
    %242 = vector.broadcast %cst_96 : f32 to vector<2x128xf32>
    %243 = arith.subf %242, %236 : vector<2x128xf32>
    %244 = arith.mulf %243, %241 : vector<2x128xf32>
    %245 = arith.mulf %236, %217 : vector<2x128xf32>
    %246 = arith.addf %244, %245 : vector<2x128xf32>
    %c0_97 = arith.constant 0 : index
    %c0_98 = arith.constant 0 : index
    %247 = vector.load %arg7[%c0_97, %c0_98] : memref<2x128xf32, #tpu.memory_space<vmem>>, vector<2x128xf32>
    tpu.vector_store %arg7[%c0_97, %c0_98], %246 {strides = array<i32>} : memref<2x128xf32, #tpu.memory_space<vmem>>, vector<2x128xf32>,
    %c0_99 = arith.constant 0 : index
    %248 = arith.index_cast %213 : i32 to index
    %c0_100 = arith.constant 0 : index
    %c0_101 = arith.constant 0 : index
    %249 = vector.load %arg5[%c0_99, %248, %c0_100, %c0_101] : memref<1x8x2x128xf32, #tpu.memory_space<vmem>>, vector<1x1x2x128xf32>
    %250 = vector.shape_cast %249 : vector<1x1x2x128xf32> to vector<2x128xf32>
    %251 = vector.shape_cast %246 : vector<2x128xf32> to vector<1x1x2x128xf32>
    tpu.vector_store %arg5[%c0_99, %248, %c0_100, %c0_101], %251 {strides = array<i32>} : memref<1x8x2x128xf32, #tpu.memory_space<vmem>>, vector<1x1x2x128xf32>,
    %c6_i32 = arith.constant 6 : i32
    %c0_i32_102 = arith.constant 0 : i32
    %252 = arith.cmpi eq, %arg0, %c0_i32_102 : i32
    %c7_i32_103 = arith.constant 7 : i32
    %253 = arith.subi %c7_i32_103, %c6_i32 : i32
    %254 = arith.select %252, %c6_i32, %253 : i32
    %c0_104 = arith.constant 0 : index
    %255 = arith.index_cast %254 : i32 to index
    %c0_105 = arith.constant 0 : index
    %c0_106 = arith.constant 0 : index
    %256 = vector.load %arg1[%c0_104, %255, %c0_105, %c0_106] : memref<1x8x2x384xf32, #tpu.memory_space<vmem>>, vector<1x1x2x384xf32>
    %257 = vector.shape_cast %256 : vector<1x1x2x384xf32> to vector<2x384xf32>
    %c0_107 = arith.constant 0 : index
    %c0_108 = arith.constant 0 : index
    %258 = vector.load %arg7[%c0_107, %c0_108] : memref<2x128xf32, #tpu.memory_space<vmem>>, vector<2x128xf32>
    %cst_109 = arith.constant dense<0.000000e+00> : vector<2x384xf32>
    %259 = tpu.matmul %258, %3, %cst_109 {dimension_numbers = #tpu.dot_dimension_numbers<[1], [0], [0], [1], [0, 0, 1, 1], [], []>} : vector<2x128xf32>, vector<128x384xf32>, vector<2x384xf32> -> vector<2x384xf32>
    %260 = vector.broadcast %5 : vector<1x384xf32> to vector<2x384xf32>
    %261 = arith.addf %259, %260 : vector<2x384xf32>
    %262 = vector.extract_strided_slice %257 {offsets = [0, 0], sizes = [2, 128], strides = [1, 1]} : vector<2x384xf32> to vector<2x128xf32>
    %263 = vector.extract_strided_slice %261 {offsets = [0, 0], sizes = [2, 128], strides = [1, 1]} : vector<2x384xf32> to vector<2x128xf32>
    %264 = arith.addf %262, %263 : vector<2x128xf32>
    %265 = arith.negf %264 : vector<2x128xf32>
    %266 = math.exp %265 : vector<2x128xf32>
    %cst_110 = arith.constant 1.000000e+00 : f32
    %267 = vector.broadcast %cst_110 : f32 to vector<2x128xf32>
    %268 = arith.addf %267, %266 : vector<2x128xf32>
    %269 = arith.divf %267, %268 : vector<2x128xf32>
    %270 = vector.extract_strided_slice %257 {offsets = [0, 128], sizes = [2, 128], strides = [1, 1]} : vector<2x384xf32> to vector<2x128xf32>
    %271 = vector.extract_strided_slice %261 {offsets = [0, 128], sizes = [2, 128], strides = [1, 1]} : vector<2x384xf32> to vector<2x128xf32>
    %272 = arith.addf %270, %271 : vector<2x128xf32>
    %273 = arith.negf %272 : vector<2x128xf32>
    %274 = math.exp %273 : vector<2x128xf32>
    %cst_111 = arith.constant 1.000000e+00 : f32
    %275 = vector.broadcast %cst_111 : f32 to vector<2x128xf32>
    %276 = arith.addf %275, %274 : vector<2x128xf32>
    %277 = arith.divf %275, %276 : vector<2x128xf32>
    %278 = vector.extract_strided_slice %257 {offsets = [0, 256], sizes = [2, 128], strides = [1, 1]} : vector<2x384xf32> to vector<2x128xf32>
    %279 = vector.extract_strided_slice %261 {offsets = [0, 256], sizes = [2, 128], strides = [1, 1]} : vector<2x384xf32> to vector<2x128xf32>
    %280 = arith.mulf %269, %279 : vector<2x128xf32>
    %281 = arith.addf %278, %280 : vector<2x128xf32>
    %282 = math.tanh %281 : vector<2x128xf32>
    %cst_112 = arith.constant 1.000000e+00 : f32
    %283 = vector.broadcast %cst_112 : f32 to vector<2x128xf32>
    %284 = arith.subf %283, %277 : vector<2x128xf32>
    %285 = arith.mulf %284, %282 : vector<2x128xf32>
    %286 = arith.mulf %277, %258 : vector<2x128xf32>
    %287 = arith.addf %285, %286 : vector<2x128xf32>
    %c0_113 = arith.constant 0 : index
    %c0_114 = arith.constant 0 : index
    %288 = vector.load %arg7[%c0_113, %c0_114] : memref<2x128xf32, #tpu.memory_space<vmem>>, vector<2x128xf32>
    tpu.vector_store %arg7[%c0_113, %c0_114], %287 {strides = array<i32>} : memref<2x128xf32, #tpu.memory_space<vmem>>, vector<2x128xf32>,
    %c0_115 = arith.constant 0 : index
    %289 = arith.index_cast %254 : i32 to index
    %c0_116 = arith.constant 0 : index
    %c0_117 = arith.constant 0 : index
    %290 = vector.load %arg5[%c0_115, %289, %c0_116, %c0_117] : memref<1x8x2x128xf32, #tpu.memory_space<vmem>>, vector<1x1x2x128xf32>
    %291 = vector.shape_cast %290 : vector<1x1x2x128xf32> to vector<2x128xf32>
    %292 = vector.shape_cast %287 : vector<2x128xf32> to vector<1x1x2x128xf32>
    tpu.vector_store %arg5[%c0_115, %289, %c0_116, %c0_117], %292 {strides = array<i32>} : memref<1x8x2x128xf32, #tpu.memory_space<vmem>>, vector<1x1x2x128xf32>,
    %c7_i32_118 = arith.constant 7 : i32
    %c0_i32_119 = arith.constant 0 : i32
    %293 = arith.cmpi eq, %arg0, %c0_i32_119 : i32
    %c7_i32_120 = arith.constant 7 : i32
    %294 = arith.subi %c7_i32_120, %c7_i32_118 : i32
    %295 = arith.select %293, %c7_i32_118, %294 : i32
    %c0_121 = arith.constant 0 : index
    %296 = arith.index_cast %295 : i32 to index
    %c0_122 = arith.constant 0 : index
    %c0_123 = arith.constant 0 : index
    %297 = vector.load %arg1[%c0_121, %296, %c0_122, %c0_123] : memref<1x8x2x384xf32, #tpu.memory_space<vmem>>, vector<1x1x2x384xf32>
    %298 = vector.shape_cast %297 : vector<1x1x2x384xf32> to vector<2x384xf32>
    %c0_124 = arith.constant 0 : index
    %c0_125 = arith.constant 0 : index
    %299 = vector.load %arg7[%c0_124, %c0_125] : memref<2x128xf32, #tpu.memory_space<vmem>>, vector<2x128xf32>
    %cst_126 = arith.constant dense<0.000000e+00> : vector<2x384xf32>
    %300 = tpu.matmul %299, %3, %cst_126 {dimension_numbers = #tpu.dot_dimension_numbers<[1], [0], [0], [1], [0, 0, 1, 1], [], []>} : vector<2x128xf32>, vector<128x384xf32>, vector<2x384xf32> -> vector<2x384xf32>
    %301 = vector.broadcast %5 : vector<1x384xf32> to vector<2x384xf32>
    %302 = arith.addf %300, %301 : vector<2x384xf32>
    %303 = vector.extract_strided_slice %298 {offsets = [0, 0], sizes = [2, 128], strides = [1, 1]} : vector<2x384xf32> to vector<2x128xf32>
    %304 = vector.extract_strided_slice %302 {offsets = [0, 0], sizes = [2, 128], strides = [1, 1]} : vector<2x384xf32> to vector<2x128xf32>
    %305 = arith.addf %303, %304 : vector<2x128xf32>
    %306 = arith.negf %305 : vector<2x128xf32>
    %307 = math.exp %306 : vector<2x128xf32>
    %cst_127 = arith.constant 1.000000e+00 : f32
    %308 = vector.broadcast %cst_127 : f32 to vector<2x128xf32>
    %309 = arith.addf %308, %307 : vector<2x128xf32>
    %310 = arith.divf %308, %309 : vector<2x128xf32>
    %311 = vector.extract_strided_slice %298 {offsets = [0, 128], sizes = [2, 128], strides = [1, 1]} : vector<2x384xf32> to vector<2x128xf32>
    %312 = vector.extract_strided_slice %302 {offsets = [0, 128], sizes = [2, 128], strides = [1, 1]} : vector<2x384xf32> to vector<2x128xf32>
    %313 = arith.addf %311, %312 : vector<2x128xf32>
    %314 = arith.negf %313 : vector<2x128xf32>
    %315 = math.exp %314 : vector<2x128xf32>
    %cst_128 = arith.constant 1.000000e+00 : f32
    %316 = vector.broadcast %cst_128 : f32 to vector<2x128xf32>
    %317 = arith.addf %316, %315 : vector<2x128xf32>
    %318 = arith.divf %316, %317 : vector<2x128xf32>
    %319 = vector.extract_strided_slice %298 {offsets = [0, 256], sizes = [2, 128], strides = [1, 1]} : vector<2x384xf32> to vector<2x128xf32>
    %320 = vector.extract_strided_slice %302 {offsets = [0, 256], sizes = [2, 128], strides = [1, 1]} : vector<2x384xf32> to vector<2x128xf32>
    %321 = arith.mulf %310, %320 : vector<2x128xf32>
    %322 = arith.addf %319, %321 : vector<2x128xf32>
    %323 = math.tanh %322 : vector<2x128xf32>
    %cst_129 = arith.constant 1.000000e+00 : f32
    %324 = vector.broadcast %cst_129 : f32 to vector<2x128xf32>
    %325 = arith.subf %324, %318 : vector<2x128xf32>
    %326 = arith.mulf %325, %323 : vector<2x128xf32>
    %327 = arith.mulf %318, %299 : vector<2x128xf32>
    %328 = arith.addf %326, %327 : vector<2x128xf32>
    %c0_130 = arith.constant 0 : index
    %c0_131 = arith.constant 0 : index
    %329 = vector.load %arg7[%c0_130, %c0_131] : memref<2x128xf32, #tpu.memory_space<vmem>>, vector<2x128xf32>
    tpu.vector_store %arg7[%c0_130, %c0_131], %328 {strides = array<i32>} : memref<2x128xf32, #tpu.memory_space<vmem>>, vector<2x128xf32>,
    %c0_132 = arith.constant 0 : index
    %330 = arith.index_cast %295 : i32 to index
    %c0_133 = arith.constant 0 : index
    %c0_134 = arith.constant 0 : index
    %331 = vector.load %arg5[%c0_132, %330, %c0_133, %c0_134] : memref<1x8x2x128xf32, #tpu.memory_space<vmem>>, vector<1x1x2x128xf32>
    %332 = vector.shape_cast %331 : vector<1x1x2x128xf32> to vector<2x128xf32>
    %333 = vector.shape_cast %328 : vector<2x128xf32> to vector<1x1x2x128xf32>
    tpu.vector_store %arg5[%c0_132, %330, %c0_133, %c0_134], %333 {strides = array<i32>} : memref<1x8x2x128xf32, #tpu.memory_space<vmem>>, vector<1x1x2x128xf32>,
    %c8_i32 = arith.constant 8 : i32
    %c0_135 = arith.constant 0 : index
    %c7 = arith.constant 7 : index
    %c0_136 = arith.constant 0 : index
    %c0_137 = arith.constant 0 : index
    %334 = vector.load %arg5[%c0_135, %c7, %c0_136, %c0_137] : memref<1x8x2x128xf32, #tpu.memory_space<vmem>>, vector<1x1x2x128xf32>
    %335 = vector.shape_cast %334 : vector<1x1x2x128xf32> to vector<2x128xf32>
    %c0_138 = arith.constant 0 : index
    %c0_139 = arith.constant 0 : index
    %c0_140 = arith.constant 0 : index
    %336 = vector.load %arg4[%c0_138, %c0_139, %c0_140] : memref<1x128x128xf32, #tpu.memory_space<vmem>>, vector<1x128x128xf32>
    %337 = vector.shape_cast %336 : vector<1x128x128xf32> to vector<128x128xf32>
    %cst_141 = arith.constant dense<0.000000e+00> : vector<2x128xf32>
    %338 = tpu.matmul %335, %337, %cst_141 {dimension_numbers = #tpu.dot_dimension_numbers<[1], [0], [0], [1], [0, 0, 1, 1], [], []>} : vector<2x128xf32>, vector<128x128xf32>, vector<2x128xf32> -> vector<2x128xf32>
    %c0_142 = arith.constant 0 : index
    %c0_143 = arith.constant 0 : index
    %c0_144 = arith.constant 0 : index
    %339 = vector.load %arg6[%c0_142, %c0_143, %c0_144] : memref<1x2x128xf32, #tpu.memory_space<vmem>>, vector<1x2x128xf32>
    %340 = vector.shape_cast %339 : vector<1x2x128xf32> to vector<2x128xf32>
    %341 = vector.shape_cast %338 : vector<2x128xf32> to vector<1x2x128xf32>
    tpu.vector_store %arg6[%c0_142, %c0_143, %c0_144], %341 {strides = array<i32>} : memref<1x2x128xf32, #tpu.memory_space<vmem>>, vector<1x2x128xf32>,
    return
  }
  func.func @transform_0(%arg0: i32) -> (i32, i32, i32, i32) {
    %c0_i32 = arith.constant 0 : i32
    %c0_i32_0 = arith.constant 0 : i32
    %c0_i32_1 = arith.constant 0 : i32
    %c0_i32_2 = arith.constant 0 : i32
    return %arg0, %c0_i32, %c0_i32_0, %c0_i32_1 : i32, i32, i32, i32
  }
  func.func @transform_1(%arg0: i32) -> (i32, i32, i32) {
    %c0_i32 = arith.constant 0 : i32
    %c0_i32_0 = arith.constant 0 : i32
    %c0_i32_1 = arith.constant 0 : i32
    return %arg0, %c0_i32, %c0_i32_0 : i32, i32, i32
  }
  func.func @transform_2(%arg0: i32) -> (i32, i32, i32) {
    %c0_i32 = arith.constant 0 : i32
    %c0_i32_0 = arith.constant 0 : i32
    %c0_i32_1 = arith.constant 0 : i32
    return %arg0, %c0_i32, %c0_i32_0 : i32, i32, i32
  }
  func.func @transform_3(%arg0: i32) -> (i32, i32, i32) {
    %c0_i32 = arith.constant 0 : i32
    %c0_i32_0 = arith.constant 0 : i32
    %c0_i32_1 = arith.constant 0 : i32
    return %arg0, %c0_i32, %c0_i32_0 : i32, i32, i32
  }
  func.func @transform_4(%arg0: i32) -> (i32, i32, i32, i32) {
    %c0_i32 = arith.constant 0 : i32
    %c0_i32_0 = arith.constant 0 : i32
    %c0_i32_1 = arith.constant 0 : i32
    %c0_i32_2 = arith.constant 0 : i32
    return %arg0, %c0_i32, %c0_i32_0, %c0_i32_1 : i32, i32, i32, i32
  }
  func.func @transform_5(%arg0: i32) -> (i32, i32, i32) {
    %c0_i32 = arith.constant 0 : i32
    %c0_i32_0 = arith.constant 0 : i32
    %c0_i32_1 = arith.constant 0 : i32
    return %arg0, %c0_i32, %c0_i32_0 : i32, i32, i32
  }
}

</mosaic_0001>

<bundles_post_ra>
// kernel: gru_module_forward.4
= control target key start
LH: loop header
LB: loop body
LE: loop exit
PB: predicated region body
PF: predicated region fallthrough
CT: control target
= control target key end

     0   :  { %8 = vsyncpa [#allocation3], 0  ;;  %s988_s0 = inlined_call_operand.vmem [shape: f32[16,128], index: 0, kind: input, shape index: {}]   ;;  %s989_s1 = inlined_call_operand.hbm [shape: f32[2,128,384], index: 1, kind: input, shape index: {}]   ;;  %s990_s2 = inlined_call_operand.hbm [shape: f32[2,1,384], index: 2, kind: input, shape index: {}]   ;;  %s991_s3 = inlined_call_operand.vmem [shape: f32[2,16,384], index: 3, kind: output, shape index: {}]  }
   0x1   :  { %10 = vsyncpa [#allocation3 + $0x1], 0 }
   0x2   :  { %11 = vsyncpa [#allocation5], 0 }
   0x3   :  { %13 = vsyncpa [#allocation5 + $0x1], 0  ;;  %s781_s12 = smov 0   ;;  %s783_s13 = smov 0  }
   0x4   :  { %s785_s14 = smov 0   ;;  %s787_s15 = smov 0  }
   0x5 LB: > { %s800_s16 = sadd.s32 4294967295, %s754_s15   ;;  %s803_s17 = sadd.s32 1, %s754_s15   ;;  %s754_s15 = sphi %s787_s15, %s1002_s15   ;;  %s750_s14 = sphi %s785_s14, %s1001_s14   ;;  %s746_s13 = sphi %s783_s13, %s1000_s13   ;;  %s742_s12 = sphi %s781_s12, %s999_s12  }
   0x6   : > { %s44_s18 = ssub.s32 %s754_s15, %s803_s17  ;;  %s47_s19 = sadd.s32 1, %s750_s14 }
   0x7   : > { %p45_p0 = scmp.eq.s32.totalorder %s44_s18, 0  ;;  %p54_p1 = scmp.ne.s32.totalorder %s750_s14, %s746_s13 }
   0x8   : > { %p55_p2 = scmp.eq.s32.totalorder %s754_s15, 0  ;;  %p60_p3 = scmp.ne.s32.totalorder %s746_s13, %s742_s12 }
   0x9   : > { %s813_s20 = scalar_select %p45_p0, %s750_s14, %s47_s19  }
   0xa   : > { %p56_p4 = por %p55_p2, %p54_p1  ;;  %p61_p5 = scmp.eq.s32.totalorder %s800_s16, 0 }
   0xb   : > { %p624_p6 = scmp.lt.s32.totalorder %s754_s15, 2  ;;  %s822_s22 = sand.u32 1, %s750_s14  }
   0xc   : > { %p817_p7 = por %p61_p5, %p60_p3  ;;  %s606_s23 = smul.u32 384, %s822_s22 }
   0xd   : > { %s607_s24 = smul.u32 6144, %s754_s15  ;;  %p826_p8 = pnand %p624_p6, %p56_p4 }
   0xe   : > { %s993_s21 = scalar_select %p817_p7, 1, 0 }
   0xf   : > { %s833_s28 = scalar_lea.hbm %s989_s1, %s607_s24  ;;  %s143_s29 = scalar_lea.vmem [#allocation2], %s606_s23 }
  0x10   : > { %s150_s30 = sshll.u32 %s143_s29, 4  ;;  %s140_s4 = scalar_lea.sflag [#allocation3], %s822_s22  ;;  %s835_s30 = int_to_ptr.vmem [resolvable:$true] %s150_s30 }
  0x11   : > { %s660_s5 = scalar_lea.hbm %s833_s28, 6144  ;;  %p662_p11 = pneg %p826_p8 }
  0x12   : > { %p661_p10 = scmp.ne.s32.totalorder %s833_s28, %s660_s5  ;;  %s665_s8 = scalar_lea.hbm %s989_s1, 12288 }
  0x13   : > { %p666_p0 = scmp.lt.s32.totalorder %s833_s28, %s989_s1  ;;  %p667_p1 = scmp.lt.s32.totalorder %s665_s8, %s660_s5 }
  0x14   : > { %p663_p12 = pnand %p662_p11, %p661_p10 }
  0x15   : > { %p668_p2 = por %p667_p1, %p666_p0 }
  0x16   : > { %p664_p13 = pneg %p663_p12 }
  0x18   : > { %p669_p3 = pnand %p668_p2, %p664_p13 }
  0x1a   : > { %672 = shalt.err (!%p669_p3)
}
  0x1b   : > { %s673_s11 = scalar_lea.vmem %s835_s30, 6144  ;;  %s756_s12 = smov [#allocation2]  }
  0x1c   : > { %p674_p4 = scmp.ne.s32.totalorder %s835_s30, %s673_s11  ;;  %s678_s18 = sshll.u32 %s756_s12, 4  ;;  %s679_s18 = int_to_ptr.vmem [resolvable:$false] %s678_s18 }
  0x1d   : > { %s680_s19 = scalar_lea.vmem %s679_s18, 12288  ;;  %p681_p10 = scmp.lt.s32.totalorder %s835_s30, %s679_s18 }
  0x1e   : > { %p676_p5 = pnand %p674_p4, %p662_p11  ;;  %p682_p12 = scmp.lt.s32.totalorder %s680_s19, %s673_s11 }
  0x20   : > { %p677_p6 = pneg %p676_p5  ;;  %p683_p9 = por %p682_p12, %p681_p10 }
  0x22   : > { %p684_p0 = pnand %p683_p9, %p677_p6 }
  0x24   : > { %687 = shalt.err (!%p684_p0)
}
  0x25   : > { %s757_s23 = smov 384   ;;  %s758_s24 = smov 24  }
  0x26   : > { %620 = dma.hbm_to_vmem [thread:$0]  (!%p826_p8), %s833_s28, 6144, %s835_s30, %s140_s4, %s757_s23, %s757_s23, %s758_s24  }
  0x27   : > { %p177_p13 = scmp.lt.s32.totalorder %s754_s15, 3  ;;  %s608_s26 = smul.u32 3, %s822_s22 }
  0x28   : > { %p995_p1 = scmp.ge.s32.totalorder %s754_s15, 1  ;;  %s609_s29 = smul.u32 48, %s754_s15 }
  0x29   : > { %s164_s8 = scalar_lea.vmem [#allocation4], %s608_s26  ;;  %s161_s28 = scalar_lea.sflag [#allocation5], %s822_s22 }
  0x2a   : > { %p869_p9 = pnand %p995_p1, %p177_p13  ;;  %s877_s7 = scalar_lea.hbm %s990_s2, %s609_s29 }
  0x2b   : > { %s172_s9 = sshll.u32 %s164_s8, 4  ;;  %s688_s30 = scalar_lea.hbm %s877_s7, 48  ;;  %s173_s9 = int_to_ptr.vmem [resolvable:$true] %s172_s9 }
  0x2c   : > { %s996_s27 = scalar_select %p869_p9, 1, 0 }
  0x2d   : > { %p689_p2 = scmp.ne.s32.totalorder %s877_s7, %s688_s30  ;;  %s693_s10 = scalar_lea.hbm %s990_s2, 96 }
  0x2e   : > { %p694_p5 = scmp.lt.s32.totalorder %s877_s7, %s990_s2  ;;  %p695_p6 = scmp.lt.s32.totalorder %s693_s10, %s688_s30 }
  0x2f   : > { %p691_p3 = pnand %p689_p2, %p662_p11 }
  0x30   : > { %p696_p10 = por %p695_p6, %p694_p5 }
  0x31   : > { %p692_p4 = pneg %p691_p3 }
  0x33   : > { %p697_p12 = pnand %p696_p10, %p692_p4 }
  0x35   : > { %700 = shalt.err (!%p697_p12)
}
  0x36   : > { %s701_s18 = scalar_lea.vmem %s173_s9, 48  ;;  %s759_s22 = smov [#allocation4]  }
  0x37   : > { %p702_p0 = scmp.ne.s32.totalorder %s173_s9, %s701_s18  ;;  %s706_s19 = sshll.u32 %s759_s22, 4  ;;  %s707_s19 = int_to_ptr.vmem [resolvable:$false] %s706_s19 }
  0x38   : > { %s708_s23 = scalar_lea.vmem %s707_s19, 96  ;;  %p709_p2 = scmp.lt.s32.totalorder %s173_s9, %s707_s19 }
  0x39   : > { %p704_p13 = pnand %p702_p0, %p662_p11  ;;  %p710_p3 = scmp.lt.s32.totalorder %s708_s23, %s701_s18 }
  0x3b   : > { %p705_p1 = pneg %p704_p13  ;;  %p711_p7 = por %p710_p3, %p709_p2 }
  0x3d   : > { %p712_p9 = pnand %p711_p7, %p705_p1 }
  0x3f   : > { %715 = shalt.err (!%p712_p9)
}
  0x40   : > { %623 = dma.hbm_to_vmem [thread:$0]  (!%p826_p8), %s877_s7, 48, %s173_s9, %s161_s28  }
  0x41   : > { %p997_p4 = scmp.ne.s32.totalorder %s996_s27, 0 }
  0x42   : > { %s183_s24 = sand.u32 (!%p997_p4), 1, %s746_s13   ;;  %p998_p11 = scmp.ne.s32.totalorder (!%p997_p4), %s993_s21, 0 }
  0x43   : > { %181 = sbr.rel (%p997_p4) target bundleno = 312 (0x138), region = 32  ;;  %s184_s29 = scalar_lea.sflag (!%p997_p4), [#allocation3], %s183_s24 }
  0x44   : > { %s610_s26 = smul.u32 (!%p997_p4), 384, %s183_s24 }
  0x46   : > { %s901_s5 = scalar_lea.vmem (!%p997_p4), [#allocation2], %s610_s26 }
  0x48   : > { %733 = dma.done.wait (%p998_p11), %s184_s29, 6144  }
  0x49   : > { %735 = vsyncadd (%p998_p11), %s184_s29, 4294961152  ;;  %s611_s6 = smul.u32 3, %s183_s24  ;;  %s193_s25 = scalar_lea.sflag [#allocation5], %s183_s24 }
  0x4b   : > { %s907_s8 = scalar_lea.vmem [#allocation4], %s611_s6 }
  0x4c   : > { %737 = dma.done.wait (%p998_p11), %s193_s25, 48  }
  0x4d   : > { %739 = vsyncadd (%p998_p11), %s193_s25, 4294967248  ;;  %v760_v0 = vmov 0.0   ;;  %v277_v1 = vld [vmem:[%s901_s5 + $0x170] sm:$0xff]  ;;  %v276_v2 = vld [vmem:[%s901_s5 + $0x168] sm:$0xff]  ;;  %v281_v51 = vlaneseq  ;;  %p224_p7 = scmp.lt.s32.totalorder %s800_s16, 1 }
  0x4e   : > { %360 = vmatprep.mubr.f32.mxu0 %v760_v0  ;;  %v274_v3 = vld [vmem:[%s901_s5 + $0x158] sm:$0xff]  ;;  %296 = vmatprep.subr.mxu0 %v277_v1  ;;  %v273_v5 = vld [vmem:[%s901_s5 + $0x150] sm:$0xff]  ;;  %v271_v6 = vld [vmem:[%s901_s5 + $0x140] sm:$0xff] }
  0x4f   : > { %v278_v4 = vld [vmem:[%s901_s5 + $0x178] sm:$0xff]  ;;  %297 = vmatpush1.msra.mxu0 %v276_v2  ;;  %v275_v7 = vld [vmem:[%s901_s5 + $0x160] sm:$0xff]  ;;  %v272_v9 = vld [vmem:[%s901_s5 + $0x148] sm:$0xff]  ;;  %v282_v52 = vshrl.u32 %v281_v51, 7  ;;  %s1004_s16 = smov (!%p224_p7, %s800_s16), 1 }
  0x50   : > { %571 = vmatprep.subr.mxu1 %v278_v4  ;;  %298 = vmatprep.subr.mxu0 %v274_v3  ;;  %v270_v8 = vld [vmem:[%s901_s5 + $0x138] sm:$0xff]  ;;  %v268_v10 = vld [vmem:[%s901_s5 + $0x128] sm:$0xff]  ;;  %v267_v11 = vld [vmem:[%s901_s5 + $0x120] sm:$0xff]  ;;  %s612_s28 = smul.u32 48, %s1004_s16 }
  0x51   : > { %572 = vmatpush3.msra.mxu1 %v278_v4  ;;  %299 = vmatpush1.msra.mxu0 %v273_v5  ;;  %v269_v12 = vld [vmem:[%s901_s5 + $0x130] sm:$0xff]  ;;  %v264_v14 = vld [vmem:[%s901_s5 + $0x108] sm:$0xff]  ;;  %v266_v15 = vld [vmem:[%s901_s5 + $0x118] sm:$0xff]  ;;  %v283_v53 = vsub.s32 0, %v282_v52  ;;  %v287_v55 = vsub.s32 1, %v282_v52  ;;  %v291_v56 = vsub.s32 2, %v282_v52 }
  0x52   : > { %573 = vmatprep.subr.mxu1 %v275_v7  ;;  %300 = vmatprep.subr.mxu0 %v271_v6  ;;  %v265_v13 = vld [vmem:[%s901_s5 + $0x110] sm:$0xff]  ;;  %v262_v16 = vld [vmem:[%s901_s5 + $0xf8] sm:$0xff]  ;;  %v263_v18 = vld [vmem:[%s901_s5 + $0x100] sm:$0xff]  ;;  %s228_s15 = scalar_lea.vmem %s991_s3, %s612_s28 }
  0x53   : > { %574 = vmatpush3.msra.mxu1 %v275_v7  ;;  %301 = vmatpush1.msra.mxu0 %v270_v8  ;;  %v261_v17 = vld [vmem:[%s901_s5 + $0xf0] sm:$0xff]  ;;  %v259_v19 = vld [vmem:[%s901_s5 + $0xe0] sm:$0xff]  ;;  %v258_v20 = vld [vmem:[%s901_s5 + $0xd8] sm:$0xff] }
  0x54   : > { %575 = vmatprep.subr.mxu1 %v272_v9  ;;  %302 = vmatprep.subr.mxu0 %v268_v10  ;;  %v260_v21 = vld [vmem:[%s901_s5 + $0xe8] sm:$0xff]  ;;  %v255_v23 = vld [vmem:[%s901_s5 + $0xc0] sm:$0xff]  ;;  %v257_v24 = vld [vmem:[%s901_s5 + $0xd0] sm:$0xff] }
  0x55   : > { %576 = vmatpush3.msra.mxu1 %v272_v9  ;;  %303 = vmatpush1.msra.mxu0 %v267_v11  ;;  %v256_v22 = vld [vmem:[%s901_s5 + $0xc8] sm:$0xff]  ;;  %v253_v25 = vld [vmem:[%s901_s5 + $0xb0] sm:$0xff]  ;;  %v254_v27 = vld [vmem:[%s901_s5 + $0xb8] sm:$0xff] }
  0x56   : > { %577 = vmatprep.subr.mxu1 %v269_v12  ;;  %304 = vmatprep.subr.mxu0 %v265_v13  ;;  %v252_v26 = vld [vmem:[%s901_s5 + $0xa8] sm:$0xff]  ;;  %v250_v28 = vld [vmem:[%s901_s5 + $0x98] sm:$0xff]  ;;  %v249_v29 = vld [vmem:[%s901_s5 + $0x90] sm:$0xff] }
  0x57   : > { %578 = vmatpush3.msra.mxu1 %v269_v12  ;;  %305 = vmatpush1.msra.mxu0 %v264_v14  ;;  %v251_v30 = vld [vmem:[%s901_s5 + $0xa0] sm:$0xff]  ;;  %v246_v32 = vld [vmem:[%s901_s5 + $0x78] sm:$0xff]  ;;  %v248_v33 = vld [vmem:[%s901_s5 + $0x88] sm:$0xff] }
  0x58   : > { %579 = vmatprep.subr.mxu1 %v266_v15  ;;  %306 = vmatprep.subr.mxu0 %v262_v16  ;;  %v247_v31 = vld [vmem:[%s901_s5 + $0x80] sm:$0xff]  ;;  %v244_v34 = vld [vmem:[%s901_s5 + $0x68] sm:$0xff]  ;;  %v245_v36 = vld [vmem:[%s901_s5 + $0x70] sm:$0xff] }
  0x59   : > { %580 = vmatpush3.msra.mxu1 %v266_v15  ;;  %307 = vmatpush1.msra.mxu0 %v261_v17  ;;  %v243_v35 = vld [vmem:[%s901_s5 + $0x60] sm:$0xff]  ;;  %v241_v37 = vld [vmem:[%s901_s5 + $0x50] sm:$0xff]  ;;  %v240_v38 = vld [vmem:[%s901_s5 + $0x48] sm:$0xff] }
  0x5a   : > { %581 = vmatprep.subr.mxu1 %v263_v18  ;;  %308 = vmatprep.subr.mxu0 %v259_v19  ;;  %v242_v39 = vld [vmem:[%s901_s5 + $0x58] sm:$0xff]  ;;  %v237_v41 = vld [vmem:[%s901_s5 + $0x30] sm:$0xff]  ;;  %v239_v42 = vld [vmem:[%s901_s5 + $0x40] sm:$0xff] }
  0x5b   : > { %582 = vmatpush3.msra.mxu1 %v263_v18  ;;  %309 = vmatpush1.msra.mxu0 %v258_v20  ;;  %v238_v40 = vld [vmem:[%s901_s5 + $0x38] sm:$0xff]  ;;  %v235_v43 = vld [vmem:[%s901_s5 + $0x20] sm:$0xff]  ;;  %v236_v45 = vld [vmem:[%s901_s5 + $0x28] sm:$0xff] }
  0x5c   : > { %583 = vmatprep.subr.mxu1 %v260_v21  ;;  %310 = vmatprep.subr.mxu0 %v256_v22  ;;  %v234_v44 = vld [vmem:[%s901_s5 + $0x18] sm:$0xff]  ;;  %v232_v46 = vld [vmem:[%s901_s5 + $0x8] sm:$0xff]  ;;  %v231_v47 = vld [vmem:[%s901_s5] sm:$0xff] }
  0x5d   : > { %584 = vmatpush3.msra.mxu1 %v260_v21  ;;  %311 = vmatpush1.msra.mxu0 %v255_v23  ;;  %v233_v48 = vld [vmem:[%s901_s5 + $0x10] sm:$0xff]  ;;  %v229_v49 = vld [vmem:[%s988_s0] sm:$0xff]  ;;  %v230_v50 = vld [vmem:[%s988_s0 + $0x8] sm:$0xff] }
  0x5e   : > { %585 = vmatprep.subr.mxu1 %v257_v24  ;;  %312 = vmatprep.subr.mxu0 %v253_v25  ;;  %v279_v54 = vld [vmem:[%s907_s8] sm:$0x7] }
  0x5f   : > { %586 = vmatpush3.msra.mxu1 %v257_v24  ;;  %313 = vmatpush1.msra.mxu0 %v252_v26  ;;  %v284_v57 = vrot.slane %v279_v54, %v283_v53  ;;  %v288_v58 = vrot.slane %v279_v54, %v287_v55  ;;  %v292_v59 = vrot.slane %v279_v54, %v291_v56 }
  0x60   : > { %587 = vmatprep.subr.mxu1 %v254_v27  ;;  %314 = vmatprep.subr.mxu0 %v250_v28 }
  0x61   : > { %588 = vmatpush3.msra.mxu1 %v254_v27  ;;  %315 = vmatpush1.msra.mxu0 %v249_v29 }
  0x62   : > { %589 = vmatprep.subr.mxu1 %v251_v30  ;;  %316 = vmatprep.subr.mxu0 %v247_v31 }
  0x63   : > { %590 = vmatpush3.msra.mxu1 %v251_v30  ;;  %317 = vmatpush1.msra.mxu0 %v246_v32 }
  0x64   : > { %591 = vmatprep.subr.mxu1 %v248_v33  ;;  %318 = vmatprep.subr.mxu0 %v244_v34 }
  0x65   : > { %592 = vmatpush3.msra.mxu1 %v248_v33  ;;  %319 = vmatpush1.msra.mxu0 %v243_v35 }
  0x66   : > { %593 = vmatprep.subr.mxu1 %v245_v36  ;;  %320 = vmatprep.subr.mxu0 %v241_v37 }
  0x67   : > { %594 = vmatpush3.msra.mxu1 %v245_v36  ;;  %321 = vmatpush1.msra.mxu0 %v240_v38 }
  0x68   : > { %595 = vmatprep.subr.mxu1 %v242_v39  ;;  %322 = vmatprep.subr.mxu0 %v238_v40 }
  0x69   : > { %596 = vmatpush3.msra.mxu1 %v242_v39  ;;  %323 = vmatpush1.msra.mxu0 %v237_v41 }
  0x6a   : > { %597 = vmatprep.subr.mxu1 %v239_v42  ;;  %324 = vmatprep.subr.mxu0 %v235_v43 }
  0x6b   : > { %598 = vmatpush3.msra.mxu1 %v239_v42  ;;  %325 = vmatpush1.msra.mxu0 %v234_v44 }
  0x6c   : > { %599 = vmatprep.subr.mxu1 %v236_v45  ;;  %326 = vmatprep.subr.mxu0 %v232_v46 }
  0x6d   : > { %600 = vmatpush3.msra.mxu1 %v236_v45  ;;  %327 = vmatpush1.msra.mxu0 %v231_v47 }
  0x6e   : > { %601 = vmatprep.subr.mxu1 %v233_v48  ;;  %361 = vmatmul.mubr.f32.vlgmr.msra.gmra.mxu0 %v229_v49 }
  0x6f   : > { %602 = vmatpush3.msra.mxu1 %v233_v48  ;;  %603 = vmatprep.mubr.f32.mxu1 %v229_v49 }
  0x70   : > { %366 = vmatprep.mubr.f32.mxu0 %v760_v0  ;;  %604 = vmatmul.mubr.f32.vlgmr.msra.gmra.mxu1 %v230_v50 }
  0x72   : > { %367 = vmatmul.mubr.f32.gmra.mxu0 %v230_v50 }
 0x12e   : > { %v362_v60 = vpop.f32.mrf.mxu0 }
 0x12f   : > { %v363_v61 = vadd.f32 %v362_v60, %v284_v57 }
 0x130   : > { %v364_v62 = vpop.f32.mrf.mxu0  ;;  %v605_v63 = vpop.f32.mrf.mxu1 }
 0x131   : > { %448 = vst [vmem:[%s228_s15] sm:$0xff] %v363_v61  ;;  %v365_v0 = vadd.f32 %v364_v62, %v288_v58  ;;  %v445_v1 = vadd.f32 %v605_v63, %v292_v59 }
 0x132   : > { %v368_v2 = vpop.f32.mrf.mxu0  ;;  %v439_v3 = vpop.f32.mrf.mxu1 }
 0x133   : > { %449 = vst [vmem:[%s228_s15 + $0x8] sm:$0xff] %v365_v0  ;;  %453 = vst [vmem:[%s228_s15 + $0x28] sm:$0xff] %v445_v1  ;;  %v369_v4 = vadd.f32 %v368_v2, %v284_v57  ;;  %v440_v5 = vadd.f32 %v439_v3, %v292_v59 }
 0x134   : > { %v370_v6 = vpop.f32.mrf.mxu0 }
 0x135   : > { %451 = vst [vmem:[%s228_s15 + $0x18] sm:$0xff] %v369_v4  ;;  %450 = vst [vmem:[%s228_s15 + $0x10] sm:$0xff] %v440_v5  ;;  %v371_v7 = vadd.f32 %v370_v6, %v288_v58 }
 0x137   : > { %452 = vst [vmem:[%s228_s15 + $0x20] sm:$0xff] %v371_v7 }
 0x138 PF: > { %p16_p8 = scmp.ge.s32.totalorder %s803_s17, 4   ;;  %s999_s12 = smov %s746_s13 }
 0x139   : > { %s1000_s13 = smov %s750_s14  ;;  %s1001_s14 = smov %s813_s20 }
 0x13a   : > { %s1002_s15 = smov %s803_s17  ;;  %18 = sbr.rel (!%p16_p8) target bundleno = 5 (0x5), region = 85 }
 0x13f   :  { %475 = vsyncpa [#allocation3], 1 }
 0x140   :  { %477 = vsyncpa [#allocation3 + $0x1], 1 }
 0x141   :  { %478 = vsyncpa [#allocation5], 1 }
 0x142   :  { %480 = vsyncpa [#allocation5 + $0x1], 1 }

// kernel: gru_module_forward.6
= control target key start
LH: loop header
LB: loop body
LE: loop exit
PB: predicated region body
PF: predicated region fallthrough
CT: control target
= control target key end

     0   :  { %s616_s12 = smov 0   ;;  %s751_s0 = inlined_call_operand.vmem [shape: f32[16,256], index: 0, kind: input, shape index: {}]   ;;  %s752_s1 = inlined_call_operand.vmem [shape: f32[2,256,384], index: 1, kind: input, shape index: {}]   ;;  %s753_s2 = inlined_call_operand.vmem [shape: f32[2,1,384], index: 2, kind: input, shape index: {}]   ;;  %s754_s3 = inlined_call_operand.vmem [shape: f32[2,16,384], index: 3, kind: output, shape index: {}]  }
   0x1 LB: > { %s530_s13 = sadd.s32 4294967295, %s594_s12   ;;  %p534_p0 = scmp.ge.s32.totalorder %s594_s12, 1  ;;  %s594_s12 = sphi %s616_s12, %s13_s12  }
   0x2   : > { %p146_p1 = scmp.lt.s32.totalorder %s594_s12, 3 }
   0x4   : > { %p147_p2 = pnand %p534_p0, %p146_p1 }
   0x5   : > { %p174_p3 = scmp.lt.s32.totalorder (!%p147_p2), %s530_s13, 1 }
   0x6   : > { %150 = sbr.rel (%p147_p2) target bundleno = 282 (0x11a), region = 32 }
   0xb   : > { %v189_v0 = vld [vmem:[%s751_s0 + $0x8] sm:$0xff]  ;;  %s756_s13 = smov (!%p174_p3, %s530_s13), 1 }
   0xc   : > { %446 = vmatprep.mubr.f32.mxu1 %v189_v0  ;;  %369 = vmatprep.mubr.f32.mxu0 %v189_v0  ;;  %s577_s16 = smul.u32 768, %s756_s13 }
   0xd   : > { %s578_s26 = smul.u32 3, %s756_s13 }
   0xe   : > { %s633_s19 = scalar_lea.vmem %s752_s1, %s577_s16  ;;  %s579_s30 = smul.u32 48, %s756_s13 }
   0xf   : > { %v238_v1 = vld [vmem:[%s633_s19 + $0x170] sm:$0xff]  ;;  %v237_v2 = vld [vmem:[%s633_s19 + $0x168] sm:$0xff]  ;;  %v235_v3 = vld [vmem:[%s633_s19 + $0x158] sm:$0xff]  ;;  %s182_s29 = scalar_lea.vmem %s753_s2, %s578_s26 }
  0x10   : > { %305 = vmatprep.subr.mxu0 %v238_v1  ;;  %v234_v4 = vld [vmem:[%s633_s19 + $0x150] sm:$0xff]  ;;  %v232_v5 = vld [vmem:[%s633_s19 + $0x140] sm:$0xff]  ;;  %v231_v6 = vld [vmem:[%s633_s19 + $0x138] sm:$0xff]  ;;  %s187_s6 = scalar_lea.vmem %s754_s3, %s579_s30 }
  0x11   : > { %306 = vmatpush1.msra.mxu0 %v237_v2  ;;  %v229_v7 = vld [vmem:[%s633_s19 + $0x128] sm:$0xff]  ;;  %v228_v8 = vld [vmem:[%s633_s19 + $0x120] sm:$0xff]  ;;  %v226_v9 = vld [vmem:[%s633_s19 + $0x110] sm:$0xff] }
  0x12   : > { %307 = vmatprep.subr.mxu0 %v235_v3  ;;  %v225_v10 = vld [vmem:[%s633_s19 + $0x108] sm:$0xff]  ;;  %v223_v11 = vld [vmem:[%s633_s19 + $0xf8] sm:$0xff]  ;;  %v222_v12 = vld [vmem:[%s633_s19 + $0xf0] sm:$0xff] }
  0x13   : > { %308 = vmatpush1.msra.mxu0 %v234_v4  ;;  %v287_v13 = vld [vmem:[%s633_s19 + $0x2f8] sm:$0xff]  ;;  %v220_v14 = vld [vmem:[%s633_s19 + $0xe0] sm:$0xff]  ;;  %v217_v19 = vld [vmem:[%s633_s19 + $0xc8] sm:$0xff] }
  0x14   : > { %309 = vmatprep.subr.mxu0 %v232_v5  ;;  %539 = vmatprep.subr.mxu1 %v287_v13  ;;  %v239_v15 = vld [vmem:[%s633_s19 + $0x178] sm:$0xff]  ;;  %v284_v17 = vld [vmem:[%s633_s19 + $0x2e0] sm:$0xff]  ;;  %v281_v20 = vld [vmem:[%s633_s19 + $0x2c8] sm:$0xff] }
  0x15   : > { %310 = vmatpush1.msra.mxu0 %v231_v6  ;;  %v219_v16 = vld [vmem:[%s633_s19 + $0xd8] sm:$0xff]  ;;  %540 = vmatpush3.msra.mxu1 %v239_v15  ;;  %v236_v18 = vld [vmem:[%s633_s19 + $0x160] sm:$0xff]  ;;  %v233_v22 = vld [vmem:[%s633_s19 + $0x148] sm:$0xff] }
  0x16   : > { %311 = vmatprep.subr.mxu0 %v229_v7  ;;  %541 = vmatprep.subr.mxu1 %v284_v17  ;;  %v216_v21 = vld [vmem:[%s633_s19 + $0xc0] sm:$0xff]  ;;  %v278_v23 = vld [vmem:[%s633_s19 + $0x2b0] sm:$0xff]  ;;  %v213_v26 = vld [vmem:[%s633_s19 + $0xa8] sm:$0xff] }
  0x17   : > { %312 = vmatpush1.msra.mxu0 %v228_v8  ;;  %542 = vmatpush3.msra.mxu1 %v236_v18  ;;  %v214_v24 = vld [vmem:[%s633_s19 + $0xb0] sm:$0xff]  ;;  %v275_v27 = vld [vmem:[%s633_s19 + $0x298] sm:$0xff]  ;;  %v272_v31 = vld [vmem:[%s633_s19 + $0x280] sm:$0xff] }
  0x18   : > { %313 = vmatprep.subr.mxu0 %v226_v9  ;;  %543 = vmatprep.subr.mxu1 %v281_v20  ;;  %v230_v25 = vld [vmem:[%s633_s19 + $0x130] sm:$0xff]  ;;  %v211_v28 = vld [vmem:[%s633_s19 + $0x98] sm:$0xff]  ;;  %v208_v32 = vld [vmem:[%s633_s19 + $0x80] sm:$0xff] }
  0x19   : > { %314 = vmatpush1.msra.mxu0 %v225_v10  ;;  %544 = vmatpush3.msra.mxu1 %v233_v22  ;;  %v227_v29 = vld [vmem:[%s633_s19 + $0x118] sm:$0xff]  ;;  %v210_v30 = vld [vmem:[%s633_s19 + $0x90] sm:$0xff]  ;;  %v224_v33 = vld [vmem:[%s633_s19 + $0x100] sm:$0xff] }
  0x1a   : > { %315 = vmatprep.subr.mxu0 %v223_v11  ;;  %545 = vmatprep.subr.mxu1 %v278_v23  ;;  %v207_v34 = vld [vmem:[%s633_s19 + $0x78] sm:$0xff]  ;;  %v269_v35 = vld [vmem:[%s633_s19 + $0x268] sm:$0xff]  ;;  %v204_v38 = vld [vmem:[%s633_s19 + $0x60] sm:$0xff] }
  0x1b   : > { %316 = vmatpush1.msra.mxu0 %v222_v12  ;;  %546 = vmatpush3.msra.mxu1 %v230_v25  ;;  %v205_v36 = vld [vmem:[%s633_s19 + $0x68] sm:$0xff]  ;;  %v266_v39 = vld [vmem:[%s633_s19 + $0x250] sm:$0xff]  ;;  %v263_v43 = vld [vmem:[%s633_s19 + $0x238] sm:$0xff] }
  0x1c   : > { %317 = vmatprep.subr.mxu0 %v220_v14  ;;  %547 = vmatprep.subr.mxu1 %v275_v27  ;;  %v221_v37 = vld [vmem:[%s633_s19 + $0xe8] sm:$0xff]  ;;  %v202_v40 = vld [vmem:[%s633_s19 + $0x50] sm:$0xff]  ;;  %v199_v44 = vld [vmem:[%s633_s19 + $0x38] sm:$0xff] }
  0x1d   : > { %318 = vmatpush1.msra.mxu0 %v219_v16  ;;  %548 = vmatpush3.msra.mxu1 %v227_v29  ;;  %v218_v41 = vld [vmem:[%s633_s19 + $0xd0] sm:$0xff]  ;;  %v201_v42 = vld [vmem:[%s633_s19 + $0x48] sm:$0xff]  ;;  %v215_v45 = vld [vmem:[%s633_s19 + $0xb8] sm:$0xff] }
  0x1e   : > { %319 = vmatprep.subr.mxu0 %v217_v19  ;;  %549 = vmatprep.subr.mxu1 %v272_v31  ;;  %v198_v46 = vld [vmem:[%s633_s19 + $0x30] sm:$0xff]  ;;  %v260_v47 = vld [vmem:[%s633_s19 + $0x220] sm:$0xff]  ;;  %v195_v50 = vld [vmem:[%s633_s19 + $0x18] sm:$0xff] }
  0x1f   : > { %320 = vmatpush1.msra.mxu0 %v216_v21  ;;  %550 = vmatpush3.msra.mxu1 %v224_v33  ;;  %v196_v48 = vld [vmem:[%s633_s19 + $0x20] sm:$0xff]  ;;  %v257_v51 = vld [vmem:[%s633_s19 + $0x208] sm:$0xff]  ;;  %v254_v55 = vld [vmem:[%s633_s19 + $0x1f0] sm:$0xff] }
  0x20   : > { %321 = vmatprep.subr.mxu0 %v214_v24  ;;  %551 = vmatprep.subr.mxu1 %v269_v35  ;;  %v212_v49 = vld [vmem:[%s633_s19 + $0xa0] sm:$0xff]  ;;  %v193_v52 = vld [vmem:[%s633_s19 + $0x8] sm:$0xff]  ;;  %v286_v56 = vld [vmem:[%s633_s19 + $0x2f0] sm:$0xff] }
  0x21   : > { %322 = vmatpush1.msra.mxu0 %v213_v26  ;;  %552 = vmatpush3.msra.mxu1 %v221_v37  ;;  %v209_v53 = vld [vmem:[%s633_s19 + $0x88] sm:$0xff]  ;;  %v192_v54 = vld [vmem:[%s633_s19] sm:$0xff]  ;;  %v206_v57 = vld [vmem:[%s633_s19 + $0x70] sm:$0xff] }
  0x22   : > { %323 = vmatprep.subr.mxu0 %v211_v28  ;;  %553 = vmatprep.subr.mxu1 %v266_v39  ;;  %v285_v58 = vld [vmem:[%s633_s19 + $0x2e8] sm:$0xff]  ;;  %v251_v59 = vld [vmem:[%s633_s19 + $0x1d8] sm:$0xff]  ;;  %v282_v62 = vld [vmem:[%s633_s19 + $0x2d0] sm:$0xff] }
  0x23   : > { %324 = vmatpush1.msra.mxu0 %v210_v30  ;;  %554 = vmatpush3.msra.mxu1 %v218_v41  ;;  %v283_v60 = vld [vmem:[%s633_s19 + $0x2d8] sm:$0xff]  ;;  %v248_v63 = vld [vmem:[%s633_s19 + $0x1c0] sm:$0xff]  ;;  %v245_v3 = vld [vmem:[%s633_s19 + $0x1a8] sm:$0xff] }
  0x24   : > { %325 = vmatprep.subr.mxu0 %v208_v32  ;;  %555 = vmatprep.subr.mxu1 %v263_v43  ;;  %v203_v61 = vld [vmem:[%s633_s19 + $0x58] sm:$0xff]  ;;  %v280_v0 = vld [vmem:[%s633_s19 + $0x2c0] sm:$0xff]  ;;  %v277_v4 = vld [vmem:[%s633_s19 + $0x2a8] sm:$0xff] }
  0x25   : > { %326 = vmatpush1.msra.mxu0 %v207_v34  ;;  %556 = vmatpush3.msra.mxu1 %v215_v45  ;;  %v200_v1 = vld [vmem:[%s633_s19 + $0x40] sm:$0xff]  ;;  %v279_v2 = vld [vmem:[%s633_s19 + $0x2b8] sm:$0xff]  ;;  %v197_v5 = vld [vmem:[%s633_s19 + $0x28] sm:$0xff] }
  0x26   : > { %327 = vmatprep.subr.mxu0 %v205_v36  ;;  %557 = vmatprep.subr.mxu1 %v260_v47  ;;  %v276_v6 = vld [vmem:[%s633_s19 + $0x2a0] sm:$0xff]  ;;  %v242_v7 = vld [vmem:[%s633_s19 + $0x190] sm:$0xff]  ;;  %v273_v10 = vld [vmem:[%s633_s19 + $0x288] sm:$0xff]  ;;  %v290_v36 = vlaneseq }
  0x27   : > { %328 = vmatpush1.msra.mxu0 %v204_v38  ;;  %558 = vmatpush3.msra.mxu1 %v212_v49  ;;  %v274_v8 = vld [vmem:[%s633_s19 + $0x290] sm:$0xff]  ;;  %v188_v11 = vld [vmem:[%s751_s0] sm:$0xff]  ;;  %v271_v12 = vld [vmem:[%s633_s19 + $0x278] sm:$0xff] }
  0x28   : > { %329 = vmatprep.subr.mxu0 %v202_v40  ;;  %559 = vmatprep.subr.mxu1 %v257_v51  ;;  %v194_v9 = vld [vmem:[%s633_s19 + $0x10] sm:$0xff]  ;;  %v191_v13 = vld [vmem:[%s751_s0 + $0x18] sm:$0xff]  ;;  %v268_v15 = vld [vmem:[%s633_s19 + $0x260] sm:$0xff]  ;;  %v291_v37 = vshrl.u32 %v290_v36, 7 }
  0x29   : > { %330 = vmatpush1.msra.mxu0 %v201_v42  ;;  %560 = vmatpush3.msra.mxu1 %v209_v53  ;;  %v270_v14 = vld [vmem:[%s633_s19 + $0x270] sm:$0xff]  ;;  %v267_v16 = vld [vmem:[%s633_s19 + $0x258] sm:$0xff]  ;;  %v265_v18 = vld [vmem:[%s633_s19 + $0x248] sm:$0xff] }
  0x2a   : > { %331 = vmatprep.subr.mxu0 %v199_v44  ;;  %561 = vmatprep.subr.mxu1 %v254_v55  ;;  %v190_v17 = vld [vmem:[%s751_s0 + $0x10] sm:$0xff]  ;;  %v264_v19 = vld [vmem:[%s633_s19 + $0x240] sm:$0xff]  ;;  %v261_v21 = vld [vmem:[%s633_s19 + $0x228] sm:$0xff]  ;;  %v300_v38 = vsub.s32 2, %v291_v37  ;;  %v292_v49 = vsub.s32 0, %v291_v37 }
  0x2b   : > { %332 = vmatpush1.msra.mxu0 %v198_v46  ;;  %562 = vmatpush3.msra.mxu1 %v206_v57  ;;  %v262_v20 = vld [vmem:[%s633_s19 + $0x230] sm:$0xff]  ;;  %v259_v22 = vld [vmem:[%s633_s19 + $0x218] sm:$0xff]  ;;  %v256_v24 = vld [vmem:[%s633_s19 + $0x200] sm:$0xff] }
  0x2c   : > { %333 = vmatprep.subr.mxu0 %v196_v48  ;;  %563 = vmatprep.subr.mxu1 %v251_v59  ;;  %v258_v23 = vld [vmem:[%s633_s19 + $0x210] sm:$0xff]  ;;  %v255_v25 = vld [vmem:[%s633_s19 + $0x1f8] sm:$0xff]  ;;  %v253_v26 = vld [vmem:[%s633_s19 + $0x1e8] sm:$0xff] }
  0x2d   : > { %334 = vmatpush1.msra.mxu0 %v195_v50  ;;  %564 = vmatpush3.msra.mxu1 %v203_v61  ;;  %v252_v27 = vld [vmem:[%s633_s19 + $0x1e0] sm:$0xff]  ;;  %v250_v28 = vld [vmem:[%s633_s19 + $0x1d0] sm:$0xff]  ;;  %v249_v29 = vld [vmem:[%s633_s19 + $0x1c8] sm:$0xff]  ;;  %v296_v50 = vsub.s32 1, %v291_v37 }
  0x2e   : > { %335 = vmatprep.subr.mxu0 %v193_v52  ;;  %565 = vmatprep.subr.mxu1 %v248_v63  ;;  %v247_v30 = vld [vmem:[%s633_s19 + $0x1b8] sm:$0xff]  ;;  %v246_v31 = vld [vmem:[%s633_s19 + $0x1b0] sm:$0xff]  ;;  %v244_v32 = vld [vmem:[%s633_s19 + $0x1a0] sm:$0xff] }
  0x2f   : > { %336 = vmatpush1.msra.mxu0 %v192_v54  ;;  %566 = vmatpush3.msra.mxu1 %v200_v1  ;;  %v243_v33 = vld [vmem:[%s633_s19 + $0x198] sm:$0xff]  ;;  %v241_v34 = vld [vmem:[%s633_s19 + $0x188] sm:$0xff]  ;;  %v240_v35 = vld [vmem:[%s633_s19 + $0x180] sm:$0xff] }
  0x30   : > { %337 = vmatprep.subr.mxu0 %v286_v56  ;;  %567 = vmatprep.subr.mxu1 %v245_v3  ;;  %v288_v39 = vld [vmem:[%s182_s29] sm:$0x7] }
  0x31   : > { %338 = vmatpush2.msra.mxu0 %v285_v58  ;;  %568 = vmatpush3.msra.mxu1 %v197_v5  ;;  %v301_v41 = vrot.slane %v288_v39, %v300_v38  ;;  %v293_v51 = vrot.slane %v288_v39, %v292_v49  ;;  %v297_v52 = vrot.slane %v288_v39, %v296_v50 }
  0x32   : > { %339 = vmatprep.subr.mxu0 %v283_v60  ;;  %569 = vmatprep.subr.mxu1 %v242_v7 }
  0x33   : > { %340 = vmatpush2.msra.mxu0 %v282_v62  ;;  %570 = vmatpush3.msra.mxu1 %v194_v9 }
  0x34   : > { %341 = vmatprep.subr.mxu0 %v280_v0  ;;  %447 = vmatmul.mubr.f32.vlgmr.msra.gmra.mxu1 %v188_v11 }
  0x35   : > { %342 = vmatpush2.msra.mxu0 %v279_v2  ;;  %451 = vmatprep.mubr.f32.mxu1 %v191_v13 }
  0x36   : > { %343 = vmatprep.subr.mxu0 %v277_v4 }
  0x37   : > { %344 = vmatpush2.msra.mxu0 %v276_v6 }
  0x38   : > { %345 = vmatprep.subr.mxu0 %v274_v8  ;;  %452 = vmatmul.mubr.f32.gmra.mxu1 %v190_v17 }
  0x39   : > { %346 = vmatpush2.msra.mxu0 %v273_v10 }
  0x3a   : > { %347 = vmatprep.subr.mxu0 %v271_v12 }
  0x3b   : > { %348 = vmatpush2.msra.mxu0 %v270_v14 }
  0x3c   : > { %349 = vmatprep.subr.mxu0 %v268_v15 }
  0x3d   : > { %350 = vmatpush2.msra.mxu0 %v267_v16 }
  0x3e   : > { %351 = vmatprep.subr.mxu0 %v265_v18 }
  0x3f   : > { %352 = vmatpush2.msra.mxu0 %v264_v19 }
  0x40   : > { %353 = vmatprep.subr.mxu0 %v262_v20 }
  0x41   : > { %354 = vmatpush2.msra.mxu0 %v261_v21 }
  0x42   : > { %355 = vmatprep.subr.mxu0 %v259_v22 }
  0x43   : > { %356 = vmatpush2.msra.mxu0 %v258_v23 }
  0x44   : > { %357 = vmatprep.subr.mxu0 %v256_v24 }
  0x45   : > { %358 = vmatpush2.msra.mxu0 %v255_v25 }
  0x46   : > { %359 = vmatprep.subr.mxu0 %v253_v26 }
  0x47   : > { %360 = vmatpush2.msra.mxu0 %v252_v27 }
  0x48   : > { %361 = vmatprep.subr.mxu0 %v250_v28 }
  0x49   : > { %362 = vmatpush2.msra.mxu0 %v249_v29 }
  0x4a   : > { %363 = vmatprep.subr.mxu0 %v247_v30 }
  0x4b   : > { %364 = vmatpush2.msra.mxu0 %v246_v31 }
  0x4c   : > { %365 = vmatprep.subr.mxu0 %v244_v32 }
  0x4d   : > { %366 = vmatpush2.msra.mxu0 %v243_v33 }
  0x4e   : > { %367 = vmatprep.subr.mxu0 %v241_v34 }
  0x4f   : > { %368 = vmatpush2.msra.mxu0 %v240_v35 }
  0x50   : > { %370 = vmatmul.mubr.f32.vlgmr.msra.gmra.mxu0 %v188_v11 }
  0x51   : > { %375 = vmatprep.mubr.f32.mxu0 %v191_v13 }
  0x54   : > { %376 = vmatmul.mubr.f32.gmra.mxu0 %v190_v17 }
  0xf4   : > { %v571_v40 = vpop.f32.mrf.mxu1 }
  0xf6   : > { %v572_v42 = vpop.f32.mrf.mxu1 }
  0xf7   : > { %v573_v43 = vadd.f32 %v572_v42, %v571_v40 }
  0xf8   : > { %v574_v44 = vpop.f32.mrf.mxu1 }
  0xf9   : > { %v449_v45 = vadd.f32 %v573_v43, %v301_v41 }
  0xfa   : > { %v575_v46 = vpop.f32.mrf.mxu1 }
  0xfb   : > { %459 = vst [vmem:[%s187_s6 + $0x10] sm:$0xff] %v449_v45  ;;  %v576_v47 = vadd.f32 %v575_v46, %v574_v44 }
  0xfd   : > { %v454_v48 = vadd.f32 %v576_v47, %v301_v41 }
  0xff   : > { %462 = vst [vmem:[%s187_s6 + $0x28] sm:$0xff] %v454_v48 }
 0x110   : > { %v371_v53 = vpop.f32.mrf.mxu0 }
 0x111   : > { %v372_v54 = vadd.f32 %v371_v53, %v293_v51 }
 0x112   : > { %v373_v55 = vpop.f32.mrf.mxu0 }
 0x113   : > { %457 = vst [vmem:[%s187_s6] sm:$0xff] %v372_v54  ;;  %v374_v56 = vadd.f32 %v373_v55, %v297_v52 }
 0x114   : > { %v377_v57 = vpop.f32.mrf.mxu0 }
 0x115   : > { %458 = vst [vmem:[%s187_s6 + $0x8] sm:$0xff] %v374_v56  ;;  %v378_v58 = vadd.f32 %v377_v57, %v293_v51 }
 0x116   : > { %v379_v59 = vpop.f32.mrf.mxu0 }
 0x117   : > { %460 = vst [vmem:[%s187_s6 + $0x18] sm:$0xff] %v378_v58  ;;  %v380_v60 = vadd.f32 %v379_v59, %v297_v52 }
 0x119   : > { %461 = vst [vmem:[%s187_s6 + $0x20] sm:$0xff] %v380_v60 }
 0x11a PF: > { %s13_s12 = sadd.s32 1, %s594_s12  }
 0x11b   : > { %p10_p4 = scmp.ge.s32.totalorder %s13_s12, 4  }
 0x11d   :  { %12 = sbr.rel (!%p10_p4) target bundleno = 1 (0x1), region = 65 }

// kernel: gru_module_forward.5
= control target key start
LH: loop header
LB: loop body
LE: loop exit
PB: predicated region body
PF: predicated region fallthrough
CT: control target
= control target key end

     0   :  { %8 = vsyncpa [#allocation4], 0  ;;  %s3757_s0 = inlined_call_operand.vmem [shape: f32[2,8,2,384], index: 0, kind: input, shape index: {}]   ;;  %s3758_s1 = inlined_call_operand.hbm [shape: f32[2,128,384], index: 1, kind: input, shape index: {}]   ;;  %s3759_s2 = inlined_call_operand.hbm [shape: f32[2,1,384], index: 2, kind: input, shape index: {}]   ;;  %s3760_s3 = inlined_call_operand.vmem [shape: f32[2,8,2,128], index: 3, kind: output, shape index: {}]  }
   0x1   :  { %10 = vsyncpa [#allocation4 + $0x1], 0 }
   0x2   :  { %11 = vsyncpa [#allocation6], 0 }
   0x3   :  { %13 = vsyncpa [#allocation6 + $0x1], 0  ;;  %s2639_s12 = smov 0   ;;  %s2641_s13 = smov 0  }
   0x4   :  { %s2643_s14 = smov 0   ;;  %s2645_s15 = smov 0  }
   0x5 LB: > { %s2658_s16 = sadd.s32 4294967295, %s2611_s15   ;;  %s2661_s17 = sadd.s32 1, %s2611_s15   ;;  %s2611_s15 = sphi %s2645_s15, %s3843_s15   ;;  %s2607_s14 = sphi %s2643_s14, %s3842_s14   ;;  %s2603_s13 = sphi %s2641_s13, %s3841_s13   ;;  %s2599_s12 = sphi %s2639_s12, %s3840_s12  }
   0x6   : > { %s49_s18 = ssub.s32 %s2611_s15, %s2661_s17  ;;  %s52_s19 = sadd.s32 1, %s2607_s14 }
   0x7   : > { %p50_p0 = scmp.eq.s32.totalorder %s49_s18, 0  ;;  %p59_p1 = scmp.ne.s32.totalorder %s2607_s14, %s2603_s13 }
   0x8   : > { %p60_p2 = scmp.eq.s32.totalorder %s2611_s15, 0  ;;  %p65_p3 = scmp.ne.s32.totalorder %s2603_s13, %s2599_s12 }
   0x9   : > { %s2671_s20 = scalar_select %p50_p0, %s2607_s14, %s52_s19  }
   0xa   : > { %p61_p4 = por %p60_p2, %p59_p1  ;;  %p3761_p5 = scmp.eq.s32.totalorder %s2658_s16, 0 }
   0xb   : > { %p2352_p6 = scmp.lt.s32.totalorder %s2611_s15, 2  ;;  %s2682_s22 = sand.u32 1, %s2607_s14  }
   0xc   : > { %p2677_p7 = por %p3761_p5, %p65_p3  ;;  %s2334_s23 = smul.u32 384, %s2682_s22 }
   0xd   : > { %s2335_s24 = smul.u32 6144, %s2611_s15  ;;  %p2686_p8 = pnand %p2352_p6, %p61_p4 }
   0xe   : > { %s3787_s21 = scalar_select %p2677_p7, 1, 0 }
   0xf   : > { %s2693_s28 = scalar_lea.hbm %s3758_s1, %s2335_s24  ;;  %s153_s29 = scalar_lea.vmem [#allocation3], %s2334_s23 }
  0x10   : > { %s160_s30 = sshll.u32 %s153_s29, 4  ;;  %s150_s4 = scalar_lea.sflag [#allocation4], %s2682_s22  ;;  %s2695_s30 = int_to_ptr.vmem [resolvable:$true] %s160_s30 }
  0x11   : > { %s2517_s5 = scalar_lea.hbm %s2693_s28, 6144  ;;  %p2519_p11 = pneg %p2686_p8 }
  0x12   : > { %p2518_p10 = scmp.ne.s32.totalorder %s2693_s28, %s2517_s5  ;;  %s2522_s8 = scalar_lea.hbm %s3758_s1, 12288 }
  0x13   : > { %p2523_p0 = scmp.lt.s32.totalorder %s2693_s28, %s3758_s1  ;;  %p2524_p1 = scmp.lt.s32.totalorder %s2522_s8, %s2517_s5 }
  0x14   : > { %p2520_p12 = pnand %p2519_p11, %p2518_p10 }
  0x15   : > { %p2525_p2 = por %p2524_p1, %p2523_p0 }
  0x16   : > { %p2521_p13 = pneg %p2520_p12 }
  0x18   : > { %p2526_p3 = pnand %p2525_p2, %p2521_p13 }
  0x1a   : > { %2529 = shalt.err (!%p2526_p3)
}
  0x1b   : > { %s2530_s11 = scalar_lea.vmem %s2695_s30, 6144  ;;  %s2613_s12 = smov [#allocation3]  }
  0x1c   : > { %p2531_p4 = scmp.ne.s32.totalorder %s2695_s30, %s2530_s11  ;;  %s2535_s18 = sshll.u32 %s2613_s12, 4  ;;  %s2536_s18 = int_to_ptr.vmem [resolvable:$false] %s2535_s18 }
  0x1d   : > { %s2537_s19 = scalar_lea.vmem %s2536_s18, 12288  ;;  %p2538_p12 = scmp.lt.s32.totalorder %s2695_s30, %s2536_s18 }
  0x1e   : > { %p2533_p6 = pnand %p2531_p4, %p2519_p11  ;;  %p2539_p5 = scmp.lt.s32.totalorder %s2537_s19, %s2530_s11 }
  0x20   : > { %p2534_p10 = pneg %p2533_p6  ;;  %p2540_p9 = por %p2539_p5, %p2538_p12 }
  0x22   : > { %p2541_p0 = pnand %p2540_p9, %p2534_p10 }
  0x24   : > { %2544 = shalt.err (!%p2541_p0)
}
  0x25   : > { %s2614_s23 = smov 384   ;;  %s2615_s24 = smov 24  }
  0x26   : > { %2348 = dma.hbm_to_vmem [thread:$0]  (!%p2686_p8), %s2693_s28, 6144, %s2695_s30, %s150_s4, %s2614_s23, %s2614_s23, %s2615_s24  }
  0x27   : > { %p187_p13 = scmp.lt.s32.totalorder %s2611_s15, 3  ;;  %s2336_s26 = smul.u32 3, %s2682_s22 }
  0x28   : > { %p3789_p5 = scmp.ge.s32.totalorder %s2611_s15, 1  ;;  %s2337_s29 = smul.u32 48, %s2611_s15 }
  0x29   : > { %s174_s8 = scalar_lea.vmem [#allocation5], %s2336_s26  ;;  %s171_s28 = scalar_lea.sflag [#allocation6], %s2682_s22 }
  0x2a   : > { %p2729_p9 = pnand %p3789_p5, %p187_p13  ;;  %s2737_s7 = scalar_lea.hbm %s3759_s2, %s2337_s29 }
  0x2b   : > { %s182_s9 = sshll.u32 %s174_s8, 4  ;;  %s2545_s30 = scalar_lea.hbm %s2737_s7, 48  ;;  %s183_s9 = int_to_ptr.vmem [resolvable:$true] %s182_s9 }
  0x2c   : > { %s3790_s27 = scalar_select %p2729_p9, 1, 0 }
  0x2d   : > { %p2546_p1 = scmp.ne.s32.totalorder %s2737_s7, %s2545_s30  ;;  %s2550_s10 = scalar_lea.hbm %s3759_s2, 96 }
  0x2e   : > { %p2551_p4 = scmp.lt.s32.totalorder %s2737_s7, %s3759_s2  ;;  %p2552_p6 = scmp.lt.s32.totalorder %s2550_s10, %s2545_s30 }
  0x2f   : > { %p2548_p2 = pnand %p2546_p1, %p2519_p11 }
  0x30   : > { %p2553_p10 = por %p2552_p6, %p2551_p4 }
  0x31   : > { %p2549_p3 = pneg %p2548_p2 }
  0x33   : > { %p2554_p12 = pnand %p2553_p10, %p2549_p3 }
  0x35   : > { %2557 = shalt.err (!%p2554_p12)
}
  0x36   : > { %s2558_s18 = scalar_lea.vmem %s183_s9, 48  ;;  %s2616_s22 = smov [#allocation5]  }
  0x37   : > { %p2559_p0 = scmp.ne.s32.totalorder %s183_s9, %s2558_s18  ;;  %s2563_s19 = sshll.u32 %s2616_s22, 4  ;;  %s2564_s19 = int_to_ptr.vmem [resolvable:$false] %s2563_s19 }
  0x38   : > { %s2565_s23 = scalar_lea.vmem %s2564_s19, 96  ;;  %p2566_p1 = scmp.lt.s32.totalorder %s183_s9, %s2564_s19 }
  0x39   : > { %p2561_p13 = pnand %p2559_p0, %p2519_p11  ;;  %p2567_p2 = scmp.lt.s32.totalorder %s2565_s23, %s2558_s18 }
  0x3b   : > { %p2562_p5 = pneg %p2561_p13  ;;  %p2568_p7 = por %p2567_p2, %p2566_p1 }
  0x3d   : > { %p2569_p9 = pnand %p2568_p7, %p2562_p5 }
  0x3f   : > { %2572 = shalt.err (!%p2569_p9)
}
  0x40   : > { %2351 = dma.hbm_to_vmem [thread:$0]  (!%p2686_p8), %s2737_s7, 48, %s183_s9, %s171_s28  }
  0x41   : > { %p3791_p3 = scmp.ne.s32.totalorder %s3790_s27, 0 }
  0x43   : > { %191 = sbr.rel (%p3791_p3) target bundleno = 2180 (0x884), region = 32 }
  0x48   : > { %s193_s24 = sand.u32 1, %s2603_s13   ;;  %p3792_p11 = scmp.ne.s32.totalorder %s3787_s21, 0 }
  0x49   : > { %s2338_s26 = smul.u32 384, %s193_s24  ;;  %s194_s29 = scalar_lea.sflag [#allocation4], %s193_s24 }
  0x4b   : > { %s2761_s5 = scalar_lea.vmem [#allocation3], %s2338_s26 }
  0x4c   : > { %2590 = dma.done.wait (%p3792_p11), %s194_s29, 6144  }
  0x4d   : > { %2592 = vsyncadd (%p3792_p11), %s194_s29, 4294961152  ;;  %s2339_s6 = smul.u32 3, %s193_s24  ;;  %s203_s25 = scalar_lea.sflag [#allocation6], %s193_s24 }
  0x4f   : > { %s2767_s8 = scalar_lea.vmem [#allocation5], %s2339_s6 }
  0x50   : > { %2594 = dma.done.wait (%p3792_p11), %s203_s25, 48  }
  0x51   : > { %2596 = vsyncadd (%p3792_p11), %s203_s25, 4294967248  ;;  %v3763_v0 = vmov 0.0   ;;  %vm2618_vm0 = vmmov 0   ;;  %v2779_v1 = vld [vmem:[%s2761_s5 + $0x170] sm:$0xff]  ;;  %v2782_v2 = vld [vmem:[%s2761_s5 + $0x168] sm:$0xff]  ;;  %p239_p7 = scmp.lt.s32.totalorder %s2658_s16, 1  ;;  %v307_v50 = vlaneseq }
  0x52   : > { %386 = vmatprep.mubr.f32.mxu0 %v3763_v0  ;;  %249 = vst [vmem:[#allocation2] sm:$0x3] %v3763_v0  ;;  %2054 = vmatprep.subr.mxu1 %v3763_v0  ;;  %3793 = vst [vmem:[#allocation9_spill] sm:$0xff] %v2779_v1  ;;  %v2785_v3 = vld [vmem:[%s2761_s5 + $0x158] sm:$0xff]  ;;  %v2789_v4 = vld [vmem:[%s2761_s5 + $0x150] sm:$0xff]  ;;  %p3798_p8 = scmp.eq.s32.totalorder %s2658_s16, 0 }
  0x53   : > { %2086 = vmatprep.mubr.msk.f32.mxu1 %vm2618_vm0, %v3763_v0  ;;  %322 = vmatprep.subr.mxu0 %v2779_v1  ;;  %v2793_v5 = vld [vmem:[%s2761_s5 + $0x140] sm:$0xff]  ;;  %v2797_v6 = vld [vmem:[%s2761_s5 + $0x138] sm:$0xff]  ;;  %v2801_v7 = vld [vmem:[%s2761_s5 + $0x128] sm:$0xff]  ;;  %s3060_s21 = scalar_select %p239_p7, %s2658_s16, 1  ;;  %v308_v51 = vshrl.u32 %v307_v50, 7 }
  0x54   : > { %323 = vmatpush1.msra.mxu0 %v2782_v2  ;;  %v2805_v8 = vld [vmem:[%s2761_s5 + $0x120] sm:$0xff]  ;;  %v2809_v9 = vld [vmem:[%s2761_s5 + $0x110] sm:$0xff]  ;;  %v2813_v10 = vld [vmem:[%s2761_s5 + $0x108] sm:$0xff]  ;;  %s3064_s27 = scalar_select %p3798_p8, 0, 7 }
  0x55   : > { %324 = vmatprep.subr.mxu0 %v2785_v3  ;;  %v2817_v11 = vld [vmem:[%s2761_s5 + $0xf8] sm:$0xff]  ;;  %v2821_v12 = vld [vmem:[%s2761_s5 + $0xf0] sm:$0xff]  ;;  %v2825_v13 = vld [vmem:[%s2761_s5 + $0xe0] sm:$0xff]  ;;  %s2340_s7 = smul.u32 48, %s3060_s21  ;;  %v309_v52 = vsub.s32 0, %v308_v51  ;;  %v313_v55 = vsub.s32 1, %v308_v51  ;;  %p3806_p9 = pmov %p3798_p8 }
  0x56   : > { %325 = vmatpush1.msra.mxu0 %v2789_v4  ;;  %v2829_v14 = vld [vmem:[%s2761_s5 + $0xd8] sm:$0xff]  ;;  %v2835_v16 = vld [vmem:[%s2761_s5 + $0x160] sm:$0xff]  ;;  %v2839_v17 = vld [vmem:[%s2761_s5 + $0xc8] sm:$0xff]  ;;  %s1910_s9 = smul.u32 6, %s3064_s27  ;;  %s1909_s10 = sshll.u32 %s3060_s21, 4 }
  0x57   : > { %326 = vmatprep.subr.mxu0 %v2793_v5  ;;  %v2832_v15 = vld [vmem:[%s2761_s5 + $0x178] sm:$0xff]  ;;  %v2844_v18 = vld [vmem:[%s2761_s5 + $0xc0] sm:$0xff]  ;;  %v2848_v19 = vld [vmem:[%s2761_s5 + $0x148] sm:$0xff]  ;;  %s3071_s4 = scalar_lea.vmem %s3757_s0, %s2340_s7  ;;  %s3088_s18 = scalar_lea.vmem %s3760_s3, %s1909_s10 }
  0x58   : > { %327 = vmatpush1.msra.mxu0 %v2797_v6  ;;  %2055 = vmatpush3.msra.mxu1 %v2832_v15  ;;  %v2852_v20 = vld [vmem:[%s2761_s5 + $0xb0] sm:$0xff]  ;;  %v2857_v21 = vld [vmem:[%s2761_s5 + $0xa8] sm:$0xff]  ;;  %v2865_v23 = vld [vmem:[%s2761_s5 + $0x98] sm:$0xff]  ;;  %s303_s15 = scalar_lea.vmem %s3071_s4, %s1910_s9  ;;  %s1878_s22 = sshll.u32 %s3064_s27, 1 }
  0x59   : > { %328 = vmatprep.subr.mxu0 %v2801_v7  ;;  %2056 = vmatprep.subr.mxu1 %v3763_v0  ;;  %v2861_v22 = vld [vmem:[%s2761_s5 + $0x130] sm:$0xff]  ;;  %v2874_v25 = vld [vmem:[%s2761_s5 + $0x118] sm:$0xff]  ;;  %v2878_v26 = vld [vmem:[%s2761_s5 + $0x80] sm:$0xff]  ;;  %s491_s19 = scalar_lea.vmem %s3088_s18, %s1878_s22  ;;  %p3814_p4 = pmov %p3798_p8 }
  0x5a   : > { %329 = vmatpush1.msra.mxu0 %v2805_v8  ;;  %2057 = vmatpush3.msra.mxu1 %v2835_v16  ;;  %v2870_v24 = vld [vmem:[%s2761_s5 + $0x90] sm:$0xff]  ;;  %v2883_v27 = vld [vmem:[%s2761_s5 + $0x78] sm:$0xff]  ;;  %v2887_v28 = vld [vmem:[%s2761_s5 + $0x100] sm:$0xff]  ;;  %s3166_s23 = scalar_select %p3806_p9, 1, 6 }
  0x5b   : > { %330 = vmatprep.subr.mxu0 %v2809_v9  ;;  %2058 = vmatprep.subr.mxu1 %v3763_v0  ;;  %v2891_v29 = vld [vmem:[%s2761_s5 + $0x68] sm:$0xff]  ;;  %v2896_v30 = vld [vmem:[%s2761_s5 + $0x60] sm:$0xff]  ;;  %v2904_v32 = vld [vmem:[%s2761_s5 + $0x50] sm:$0xff]  ;;  %s3249_s25 = scalar_select %p3814_p4, 2, 5 }
  0x5c   : > { %331 = vmatpush1.msra.mxu0 %v2813_v10  ;;  %2059 = vmatpush3.msra.mxu1 %v2848_v19  ;;  %v2900_v31 = vld [vmem:[%s2761_s5 + $0xe8] sm:$0xff]  ;;  %v2913_v34 = vld [vmem:[%s2761_s5 + $0xd0] sm:$0xff]  ;;  %v2917_v35 = vld [vmem:[%s2761_s5 + $0x38] sm:$0xff]  ;;  %s1911_s24 = smul.u32 6, %s3166_s23  ;;  %s1882_s29 = sshll.u32 %s3166_s23, 1 }
  0x5d   : > { %332 = vmatprep.subr.mxu0 %v2817_v11  ;;  %2060 = vmatprep.subr.mxu1 %v3763_v0  ;;  %v2909_v33 = vld [vmem:[%s2761_s5 + $0x48] sm:$0xff]  ;;  %v2922_v36 = vld [vmem:[%s2761_s5 + $0x30] sm:$0xff]  ;;  %v2926_v37 = vld [vmem:[%s2761_s5 + $0xb8] sm:$0xff]  ;;  %s668_s6 = scalar_lea.vmem %s3088_s18, %s1882_s29  ;;  %s1886_s27 = sshll.u32 %s3249_s25, 1 }
  0x5e   : > { %333 = vmatpush1.msra.mxu0 %v2821_v12  ;;  %2061 = vmatpush3.msra.mxu1 %v2861_v22  ;;  %v2930_v38 = vld [vmem:[%s2761_s5 + $0x20] sm:$0xff]  ;;  %v2935_v39 = vld [vmem:[%s2761_s5 + $0x18] sm:$0xff]  ;;  %v2943_v41 = vld [vmem:[%s2761_s5 + $0x8] sm:$0xff]  ;;  %s496_s26 = scalar_lea.vmem %s3071_s4, %s1911_s24  ;;  %s845_s7 = scalar_lea.vmem %s3088_s18, %s1886_s27 }
  0x5f   : > { %334 = vmatprep.subr.mxu0 %v2825_v13  ;;  %2062 = vmatprep.subr.mxu1 %v3763_v0  ;;  %v2939_v40 = vld [vmem:[%s2761_s5 + $0xa0] sm:$0xff]  ;;  %3794 = vst [vmem:[#allocation10_spill] sm:$0xff] %v2943_v41  ;;  %v2952_v43 = vld [vmem:[%s2761_s5 + $0x88] sm:$0xff]  ;;  %v2955_v44 = vld [vmem:[#allocation2] sm:$0x3]  ;;  %p3821_p6 = pmov %p3814_p4  ;;  %p3825_p10 = pmov %p3814_p4 }
  0x60   : > { %335 = vmatpush1.msra.mxu0 %v2829_v14  ;;  %2063 = vmatpush3.msra.mxu1 %v2874_v25  ;;  %v2948_v42 = vld [vmem:[%s2761_s5] sm:$0xff]  ;;  %v2961_v45 = vld [vmem:[%s2761_s5 + $0x70] sm:$0xff]  ;;  %v2968_v46 = vld [vmem:[%s2761_s5 + $0x58] sm:$0xff]  ;;  %p3831_p12 = pmov %p3814_p4  ;;  %p3837_p0 = pmov %p3814_p4 }
  0x61   : > { %336 = vmatprep.subr.mxu0 %v2839_v17  ;;  %2064 = vmatprep.subr.mxu1 %v3763_v0  ;;  %3795 = vst [vmem:[#allocation11_spill] sm:$0xff] %v2948_v42  ;;  %v2974_v47 = vld [vmem:[%s2761_s5 + $0x40] sm:$0xff]  ;;  %v2981_v48 = vld [vmem:[%s2761_s5 + $0x28] sm:$0xff]  ;;  %v2988_v49 = vld [vmem:[%s2761_s5 + $0x10] sm:$0xff]  ;;  %s3335_s9 = scalar_select %p3821_p6, 3, 4 }
  0x62   : > { %337 = vmatpush1.msra.mxu0 %v2844_v18  ;;  %2065 = vmatpush3.msra.mxu1 %v2887_v28  ;;  %3796 = vst [vmem:[#allocation12_spill] sm:$0xff] %v2981_v48  ;;  %3797 = vst [vmem:[#allocation13_spill] sm:$0xff] %v2988_v49  ;;  %v298_v53 = vld [vmem:[%s2767_s8] sm:$0x7]  ;;  %s1912_s8 = smul.u32 6, %s3249_s25  ;;  %p3839_p13 = pmov %p3837_p0 }
  0x63   : > { %338 = vmatprep.subr.mxu0 %v2852_v20  ;;  %2066 = vmatprep.subr.mxu1 %v3763_v0  ;;  %v3075_v54 = vrot.slane %v298_v53, %v309_v52  ;;  %v304_v56 = vld [vmem:[%s303_s15] sm:$0x3f]  ;;  %v3078_v59 = vrot.slane %v298_v53, %v313_v55  ;;  %s1913_s28 = smul.u32 6, %s3335_s9  ;;  %s1890_s15 = sshll.u32 %s3335_s9, 1 }
  0x64   : > { %339 = vmatpush1.msra.mxu0 %v2857_v21  ;;  %2067 = vmatpush3.msra.mxu1 %v2900_v31  ;;  %v471_v50 = vrot.slane %v304_v56, 2  ;;  %s673_s21 = scalar_lea.vmem %s3071_s4, %s1912_s8  ;;  %s1022_s10 = scalar_lea.vmem %s3088_s18, %s1890_s15 }
  0x65   : > { %340 = vmatprep.subr.mxu0 %v2865_v23  ;;  %2068 = vmatprep.subr.mxu1 %v3763_v0  ;;  %3799 = vst [vmem:[#allocation14_spill] sm:$0xff] %v3075_v54  ;;  %3800 = vst [vmem:[#allocation15_spill] sm:$0xff] %v3078_v59  ;;  %s850_s30 = scalar_lea.vmem %s3071_s4, %s1913_s28 }
  0x66   : > { %341 = vmatpush1.msra.mxu0 %v2870_v24  ;;  %2069 = vmatpush3.msra.mxu1 %v2913_v34  ;;  %s3553_s11 = scalar_select %p3825_p10, 4, 3 }
  0x67   : > { %342 = vmatprep.subr.mxu0 %v2878_v26  ;;  %2070 = vmatprep.subr.mxu1 %v3763_v0  ;;  %s3642_s24 = scalar_select %p3831_p12, 5, 2 }
  0x68   : > { %343 = vmatpush1.msra.mxu0 %v2883_v27  ;;  %2071 = vmatpush3.msra.mxu1 %v2926_v37  ;;  %s1914_s12 = smul.u32 6, %s3553_s11 }
  0x69   : > { %344 = vmatprep.subr.mxu0 %v2891_v29  ;;  %2072 = vmatprep.subr.mxu1 %v3763_v0  ;;  %s3723_s25 = scalar_select %p3837_p0, 6, 1 }
  0x6a   : > { %345 = vmatpush1.msra.mxu0 %v2896_v30  ;;  %2073 = vmatpush3.msra.mxu1 %v2939_v40  ;;  %s1027_s22 = scalar_lea.vmem %s3071_s4, %s1914_s12 }
  0x6b   : > { %346 = vmatprep.subr.mxu0 %v2904_v32  ;;  %2074 = vmatprep.subr.mxu1 %v3763_v0  ;;  %s1916_s8 = smul.u32 6, %s3723_s25  ;;  %s1902_s27 = sshll.u32 %s3723_s25, 1 }
  0x6c   : > { %347 = vmatpush1.msra.mxu0 %v2909_v33  ;;  %2075 = vmatpush3.msra.mxu1 %v2952_v43  ;;  %s3735_s9 = scalar_select %p3839_p13, 7, 0 }
  0x6d   : > { %348 = vmatprep.subr.mxu0 %v2917_v35  ;;  %2076 = vmatprep.subr.mxu1 %v3763_v0 }
  0x6e   : > { %349 = vmatpush1.msra.mxu0 %v2922_v36  ;;  %2077 = vmatpush3.msra.mxu1 %v2961_v45  ;;  %s1917_s28 = smul.u32 6, %s3735_s9  ;;  %s1906_s16 = sshll.u32 %s3735_s9, 1 }
  0x6f   : > { %350 = vmatprep.subr.mxu0 %v2930_v38  ;;  %2078 = vmatprep.subr.mxu1 %v3763_v0 }
  0x70   : > { %351 = vmatpush1.msra.mxu0 %v2935_v39  ;;  %2079 = vmatpush3.msra.mxu1 %v2968_v46 }
  0x71   : > { %352 = vmatprep.subr.mxu0 %v2943_v41  ;;  %2080 = vmatprep.subr.mxu1 %v3763_v0 }
  0x72   : > { %353 = vmatpush1.msra.mxu0 %v2948_v42  ;;  %2081 = vmatpush3.msra.mxu1 %v2974_v47 }
  0x73   : > { %387 = vmatmul.mubr.f32.vlgmr.msra.gmra.mxu0 %v2955_v44  ;;  %499 = vmatprep.subr.mxu0 %v2779_v1 }
  0x74   : > { %500 = vmatpush1.msra.mxu0 %v2782_v2  ;;  %2082 = vmatprep.subr.mxu1 %v3763_v0 }
  0x75   : > { %501 = vmatprep.subr.mxu0 %v2785_v3  ;;  %2083 = vmatpush3.msra.mxu1 %v2981_v48 }
  0x76   : > { %502 = vmatpush1.msra.mxu0 %v2789_v4  ;;  %2084 = vmatprep.subr.mxu1 %v3763_v0 }
  0x77   : > { %503 = vmatprep.subr.mxu0 %v2793_v5  ;;  %2085 = vmatpush3.msra.mxu1 %v2988_v49 }
  0x78   : > { %504 = vmatpush1.msra.mxu0 %v2797_v6  ;;  %2087 = vmatmul.mubr.f32.vlgmr.msra.gmra.mxu1 %v2955_v44 }
  0x79   : > { %505 = vmatprep.subr.mxu0 %v2801_v7  ;;  %2089 = vmatprep.subr.mxu1 %v3763_v0 }
  0x7a   : > { %506 = vmatpush1.msra.mxu0 %v2805_v8  ;;  %2090 = vmatpush3.msra.mxu1 %v2832_v15 }
  0x7b   : > { %507 = vmatprep.subr.mxu0 %v2809_v9  ;;  %2091 = vmatprep.subr.mxu1 %v3763_v0 }
  0x7c   : > { %508 = vmatpush1.msra.mxu0 %v2813_v10  ;;  %2092 = vmatpush3.msra.mxu1 %v2835_v16 }
  0x7d   : > { %509 = vmatprep.subr.mxu0 %v2817_v11  ;;  %2093 = vmatprep.subr.mxu1 %v3763_v0 }
  0x7e   : > { %510 = vmatpush1.msra.mxu0 %v2821_v12  ;;  %2094 = vmatpush3.msra.mxu1 %v2848_v19 }
  0x7f   : > { %511 = vmatprep.subr.mxu0 %v2825_v13  ;;  %2095 = vmatprep.subr.mxu1 %v3763_v0 }
  0x80   : > { %512 = vmatpush1.msra.mxu0 %v2829_v14  ;;  %2096 = vmatpush3.msra.mxu1 %v2861_v22 }
  0x81   : > { %513 = vmatprep.subr.mxu0 %v2839_v17  ;;  %2097 = vmatprep.subr.mxu1 %v3763_v0 }
  0x82   : > { %514 = vmatpush1.msra.mxu0 %v2844_v18  ;;  %2098 = vmatpush3.msra.mxu1 %v2874_v25 }
  0x83   : > { %515 = vmatprep.subr.mxu0 %v2852_v20  ;;  %2099 = vmatprep.subr.mxu1 %v3763_v0 }
  0x84   : > { %516 = vmatpush1.msra.mxu0 %v2857_v21  ;;  %2100 = vmatpush3.msra.mxu1 %v2887_v28 }
  0x85   : > { %517 = vmatprep.subr.mxu0 %v2865_v23  ;;  %2101 = vmatprep.subr.mxu1 %v3763_v0 }
  0x86   : > { %518 = vmatpush1.msra.mxu0 %v2870_v24  ;;  %2102 = vmatpush3.msra.mxu1 %v2900_v31 }
  0x87   : > { %519 = vmatprep.subr.mxu0 %v2878_v26  ;;  %2103 = vmatprep.subr.mxu1 %v3763_v0 }
  0x88   : > { %520 = vmatpush1.msra.mxu0 %v2883_v27  ;;  %2104 = vmatpush3.msra.mxu1 %v2913_v34 }
  0x89   : > { %521 = vmatprep.subr.mxu0 %v2891_v29  ;;  %2105 = vmatprep.subr.mxu1 %v3763_v0 }
  0x8a   : > { %522 = vmatpush1.msra.mxu0 %v2896_v30  ;;  %2106 = vmatpush3.msra.mxu1 %v2926_v37 }
  0x8b   : > { %523 = vmatprep.subr.mxu0 %v2904_v32  ;;  %2107 = vmatprep.subr.mxu1 %v3763_v0 }
  0x8c   : > { %524 = vmatpush1.msra.mxu0 %v2909_v33  ;;  %2108 = vmatpush3.msra.mxu1 %v2939_v40 }
  0x8d   : > { %525 = vmatprep.subr.mxu0 %v2917_v35  ;;  %2109 = vmatprep.subr.mxu1 %v3763_v0 }
  0x8e   : > { %526 = vmatpush1.msra.mxu0 %v2922_v36  ;;  %2110 = vmatpush3.msra.mxu1 %v2952_v43 }
  0x8f   : > { %527 = vmatprep.subr.mxu0 %v2930_v38  ;;  %2111 = vmatprep.subr.mxu1 %v3763_v0 }
  0x90   : > { %528 = vmatpush1.msra.mxu0 %v2935_v39  ;;  %2112 = vmatpush3.msra.mxu1 %v2961_v45 }
  0x91   : > { %529 = vmatprep.subr.mxu0 %v2943_v41  ;;  %2113 = vmatprep.subr.mxu1 %v3763_v0 }
  0x92   : > { %530 = vmatpush1.msra.mxu0 %v2948_v42  ;;  %563 = vmatprep.mubr.f32.mxu0 %v3763_v0 }
  0x93   : > { %2114 = vmatpush3.msra.mxu1 %v2968_v46  ;;  %2121 = vmatprep.mubr.msk.f32.mxu1 %vm2618_vm0, %v3763_v0 }
  0x94   : > { %2115 = vmatprep.subr.mxu1 %v3763_v0  ;;  %676 = vmatprep.subr.mxu0 %v2779_v1 }
  0x95   : > { %2116 = vmatpush3.msra.mxu1 %v2974_v47 }
  0x96   : > { %2117 = vmatprep.subr.mxu1 %v3763_v0 }
  0x97   : > { %2118 = vmatpush3.msra.mxu1 %v2981_v48 }
  0x98   : > { %2119 = vmatprep.subr.mxu1 %v3763_v0 }
  0x99   : > { %2120 = vmatpush3.msra.mxu1 %v2988_v49 }
  0x9a   : > { %2124 = vmatprep.subr.mxu1 %v3763_v0 }
 0x133   : > { %v388_v57 = vpop.f32.mrf.mxu0 }
 0x134   : > { %v389_v58 = vadd.f32 %v388_v57, %v3075_v54  ;;  %v317_v57 = vsub.s32 2, %v308_v51 }
 0x135   : > { %v390_v60 = vpop.f32.mrf.mxu0 }
 0x136   : > { %v463_v61 = vadd.f32 %v389_v58, %v304_v56  ;;  %v391_v63 = vadd.f32 %v390_v60, %v3078_v59  ;;  %v3081_v55 = vrot.slane %v298_v53, %v317_v57  ;;  %v481_v60 = vrot.slane %v304_v56, 4  ;;  %v3803_v56 = vld [vmem:[#allocation11_spill] sm:$0xff] }
 0x138   : > { %v1876_v62 = vmul.f32 -1.442695, %v463_v61  ;;  %v473_v0 = vadd.f32 %v471_v50, %v391_v63  ;;  %v459_v1 = vpop.f32.mrf.mxu1  ;;  %v3805_v50 = vld [vmem:[#allocation9_spill] sm:$0xff] }
 0x139   : > { %v460_v61 = vadd.f32 %v459_v1, %v3081_v55 }
 0x13a   : > { %2389 = vpow2.f32 %v1876_v62  ;;  %v2088_v49 = vpop.f32.mrf.mxu1  ;;  %v1877_v42 = vmul.f32 -1.442695, %v473_v0 }
 0x13c   : > { %2391 = vpow2.f32 %v1877_v42 }
 0x147   : > { %v2390_v52 = vpop.eup %2389 }
 0x148   : > { %v467_v41 = vadd.f32 1.0, %v2390_v52  ;;  %v497_v52 = vld [vmem:[%s496_s26] sm:$0x3f]  ;;  %s1915_s26 = smul.u32 6, %s3642_s24 }
 0x149   : > { %v2392_v54 = vpop.eup %2391 }
 0x14a   : > { %2393 = vrcp.f32 %v467_v41  ;;  %v477_v58 = vadd.f32 1.0, %v2392_v54  ;;  %v3801_v54 = vmov 0.0   ;;  %s1204_s29 = scalar_lea.vmem %s3071_s4, %s1915_s26 }
 0x14c   : > { %2395 = vrcp.f32 %v477_v58 }
 0x157   : > { %v2394_v59 = vpop.eup %2393 }
 0x158   : > { %v480_v62 = vmul.f32 %v2394_v59, %v460_v61  ;;  %v3804_v59 = vld [vmem:[#allocation13_spill] sm:$0xff]  ;;  %v3807_v61 = vld [vmem:[#allocation14_spill] sm:$0xff] }
 0x159   : > { %v2396_v0 = vpop.eup %2395 }
 0x15a   : > { %v483_v63 = vadd.f32 %v481_v60, %v480_v62  ;;  %v485_v41 = vsub.f32 1.0, %v2396_v0  ;;  %v487_v49 = vmul.f32 %v2396_v0, %v2955_v44  ;;  %v3802_v44 = vld [vmem:[#allocation10_spill] sm:$0xff] }
 0x15c   : > { %2397 = vtanh.f32 %v483_v63 }
 0x169   : > { %v2398_v42 = vpop.eup %2397 }
 0x16a   : > { %v486_v1 = vmul.f32 %v2398_v42, %v485_v41  ;;  %v3808_v42 = vld [vmem:[#allocation15_spill] sm:$0xff] }
 0x16c   : > { %v488_v51 = vadd.f32 %v487_v49, %v486_v1  ;;  %v648_v1 = vrot.slane %v497_v52, 2 }
 0x16e   : > { %489 = vst [vmem:[#allocation2] sm:$0x3] %v488_v51  ;;  %492 = vst [vmem:[%s491_s19] sm:$0x3] %v488_v51  ;;  %s1894_s19 = sshll.u32 %s3553_s11, 1 }
 0x16f   : > { %s1199_s23 = scalar_lea.vmem %s3088_s18, %s1894_s19 }
 0x175   : > { %v3093_v53 = vld [vmem:[#allocation2] sm:$0x3] }
 0x176   : > { %564 = vmatmul.mubr.f32.vlgmr.msra.gmra.mxu0 %v3093_v53  ;;  %2122 = vmatmul.mubr.f32.vlgmr.msra.gmra.mxu1 %v3093_v53 }
 0x177   : > { %677 = vmatpush1.msra.mxu0 %v2782_v2  ;;  %2125 = vmatpush3.msra.mxu1 %v2832_v15 }
 0x178   : > { %678 = vmatprep.subr.mxu0 %v2785_v3  ;;  %2126 = vmatprep.subr.mxu1 %v3801_v54 }
 0x179   : > { %679 = vmatpush1.msra.mxu0 %v2789_v4  ;;  %2127 = vmatpush3.msra.mxu1 %v2835_v16 }
 0x17a   : > { %680 = vmatprep.subr.mxu0 %v2793_v5  ;;  %2128 = vmatprep.subr.mxu1 %v3801_v54 }
 0x17b   : > { %681 = vmatpush1.msra.mxu0 %v2797_v6  ;;  %2129 = vmatpush3.msra.mxu1 %v2848_v19 }
 0x17c   : > { %682 = vmatprep.subr.mxu0 %v2801_v7  ;;  %2130 = vmatprep.subr.mxu1 %v3801_v54 }
 0x17d   : > { %683 = vmatpush1.msra.mxu0 %v2805_v8  ;;  %2131 = vmatpush3.msra.mxu1 %v2861_v22 }
 0x17e   : > { %684 = vmatprep.subr.mxu0 %v2809_v9  ;;  %2132 = vmatprep.subr.mxu1 %v3801_v54 }
 0x17f   : > { %685 = vmatpush1.msra.mxu0 %v2813_v10  ;;  %2133 = vmatpush3.msra.mxu1 %v2874_v25 }
 0x180   : > { %686 = vmatprep.subr.mxu0 %v2817_v11  ;;  %2134 = vmatprep.subr.mxu1 %v3801_v54 }
 0x181   : > { %687 = vmatpush1.msra.mxu0 %v2821_v12  ;;  %2135 = vmatpush3.msra.mxu1 %v2887_v28 }
 0x182   : > { %688 = vmatprep.subr.mxu0 %v2825_v13  ;;  %2136 = vmatprep.subr.mxu1 %v3801_v54 }
 0x183   : > { %689 = vmatpush1.msra.mxu0 %v2829_v14  ;;  %2137 = vmatpush3.msra.mxu1 %v2900_v31 }
 0x184   : > { %690 = vmatprep.subr.mxu0 %v2839_v17  ;;  %2138 = vmatprep.subr.mxu1 %v3801_v54 }
 0x185   : > { %691 = vmatpush1.msra.mxu0 %v2844_v18  ;;  %2139 = vmatpush3.msra.mxu1 %v2913_v34 }
 0x186   : > { %692 = vmatprep.subr.mxu0 %v2852_v20  ;;  %2140 = vmatprep.subr.mxu1 %v3801_v54 }
 0x187   : > { %693 = vmatpush1.msra.mxu0 %v2857_v21  ;;  %2141 = vmatpush3.msra.mxu1 %v2926_v37 }
 0x188   : > { %694 = vmatprep.subr.mxu0 %v2865_v23  ;;  %2142 = vmatprep.subr.mxu1 %v3801_v54 }
 0x189   : > { %695 = vmatpush1.msra.mxu0 %v2870_v24  ;;  %2143 = vmatpush3.msra.mxu1 %v2939_v40 }
 0x18a   : > { %696 = vmatprep.subr.mxu0 %v2878_v26  ;;  %2144 = vmatprep.subr.mxu1 %v3801_v54 }
 0x18b   : > { %697 = vmatpush1.msra.mxu0 %v2883_v27  ;;  %2145 = vmatpush3.msra.mxu1 %v2952_v43 }
 0x18c   : > { %698 = vmatprep.subr.mxu0 %v2891_v29  ;;  %2146 = vmatprep.subr.mxu1 %v3801_v54 }
 0x18d   : > { %699 = vmatpush1.msra.mxu0 %v2896_v30  ;;  %2147 = vmatpush3.msra.mxu1 %v2961_v45 }
 0x18e   : > { %700 = vmatprep.subr.mxu0 %v2904_v32  ;;  %2148 = vmatprep.subr.mxu1 %v3801_v54 }
 0x18f   : > { %701 = vmatpush1.msra.mxu0 %v2909_v33  ;;  %2149 = vmatpush3.msra.mxu1 %v2968_v46 }
 0x190   : > { %702 = vmatprep.subr.mxu0 %v2917_v35  ;;  %2150 = vmatprep.subr.mxu1 %v3801_v54 }
 0x191   : > { %703 = vmatpush1.msra.mxu0 %v2922_v36  ;;  %2151 = vmatpush3.msra.mxu1 %v2974_v47 }
 0x192   : > { %704 = vmatprep.subr.mxu0 %v2930_v38  ;;  %2152 = vmatprep.subr.mxu1 %v3801_v54 }
 0x193   : > { %705 = vmatpush1.msra.mxu0 %v2935_v39  ;;  %2153 = vmatpush3.msra.mxu1 %v2981_v48 }
 0x194   : > { %706 = vmatprep.subr.mxu0 %v3802_v44  ;;  %2154 = vmatprep.subr.mxu1 %v3801_v54 }
 0x195   : > { %707 = vmatpush1.msra.mxu0 %v3803_v56  ;;  %740 = vmatprep.mubr.f32.mxu0 %v3801_v54 }
 0x196   : > { %2155 = vmatpush3.msra.mxu1 %v3804_v59  ;;  %2156 = vmatprep.mubr.msk.f32.mxu1 %vm2618_vm0, %v3801_v54 }
 0x197   : > { %853 = vmatprep.subr.mxu0 %v3805_v50  ;;  %2159 = vmatprep.subr.mxu1 %v3801_v54 }
 0x236   : > { %v565_v57 = vpop.f32.mrf.mxu0  ;;  %v636_v58 = vpop.f32.mrf.mxu1 }
 0x237   : > { %v566_v60 = vadd.f32 %v565_v57, %v3807_v61  ;;  %v637_v57 = vadd.f32 %v636_v58, %v3081_v55  ;;  %v658_v61 = vrot.slane %v497_v52, 4  ;;  %v3813_v58 = vld [vmem:[#allocation9_spill] sm:$0xff] }
 0x238   : > { %v567_v62 = vpop.f32.mrf.mxu0  ;;  %v2123_v63 = vpop.f32.mrf.mxu1 }
 0x239   : > { %v640_v0 = vadd.f32 %v566_v60, %v497_v52  ;;  %v568_v49 = vadd.f32 %v567_v62, %v3808_v42  ;;  %v3812_v52 = vld [vmem:[#allocation13_spill] sm:$0xff] }
 0x23b   : > { %v1880_v41 = vmul.f32 -1.442695, %v640_v0  ;;  %v650_v51 = vadd.f32 %v648_v1, %v568_v49 }
 0x23d   : > { %2399 = vpow2.f32 %v1880_v41  ;;  %v1881_v50 = vmul.f32 -1.442695, %v650_v51 }
 0x23f   : > { %2401 = vpow2.f32 %v1881_v50 }
 0x24a   : > { %v2400_v59 = vpop.eup %2399 }
 0x24b   : > { %v644_v56 = vadd.f32 1.0, %v2400_v59  ;;  %v3811_v59 = vld [vmem:[#allocation11_spill] sm:$0xff] }
 0x24c   : > { %v2402_v44 = vpop.eup %2401 }
 0x24d   : > { %2403 = vrcp.f32 %v644_v56  ;;  %v654_v48 = vadd.f32 1.0, %v2402_v44 }
 0x24f   : > { %2405 = vrcp.f32 %v654_v48  ;;  %v3809_v48 = vld [vmem:[#allocation12_spill] sm:$0xff] }
 0x25a   : > { %v2404_v63 = vpop.eup %2403 }
 0x25b   : > { %v657_v60 = vmul.f32 %v2404_v63, %v637_v57  ;;  %v3815_v63 = vld [vmem:[#allocation14_spill] sm:$0xff] }
 0x25c   : > { %v2406_v62 = vpop.eup %2405 }
 0x25d   : > { %v660_v0 = vadd.f32 %v658_v61, %v657_v60  ;;  %v662_v41 = vsub.f32 1.0, %v2406_v62  ;;  %v664_v50 = vmul.f32 %v2406_v62, %v3093_v53  ;;  %v3810_v53 = vld [vmem:[#allocation10_spill] sm:$0xff]  ;;  %v674_v61 = vld [vmem:[%s673_s21] sm:$0x3f]  ;;  %s1381_s21 = scalar_lea.vmem %s3071_s4, %s1916_s8 }
 0x25f   : > { %2407 = vtanh.f32 %v660_v0 }
 0x26c   : > { %v2408_v49 = vpop.eup %2407 }
 0x26d   : > { %v663_v1 = vmul.f32 %v2408_v49, %v662_v41 }
 0x26f   : > { %v665_v56 = vadd.f32 %v664_v50, %v663_v1  ;;  %v825_v50 = vrot.slane %v674_v61, 2 }
 0x271   : > { %666 = vst [vmem:[#allocation2] sm:$0x3] %v665_v56  ;;  %669 = vst [vmem:[%s668_s6] sm:$0x3] %v665_v56 }
 0x278   : > { %v3176_v44 = vld [vmem:[#allocation2] sm:$0x3] }
 0x279   : > { %741 = vmatmul.mubr.f32.vlgmr.msra.gmra.mxu0 %v3176_v44  ;;  %2157 = vmatmul.mubr.f32.vlgmr.msra.gmra.mxu1 %v3176_v44 }
 0x27a   : > { %854 = vmatpush1.msra.mxu0 %v2782_v2  ;;  %2160 = vmatpush3.msra.mxu1 %v2832_v15 }
 0x27b   : > { %855 = vmatprep.subr.mxu0 %v2785_v3  ;;  %2161 = vmatprep.subr.mxu1 %v3801_v54 }
 0x27c   : > { %856 = vmatpush1.msra.mxu0 %v2789_v4  ;;  %2162 = vmatpush3.msra.mxu1 %v2835_v16 }
 0x27d   : > { %857 = vmatprep.subr.mxu0 %v2793_v5  ;;  %2163 = vmatprep.subr.mxu1 %v3801_v54 }
 0x27e   : > { %858 = vmatpush1.msra.mxu0 %v2797_v6  ;;  %2164 = vmatpush3.msra.mxu1 %v2848_v19 }
 0x27f   : > { %859 = vmatprep.subr.mxu0 %v2801_v7  ;;  %2165 = vmatprep.subr.mxu1 %v3801_v54 }
 0x280   : > { %860 = vmatpush1.msra.mxu0 %v2805_v8  ;;  %2166 = vmatpush3.msra.mxu1 %v2861_v22 }
 0x281   : > { %861 = vmatprep.subr.mxu0 %v2809_v9  ;;  %2167 = vmatprep.subr.mxu1 %v3801_v54 }
 0x282   : > { %862 = vmatpush1.msra.mxu0 %v2813_v10  ;;  %2168 = vmatpush3.msra.mxu1 %v2874_v25 }
 0x283   : > { %863 = vmatprep.subr.mxu0 %v2817_v11  ;;  %2169 = vmatprep.subr.mxu1 %v3801_v54 }
 0x284   : > { %864 = vmatpush1.msra.mxu0 %v2821_v12  ;;  %2170 = vmatpush3.msra.mxu1 %v2887_v28 }
 0x285   : > { %865 = vmatprep.subr.mxu0 %v2825_v13  ;;  %2171 = vmatprep.subr.mxu1 %v3801_v54 }
 0x286   : > { %866 = vmatpush1.msra.mxu0 %v2829_v14  ;;  %2172 = vmatpush3.msra.mxu1 %v2900_v31 }
 0x287   : > { %867 = vmatprep.subr.mxu0 %v2839_v17  ;;  %2173 = vmatprep.subr.mxu1 %v3801_v54 }
 0x288   : > { %868 = vmatpush1.msra.mxu0 %v2844_v18  ;;  %2174 = vmatpush3.msra.mxu1 %v2913_v34 }
 0x289   : > { %869 = vmatprep.subr.mxu0 %v2852_v20  ;;  %2175 = vmatprep.subr.mxu1 %v3801_v54 }
 0x28a   : > { %870 = vmatpush1.msra.mxu0 %v2857_v21  ;;  %2176 = vmatpush3.msra.mxu1 %v2926_v37 }
 0x28b   : > { %871 = vmatprep.subr.mxu0 %v2865_v23  ;;  %2177 = vmatprep.subr.mxu1 %v3801_v54 }
 0x28c   : > { %872 = vmatpush1.msra.mxu0 %v2870_v24  ;;  %2178 = vmatpush3.msra.mxu1 %v2939_v40 }
 0x28d   : > { %873 = vmatprep.subr.mxu0 %v2878_v26  ;;  %2179 = vmatprep.subr.mxu1 %v3801_v54 }
 0x28e   : > { %874 = vmatpush1.msra.mxu0 %v2883_v27  ;;  %2180 = vmatpush3.msra.mxu1 %v2952_v43 }
 0x28f   : > { %875 = vmatprep.subr.mxu0 %v2891_v29  ;;  %2181 = vmatprep.subr.mxu1 %v3801_v54 }
 0x290   : > { %876 = vmatpush1.msra.mxu0 %v2896_v30  ;;  %2182 = vmatpush3.msra.mxu1 %v2961_v45 }
 0x291   : > { %877 = vmatprep.subr.mxu0 %v2904_v32  ;;  %2183 = vmatprep.subr.mxu1 %v3801_v54 }
 0x292   : > { %878 = vmatpush1.msra.mxu0 %v2909_v33  ;;  %2184 = vmatpush3.msra.mxu1 %v2968_v46 }
 0x293   : > { %879 = vmatprep.subr.mxu0 %v2917_v35  ;;  %2185 = vmatprep.subr.mxu1 %v3801_v54 }
 0x294   : > { %880 = vmatpush1.msra.mxu0 %v2922_v36  ;;  %2186 = vmatpush3.msra.mxu1 %v2974_v47 }
 0x295   : > { %881 = vmatprep.subr.mxu0 %v2930_v38  ;;  %2187 = vmatprep.subr.mxu1 %v3801_v54 }
 0x296   : > { %882 = vmatpush1.msra.mxu0 %v2935_v39  ;;  %2188 = vmatpush3.msra.mxu1 %v3809_v48 }
 0x297   : > { %883 = vmatprep.subr.mxu0 %v3810_v53  ;;  %2189 = vmatprep.subr.mxu1 %v3801_v54 }
 0x298   : > { %884 = vmatpush1.msra.mxu0 %v3811_v59  ;;  %917 = vmatprep.mubr.f32.mxu0 %v3801_v54 }
 0x299   : > { %2190 = vmatpush3.msra.mxu1 %v3812_v52  ;;  %2191 = vmatprep.mubr.msk.f32.mxu1 %vm2618_vm0, %v3801_v54 }
 0x29a   : > { %1030 = vmatprep.subr.mxu0 %v3813_v58  ;;  %2194 = vmatprep.subr.mxu1 %v3801_v54 }
 0x339   : > { %v742_v51 = vpop.f32.mrf.mxu0  ;;  %v813_v57 = vpop.f32.mrf.mxu1 }
 0x33a   : > { %v743_v60 = vadd.f32 %v742_v51, %v3815_v63  ;;  %v814_v51 = vadd.f32 %v813_v57, %v3081_v55  ;;  %v835_v63 = vrot.slane %v674_v61, 4  ;;  %v3406_v57 = vld [vmem:[%s2761_s5 + $0x118] sm:$0xff] }
 0x33b   : > { %v744_v0 = vpop.f32.mrf.mxu0  ;;  %v2158_v62 = vpop.f32.mrf.mxu1 }
 0x33c   : > { %v817_v41 = vadd.f32 %v743_v60, %v674_v61  ;;  %v745_v1 = vadd.f32 %v744_v0, %v3808_v42  ;;  %v3402_v61 = vld [vmem:[%s2761_s5 + $0x108] sm:$0xff] }
 0x33e   : > { %v1884_v49 = vmul.f32 -1.442695, %v817_v41  ;;  %v827_v56 = vadd.f32 %v825_v50, %v745_v1 }
 0x340   : > { %2409 = vpow2.f32 %v1884_v49  ;;  %v1885_v58 = vmul.f32 -1.442695, %v827_v56 }
 0x342   : > { %2411 = vpow2.f32 %v1885_v58  ;;  %v3415_v58 = vld [vmem:[%s2761_s5 + $0xf0] sm:$0xff] }
 0x34d   : > { %v2410_v52 = vpop.eup %2409 }
 0x34e   : > { %v821_v59 = vadd.f32 1.0, %v2410_v52  ;;  %v3397_v52 = vld [vmem:[%s2761_s5 + $0x110] sm:$0xff] }
 0x34f   : > { %v2412_v53 = vpop.eup %2411 }
 0x350   : > { %2413 = vrcp.f32 %v821_v59  ;;  %v831_v48 = vadd.f32 1.0, %v2412_v53 }
 0x352   : > { %2415 = vrcp.f32 %v831_v48  ;;  %v3393_v48 = vld [vmem:[%s2761_s5 + $0x130] sm:$0xff] }
 0x35d   : > { %v2414_v62 = vpop.eup %2413 }
 0x35e   : > { %v834_v60 = vmul.f32 %v2414_v62, %v814_v51  ;;  %v3419_v51 = vld [vmem:[%s2761_s5 + $0x100] sm:$0xff] }
 0x35f   : > { %v2416_v0 = vpop.eup %2415  ;;  %v3423_v62 = vld [vmem:[%s2761_s5 + $0xe0] sm:$0xff] }
 0x360   : > { %v837_v41 = vadd.f32 %v835_v63, %v834_v60  ;;  %v839_v49 = vsub.f32 1.0, %v2416_v0  ;;  %v841_v56 = vmul.f32 %v2416_v0, %v3176_v44  ;;  %v3389_v44 = vld [vmem:[%s2761_s5 + $0x120] sm:$0xff]  ;;  %v3410_v63 = vld [vmem:[%s2761_s5 + $0xf8] sm:$0xff]  ;;  %v3436_v0 = vld [vmem:[%s2761_s5 + $0xc8] sm:$0xff] }
 0x361   : > { %v3428_v60 = vld [vmem:[%s2761_s5 + $0xd8] sm:$0xff] }
 0x362   : > { %2417 = vtanh.f32 %v837_v41  ;;  %v3432_v41 = vld [vmem:[%s2761_s5 + $0xe8] sm:$0xff] }
 0x36f   : > { %v2418_v1 = vpop.eup %2417 }
 0x370   : > { %v840_v50 = vmul.f32 %v2418_v1, %v839_v49  ;;  %v3441_v49 = vld [vmem:[%s2761_s5 + $0xc0] sm:$0xff]  ;;  %v3445_v1 = vld [vmem:[%s2761_s5 + $0xd0] sm:$0xff] }
 0x372   : > { %v842_v59 = vadd.f32 %v841_v56, %v840_v50  ;;  %v3449_v50 = vld [vmem:[%s2761_s5 + $0xb0] sm:$0xff]  ;;  %v3454_v56 = vld [vmem:[%s2761_s5 + $0xa8] sm:$0xff] }
 0x374   : > { %843 = vst [vmem:[#allocation2] sm:$0x3] %v842_v59  ;;  %846 = vst [vmem:[%s845_s7] sm:$0x3] %v842_v59  ;;  %v3458_v59 = vld [vmem:[%s2761_s5 + $0xb8] sm:$0xff]  ;;  %s1553_s7 = scalar_lea.vmem %s3088_s18, %s1902_s27 }
 0x37b   : > { %v3259_v53 = vld [vmem:[#allocation2] sm:$0x3] }
 0x37c   : > { %918 = vmatmul.mubr.f32.vlgmr.msra.gmra.mxu0 %v3259_v53  ;;  %2192 = vmatmul.mubr.f32.vlgmr.msra.gmra.mxu1 %v3259_v53 }
 0x37d   : > { %1031 = vmatpush1.msra.mxu0 %v2782_v2  ;;  %2195 = vmatpush3.msra.mxu1 %v2832_v15  ;;  %v3816_v2 = vld [vmem:[#allocation12_spill] sm:$0xff] }
 0x37e   : > { %1032 = vmatprep.subr.mxu0 %v2785_v3  ;;  %2196 = vmatprep.subr.mxu1 %v3801_v54  ;;  %v3817_v3 = vld [vmem:[#allocation10_spill] sm:$0xff] }
 0x37f   : > { %1033 = vmatpush1.msra.mxu0 %v2789_v4  ;;  %2197 = vmatpush3.msra.mxu1 %v2835_v16  ;;  %v3818_v4 = vld [vmem:[#allocation11_spill] sm:$0xff] }
 0x380   : > { %1034 = vmatprep.subr.mxu0 %v2793_v5  ;;  %2198 = vmatprep.subr.mxu1 %v3801_v54  ;;  %v3819_v5 = vld [vmem:[#allocation13_spill] sm:$0xff] }
 0x381   : > { %1035 = vmatpush1.msra.mxu0 %v2797_v6  ;;  %2199 = vmatpush3.msra.mxu1 %v2848_v19  ;;  %v3329_v6 = vld [vmem:[%s2761_s5 + $0x170] sm:$0xff] }
 0x382   : > { %1036 = vmatprep.subr.mxu0 %v2801_v7  ;;  %2200 = vmatprep.subr.mxu1 %v3801_v54  ;;  %3820 = vst [vmem:[#allocation15_spill] sm:$0xff] %v3329_v6  ;;  %v851_v7 = vld [vmem:[%s850_s30] sm:$0x3f]  ;;  %s1558_s30 = scalar_lea.vmem %s3071_s4, %s1917_s28  ;;  %s1730_s4 = scalar_lea.vmem %s3088_s18, %s1906_s16 }
 0x383   : > { %1037 = vmatpush1.msra.mxu0 %v2805_v8  ;;  %2201 = vmatpush3.msra.mxu1 %v2861_v22 }
 0x384   : > { %1038 = vmatprep.subr.mxu0 %v2809_v9  ;;  %2202 = vmatprep.subr.mxu1 %v3801_v54 }
 0x385   : > { %1039 = vmatpush1.msra.mxu0 %v2813_v10  ;;  %2203 = vmatpush3.msra.mxu1 %v2874_v25  ;;  %v3822_v10 = vld [vmem:[#allocation14_spill] sm:$0xff]  ;;  %v1012_v25 = vrot.slane %v851_v7, 4 }
 0x386   : > { %1040 = vmatprep.subr.mxu0 %v2817_v11  ;;  %2204 = vmatprep.subr.mxu1 %v3801_v54 }
 0x387   : > { %1041 = vmatpush1.msra.mxu0 %v2821_v12  ;;  %2205 = vmatpush3.msra.mxu1 %v2887_v28 }
 0x388   : > { %1042 = vmatprep.subr.mxu0 %v2825_v13  ;;  %2206 = vmatprep.subr.mxu1 %v3801_v54 }
 0x389   : > { %1043 = vmatpush1.msra.mxu0 %v2829_v14  ;;  %2207 = vmatpush3.msra.mxu1 %v2900_v31 }
 0x38a   : > { %1044 = vmatprep.subr.mxu0 %v2839_v17  ;;  %2208 = vmatprep.subr.mxu1 %v3801_v54  ;;  %v1002_v17 = vrot.slane %v851_v7, 2 }
 0x38b   : > { %1045 = vmatpush1.msra.mxu0 %v2844_v18  ;;  %2209 = vmatpush3.msra.mxu1 %v2913_v34 }
 0x38c   : > { %1046 = vmatprep.subr.mxu0 %v2852_v20  ;;  %2210 = vmatprep.subr.mxu1 %v3801_v54 }
 0x38d   : > { %1047 = vmatpush1.msra.mxu0 %v2857_v21  ;;  %2211 = vmatpush3.msra.mxu1 %v2926_v37  ;;  %v3354_v37 = vld [vmem:[%s2761_s5 + $0x178] sm:$0xff] }
 0x38e   : > { %1048 = vmatprep.subr.mxu0 %v2865_v23  ;;  %2212 = vmatprep.subr.mxu1 %v3801_v54 }
 0x38f   : > { %1049 = vmatpush1.msra.mxu0 %v2870_v24  ;;  %2213 = vmatpush3.msra.mxu1 %v2939_v40  ;;  %v3367_v40 = vld [vmem:[%s2761_s5 + $0x160] sm:$0xff] }
 0x390   : > { %1050 = vmatprep.subr.mxu0 %v2878_v26  ;;  %2214 = vmatprep.subr.mxu1 %v3801_v54 }
 0x391   : > { %1051 = vmatpush1.msra.mxu0 %v2883_v27  ;;  %2215 = vmatpush3.msra.mxu1 %v2952_v43  ;;  %v3371_v43 = vld [vmem:[%s2761_s5 + $0x140] sm:$0xff] }
 0x392   : > { %1052 = vmatprep.subr.mxu0 %v2891_v29  ;;  %2216 = vmatprep.subr.mxu1 %v3801_v54 }
 0x393   : > { %1053 = vmatpush1.msra.mxu0 %v2896_v30  ;;  %2217 = vmatpush3.msra.mxu1 %v2961_v45  ;;  %v3376_v45 = vld [vmem:[%s2761_s5 + $0x138] sm:$0xff] }
 0x394   : > { %1054 = vmatprep.subr.mxu0 %v2904_v32  ;;  %2218 = vmatprep.subr.mxu1 %v3801_v54 }
 0x395   : > { %1055 = vmatpush1.msra.mxu0 %v2909_v33  ;;  %2219 = vmatpush3.msra.mxu1 %v2968_v46  ;;  %v3380_v46 = vld [vmem:[%s2761_s5 + $0x148] sm:$0xff] }
 0x396   : > { %1056 = vmatprep.subr.mxu0 %v2917_v35  ;;  %2220 = vmatprep.subr.mxu1 %v3801_v54 }
 0x397   : > { %1057 = vmatpush1.msra.mxu0 %v2922_v36  ;;  %2221 = vmatpush3.msra.mxu1 %v2974_v47  ;;  %v3350_v36 = vld [vmem:[%s2761_s5 + $0x168] sm:$0xff] }
 0x398   : > { %1058 = vmatprep.subr.mxu0 %v2930_v38  ;;  %2222 = vmatprep.subr.mxu1 %v3801_v54  ;;  %v3358_v38 = vld [vmem:[%s2761_s5 + $0x158] sm:$0xff]  ;;  %v3384_v47 = vld [vmem:[%s2761_s5 + $0x128] sm:$0xff] }
 0x399   : > { %1059 = vmatpush1.msra.mxu0 %v2935_v39  ;;  %2223 = vmatpush3.msra.mxu1 %v3816_v2  ;;  %v3363_v39 = vld [vmem:[%s2761_s5 + $0x150] sm:$0xff] }
 0x39a   : > { %1060 = vmatprep.subr.mxu0 %v3817_v3  ;;  %2224 = vmatprep.subr.mxu1 %v3801_v54  ;;  %v3467_v3 = vld [vmem:[%s2761_s5 + $0x90] sm:$0xff] }
 0x39b   : > { %1061 = vmatpush1.msra.mxu0 %v3818_v4  ;;  %1094 = vmatprep.mubr.f32.mxu0 %v3801_v54  ;;  %v3471_v4 = vld [vmem:[%s2761_s5 + $0xa0] sm:$0xff] }
 0x39c   : > { %2225 = vmatpush3.msra.mxu1 %v3819_v5  ;;  %2226 = vmatprep.mubr.msk.f32.mxu1 %vm2618_vm0, %v3801_v54 }
 0x39d   : > { %1207 = vmatprep.subr.mxu0 %v3329_v6  ;;  %2229 = vmatprep.subr.mxu1 %v3801_v54 }
 0x43c   : > { %v919_v8 = vpop.f32.mrf.mxu0  ;;  %v990_v9 = vpop.f32.mrf.mxu1 }
 0x43d   : > { %v920_v11 = vadd.f32 %v919_v8, %v3822_v10  ;;  %v991_v24 = vadd.f32 %v990_v9, %v3081_v55  ;;  %v3480_v8 = vld [vmem:[%s2761_s5 + $0x78] sm:$0xff]  ;;  %v3484_v9 = vld [vmem:[%s2761_s5 + $0x88] sm:$0xff] }
 0x43e   : > { %v921_v12 = vpop.f32.mrf.mxu0  ;;  %v2193_v13 = vpop.f32.mrf.mxu1 }
 0x43f   : > { %v994_v14 = vadd.f32 %v920_v11, %v851_v7  ;;  %v922_v16 = vadd.f32 %v921_v12, %v3808_v42  ;;  %v3475_v7 = vld [vmem:[%s2761_s5 + $0x80] sm:$0xff]  ;;  %v3488_v11 = vld [vmem:[%s2761_s5 + $0x68] sm:$0xff]  ;;  %v3497_v13 = vld [vmem:[%s2761_s5 + $0x70] sm:$0xff] }
 0x440   : > { %v3493_v12 = vld [vmem:[%s2761_s5 + $0x60] sm:$0xff] }
 0x441   : > { %v1888_v15 = vmul.f32 -1.442695, %v994_v14  ;;  %v1004_v18 = vadd.f32 %v1002_v17, %v922_v16  ;;  %v3501_v14 = vld [vmem:[%s2761_s5 + $0x50] sm:$0xff]  ;;  %v3510_v16 = vld [vmem:[%s2761_s5 + $0x58] sm:$0xff] }
 0x442   : > { %v3514_v17 = vld [vmem:[%s2761_s5 + $0x38] sm:$0xff] }
 0x443   : > { %2419 = vpow2.f32 %v1888_v15  ;;  %v1889_v19 = vmul.f32 -1.442695, %v1004_v18  ;;  %v3506_v15 = vld [vmem:[%s2761_s5 + $0x48] sm:$0xff]  ;;  %v3519_v18 = vld [vmem:[%s2761_s5 + $0x30] sm:$0xff] }
 0x445   : > { %2421 = vpow2.f32 %v1889_v19  ;;  %v3523_v19 = vld [vmem:[%s2761_s5 + $0x40] sm:$0xff] }
 0x450   : > { %v2420_v20 = vpop.eup %2419 }
 0x451   : > { %v998_v21 = vadd.f32 1.0, %v2420_v20  ;;  %v3527_v20 = vld [vmem:[%s2761_s5 + $0x20] sm:$0xff] }
 0x452   : > { %v2422_v22 = vpop.eup %2421 }
 0x453   : > { %2423 = vrcp.f32 %v998_v21  ;;  %v1008_v23 = vadd.f32 1.0, %v2422_v22  ;;  %v3532_v21 = vld [vmem:[%s2761_s5 + $0x18] sm:$0xff]  ;;  %v3537_v22 = vld [vmem:[%s2761_s5 + $0x8] sm:$0xff] }
 0x454   : > { %3823 = vst [vmem:[#allocation9_spill] sm:$0xff] %v3537_v22 }
 0x455   : > { %2425 = vrcp.f32 %v1008_v23  ;;  %v3542_v23 = vld [vmem:[%s2761_s5] sm:$0xff] }
 0x456   : > { %3824 = vst [vmem:[#allocation12_spill] sm:$0xff] %v3542_v23 }
 0x460   : > { %v2424_v26 = vpop.eup %2423 }
 0x461   : > { %v1011_v27 = vmul.f32 %v2424_v26, %v991_v24 }
 0x462   : > { %v2426_v29 = vpop.eup %2425 }
 0x463   : > { %v1014_v28 = vadd.f32 %v1012_v25, %v1011_v27  ;;  %v1016_v30 = vsub.f32 1.0, %v2426_v29  ;;  %v1018_v33 = vmul.f32 %v2426_v29, %v3259_v53  ;;  %v3462_v53 = vld [vmem:[%s2761_s5 + $0x98] sm:$0xff] }
 0x465   : > { %2427 = vtanh.f32 %v1014_v28 }
 0x472   : > { %v2428_v31 = vpop.eup %2427 }
 0x473   : > { %v1017_v32 = vmul.f32 %v2428_v31, %v1016_v30 }
 0x475   : > { %v1019_v34 = vadd.f32 %v1018_v33, %v1017_v32 }
 0x477   : > { %1023 = vst [vmem:[%s1022_s10] sm:$0x3] %v1019_v34  ;;  %1020 = vst [vmem:[#allocation2] sm:$0x3] %v1019_v34 }
 0x47e   : > { %v3345_v35 = vld [vmem:[#allocation2] sm:$0x3] }
 0x47f   : > { %1095 = vmatmul.mubr.f32.vlgmr.msra.gmra.mxu0 %v3345_v35  ;;  %2227 = vmatmul.mubr.f32.vlgmr.msra.gmra.mxu1 %v3345_v35 }
 0x480   : > { %1208 = vmatpush1.msra.mxu0 %v3350_v36  ;;  %2230 = vmatpush3.msra.mxu1 %v3354_v37 }
 0x481   : > { %1209 = vmatprep.subr.mxu0 %v3358_v38  ;;  %2231 = vmatprep.subr.mxu1 %v3801_v54 }
 0x482   : > { %1210 = vmatpush1.msra.mxu0 %v3363_v39  ;;  %2232 = vmatpush3.msra.mxu1 %v3367_v40 }
 0x483   : > { %1211 = vmatprep.subr.mxu0 %v3371_v43  ;;  %2233 = vmatprep.subr.mxu1 %v3801_v54 }
 0x484   : > { %1212 = vmatpush1.msra.mxu0 %v3376_v45  ;;  %2234 = vmatpush3.msra.mxu1 %v3380_v46 }
 0x485   : > { %1213 = vmatprep.subr.mxu0 %v3384_v47  ;;  %2235 = vmatprep.subr.mxu1 %v3801_v54 }
 0x486   : > { %1214 = vmatpush1.msra.mxu0 %v3389_v44  ;;  %2236 = vmatpush3.msra.mxu1 %v3393_v48 }
 0x487   : > { %1215 = vmatprep.subr.mxu0 %v3397_v52  ;;  %2237 = vmatprep.subr.mxu1 %v3801_v54 }
 0x488   : > { %1216 = vmatpush1.msra.mxu0 %v3402_v61  ;;  %2238 = vmatpush3.msra.mxu1 %v3406_v57 }
 0x489   : > { %1217 = vmatprep.subr.mxu0 %v3410_v63  ;;  %2239 = vmatprep.subr.mxu1 %v3801_v54 }
 0x48a   : > { %1218 = vmatpush1.msra.mxu0 %v3415_v58  ;;  %2240 = vmatpush3.msra.mxu1 %v3419_v51 }
 0x48b   : > { %1219 = vmatprep.subr.mxu0 %v3423_v62  ;;  %2241 = vmatprep.subr.mxu1 %v3801_v54 }
 0x48c   : > { %1220 = vmatpush1.msra.mxu0 %v3428_v60  ;;  %2242 = vmatpush3.msra.mxu1 %v3432_v41 }
 0x48d   : > { %1221 = vmatprep.subr.mxu0 %v3436_v0  ;;  %2243 = vmatprep.subr.mxu1 %v3801_v54 }
 0x48e   : > { %1222 = vmatpush1.msra.mxu0 %v3441_v49  ;;  %2244 = vmatpush3.msra.mxu1 %v3445_v1 }
 0x48f   : > { %1223 = vmatprep.subr.mxu0 %v3449_v50  ;;  %2245 = vmatprep.subr.mxu1 %v3801_v54 }
 0x490   : > { %1224 = vmatpush1.msra.mxu0 %v3454_v56  ;;  %2246 = vmatpush3.msra.mxu1 %v3458_v59 }
 0x491   : > { %1225 = vmatprep.subr.mxu0 %v3462_v53  ;;  %2247 = vmatprep.subr.mxu1 %v3801_v54 }
 0x492   : > { %1226 = vmatpush1.msra.mxu0 %v3467_v3  ;;  %2248 = vmatpush3.msra.mxu1 %v3471_v4 }
 0x493   : > { %1227 = vmatprep.subr.mxu0 %v3475_v7  ;;  %2249 = vmatprep.subr.mxu1 %v3801_v54 }
 0x494   : > { %1228 = vmatpush1.msra.mxu0 %v3480_v8  ;;  %2250 = vmatpush3.msra.mxu1 %v3484_v9 }
 0x495   : > { %1229 = vmatprep.subr.mxu0 %v3488_v11  ;;  %2251 = vmatprep.subr.mxu1 %v3801_v54 }
 0x496   : > { %1230 = vmatpush1.msra.mxu0 %v3493_v12  ;;  %2252 = vmatpush3.msra.mxu1 %v3497_v13 }
 0x497   : > { %1231 = vmatprep.subr.mxu0 %v3501_v14  ;;  %2253 = vmatprep.subr.mxu1 %v3801_v54 }
 0x498   : > { %1232 = vmatpush1.msra.mxu0 %v3506_v15  ;;  %2254 = vmatpush3.msra.mxu1 %v3510_v16 }
 0x499   : > { %1233 = vmatprep.subr.mxu0 %v3514_v17  ;;  %2255 = vmatprep.subr.mxu1 %v3801_v54 }
 0x49a   : > { %1234 = vmatpush1.msra.mxu0 %v3519_v18  ;;  %2256 = vmatpush3.msra.mxu1 %v3523_v19 }
 0x49b   : > { %1235 = vmatprep.subr.mxu0 %v3527_v20  ;;  %2257 = vmatprep.subr.mxu1 %v3801_v54 }
 0x49c   : > { %1236 = vmatpush1.msra.mxu0 %v3532_v21  ;;  %2258 = vmatpush3.msra.mxu1 %v3816_v2  ;;  %v1028_v2 = vld [vmem:[%s1027_s22] sm:$0x3f] }
 0x49d   : > { %1237 = vmatprep.subr.mxu0 %v3537_v22  ;;  %2259 = vmatprep.subr.mxu1 %v3801_v54  ;;  %v1179_v31 = vrot.slane %v1028_v2, 2 }
 0x49e   : > { %1238 = vmatpush1.msra.mxu0 %v3542_v23  ;;  %1271 = vmatprep.mubr.f32.mxu0 %v3801_v54 }
 0x49f   : > { %2260 = vmatpush3.msra.mxu1 %v3819_v5  ;;  %2261 = vmatprep.mubr.msk.f32.mxu1 %vm2618_vm0, %v3801_v54 }
 0x4a0   : > { %1384 = vmatprep.subr.mxu0 %v3329_v6  ;;  %2264 = vmatprep.subr.mxu1 %v3801_v54 }
 0x53f   : > { %v1096_v24 = vpop.f32.mrf.mxu0  ;;  %v1167_v25 = vpop.f32.mrf.mxu1 }
 0x540   : > { %v1097_v26 = vadd.f32 %v1096_v24, %v3822_v10  ;;  %v1168_v24 = vadd.f32 %v1167_v25, %v3081_v55  ;;  %v1189_v10 = vrot.slane %v1028_v2, 4  ;;  %v3830_v25 = vld [vmem:[#allocation15_spill] sm:$0xff] }
 0x541   : > { %v1098_v27 = vpop.f32.mrf.mxu0  ;;  %v2228_v5 = vpop.f32.mrf.mxu1 }
 0x542   : > { %v1171_v28 = vadd.f32 %v1097_v26, %v1028_v2  ;;  %v1099_v30 = vadd.f32 %v1098_v27, %v3808_v42  ;;  %v3633_v2 = vld [vmem:[%s2761_s5 + $0x10] sm:$0xff] }
 0x543   : > { %3829 = vst [vmem:[#allocation11_spill] sm:$0xff] %v3633_v2 }
 0x544   : > { %v1892_v29 = vmul.f32 -1.442695, %v1171_v28  ;;  %v1181_v32 = vadd.f32 %v1179_v31, %v1099_v30 }
 0x546   : > { %2429 = vpow2.f32 %v1892_v29  ;;  %v1893_v33 = vmul.f32 -1.442695, %v1181_v32 }
 0x548   : > { %2431 = vpow2.f32 %v1893_v33  ;;  %v1205_v33 = vld [vmem:[%s1204_s29] sm:$0x3f] }
 0x553   : > { %v2430_v34 = vpop.eup %2429 }
 0x554   : > { %v1175_v6 = vadd.f32 1.0, %v2430_v34 }
 0x555   : > { %v2432_v23 = vpop.eup %2431 }
 0x556   : > { %2433 = vrcp.f32 %v1175_v6  ;;  %v1185_v22 = vadd.f32 1.0, %v2432_v23 }
 0x558   : > { %2435 = vrcp.f32 %v1185_v22  ;;  %v3828_v22 = vld [vmem:[#allocation12_spill] sm:$0xff] }
 0x563   : > { %v2434_v5 = vpop.eup %2433 }
 0x564   : > { %v1188_v26 = vmul.f32 %v2434_v5, %v1168_v24  ;;  %v3832_v5 = vld [vmem:[#allocation14_spill] sm:$0xff] }
 0x565   : > { %v2436_v27 = vpop.eup %2435 }
 0x566   : > { %v1191_v28 = vadd.f32 %v1189_v10, %v1188_v26  ;;  %v1193_v29 = vsub.f32 1.0, %v2436_v27  ;;  %v1195_v32 = vmul.f32 %v2436_v27, %v3345_v35  ;;  %v3625_v10 = vld [vmem:[%s2761_s5 + $0x28] sm:$0xff]  ;;  %s1898_s5 = sshll.u32 %s3642_s24, 1 }
 0x567   : > { %3826 = vst [vmem:[#allocation10_spill] sm:$0xff] %v3625_v10  ;;  %v3827_v35 = vld [vmem:[#allocation9_spill] sm:$0xff]  ;;  %s1376_s6 = scalar_lea.vmem %s3088_s18, %s1898_s5 }
 0x568   : > { %2437 = vtanh.f32 %v1191_v28 }
 0x575   : > { %v2438_v30 = vpop.eup %2437 }
 0x576   : > { %v1194_v31 = vmul.f32 %v2438_v30, %v1193_v29 }
 0x578   : > { %v1196_v6 = vadd.f32 %v1195_v32, %v1194_v31  ;;  %v1356_v32 = vrot.slane %v1205_v33, 2 }
 0x57a   : > { %1200 = vst [vmem:[%s1199_s23] sm:$0x3] %v1196_v6  ;;  %1197 = vst [vmem:[#allocation2] sm:$0x3] %v1196_v6 }
 0x581   : > { %v3563_v23 = vld [vmem:[#allocation2] sm:$0x3] }
 0x582   : > { %1272 = vmatmul.mubr.f32.vlgmr.msra.gmra.mxu0 %v3563_v23  ;;  %2262 = vmatmul.mubr.f32.vlgmr.msra.gmra.mxu1 %v3563_v23 }
 0x583   : > { %1385 = vmatpush1.msra.mxu0 %v3350_v36  ;;  %2265 = vmatpush3.msra.mxu1 %v3354_v37 }
 0x584   : > { %1386 = vmatprep.subr.mxu0 %v3358_v38  ;;  %2266 = vmatprep.subr.mxu1 %v3801_v54 }
 0x585   : > { %1387 = vmatpush1.msra.mxu0 %v3363_v39  ;;  %2267 = vmatpush3.msra.mxu1 %v3367_v40 }
 0x586   : > { %1388 = vmatprep.subr.mxu0 %v3371_v43  ;;  %2268 = vmatprep.subr.mxu1 %v3801_v54 }
 0x587   : > { %1389 = vmatpush1.msra.mxu0 %v3376_v45  ;;  %2269 = vmatpush3.msra.mxu1 %v3380_v46 }
 0x588   : > { %1390 = vmatprep.subr.mxu0 %v3384_v47  ;;  %2270 = vmatprep.subr.mxu1 %v3801_v54 }
 0x589   : > { %1391 = vmatpush1.msra.mxu0 %v3389_v44  ;;  %2271 = vmatpush3.msra.mxu1 %v3393_v48 }
 0x58a   : > { %1392 = vmatprep.subr.mxu0 %v3397_v52  ;;  %2272 = vmatprep.subr.mxu1 %v3801_v54 }
 0x58b   : > { %1393 = vmatpush1.msra.mxu0 %v3402_v61  ;;  %2273 = vmatpush3.msra.mxu1 %v3406_v57 }
 0x58c   : > { %1394 = vmatprep.subr.mxu0 %v3410_v63  ;;  %2274 = vmatprep.subr.mxu1 %v3801_v54 }
 0x58d   : > { %1395 = vmatpush1.msra.mxu0 %v3415_v58  ;;  %2275 = vmatpush3.msra.mxu1 %v3419_v51 }
 0x58e   : > { %1396 = vmatprep.subr.mxu0 %v3423_v62  ;;  %2276 = vmatprep.subr.mxu1 %v3801_v54 }
 0x58f   : > { %1397 = vmatpush1.msra.mxu0 %v3428_v60  ;;  %2277 = vmatpush3.msra.mxu1 %v3432_v41 }
 0x590   : > { %1398 = vmatprep.subr.mxu0 %v3436_v0  ;;  %2278 = vmatprep.subr.mxu1 %v3801_v54 }
 0x591   : > { %1399 = vmatpush1.msra.mxu0 %v3441_v49  ;;  %2279 = vmatpush3.msra.mxu1 %v3445_v1 }
 0x592   : > { %1400 = vmatprep.subr.mxu0 %v3449_v50  ;;  %2280 = vmatprep.subr.mxu1 %v3801_v54 }
 0x593   : > { %1401 = vmatpush1.msra.mxu0 %v3454_v56  ;;  %2281 = vmatpush3.msra.mxu1 %v3458_v59 }
 0x594   : > { %1402 = vmatprep.subr.mxu0 %v3462_v53  ;;  %2282 = vmatprep.subr.mxu1 %v3801_v54 }
 0x595   : > { %1403 = vmatpush1.msra.mxu0 %v3467_v3  ;;  %2283 = vmatpush3.msra.mxu1 %v3471_v4 }
 0x596   : > { %1404 = vmatprep.subr.mxu0 %v3475_v7  ;;  %2284 = vmatprep.subr.mxu1 %v3801_v54 }
 0x597   : > { %1405 = vmatpush1.msra.mxu0 %v3480_v8  ;;  %2285 = vmatpush3.msra.mxu1 %v3484_v9 }
 0x598   : > { %1406 = vmatprep.subr.mxu0 %v3488_v11  ;;  %2286 = vmatprep.subr.mxu1 %v3801_v54 }
 0x599   : > { %1407 = vmatpush1.msra.mxu0 %v3493_v12  ;;  %2287 = vmatpush3.msra.mxu1 %v3497_v13 }
 0x59a   : > { %1408 = vmatprep.subr.mxu0 %v3501_v14  ;;  %2288 = vmatprep.subr.mxu1 %v3801_v54 }
 0x59b   : > { %1409 = vmatpush1.msra.mxu0 %v3506_v15  ;;  %2289 = vmatpush3.msra.mxu1 %v3510_v16 }
 0x59c   : > { %1410 = vmatprep.subr.mxu0 %v3514_v17  ;;  %2290 = vmatprep.subr.mxu1 %v3801_v54 }
 0x59d   : > { %1411 = vmatpush1.msra.mxu0 %v3519_v18  ;;  %2291 = vmatpush3.msra.mxu1 %v3523_v19 }
 0x59e   : > { %1412 = vmatprep.subr.mxu0 %v3527_v20  ;;  %2292 = vmatprep.subr.mxu1 %v3801_v54 }
 0x59f   : > { %1413 = vmatpush1.msra.mxu0 %v3532_v21  ;;  %2293 = vmatpush3.msra.mxu1 %v3625_v10 }
 0x5a0   : > { %1414 = vmatprep.subr.mxu0 %v3827_v35  ;;  %2294 = vmatprep.subr.mxu1 %v3801_v54 }
 0x5a1   : > { %1415 = vmatpush1.msra.mxu0 %v3828_v22  ;;  %1448 = vmatprep.mubr.f32.mxu0 %v3801_v54 }
 0x5a2   : > { %2295 = vmatpush3.msra.mxu1 %v3633_v2  ;;  %2296 = vmatprep.mubr.msk.f32.mxu1 %vm2618_vm0, %v3801_v54 }
 0x5a3   : > { %1561 = vmatprep.subr.mxu0 %v3830_v25  ;;  %2299 = vmatprep.subr.mxu1 %v3801_v54 }
 0x642   : > { %v1273_v34 = vpop.f32.mrf.mxu0  ;;  %v1344_v24 = vpop.f32.mrf.mxu1 }
 0x643   : > { %v1274_v26 = vadd.f32 %v1273_v34, %v3832_v5  ;;  %v1345_v34 = vadd.f32 %v1344_v24, %v3081_v55  ;;  %v1366_v5 = vrot.slane %v1205_v33, 4 }
 0x644   : > { %v1275_v28 = vpop.f32.mrf.mxu0  ;;  %v2263_v27 = vpop.f32.mrf.mxu1 }
 0x645   : > { %v1348_v29 = vadd.f32 %v1274_v26, %v1205_v33  ;;  %v1276_v31 = vadd.f32 %v1275_v28, %v3808_v42 }
 0x647   : > { %v1896_v30 = vmul.f32 -1.442695, %v1348_v29  ;;  %v1358_v6 = vadd.f32 %v1356_v32, %v1276_v31 }
 0x649   : > { %2439 = vpow2.f32 %v1896_v30  ;;  %v1897_v25 = vmul.f32 -1.442695, %v1358_v6 }
 0x64b   : > { %2441 = vpow2.f32 %v1897_v25 }
 0x656   : > { %v2440_v2 = vpop.eup %2439 }
 0x657   : > { %v1352_v22 = vadd.f32 1.0, %v2440_v2 }
 0x658   : > { %v2442_v35 = vpop.eup %2441 }
 0x659   : > { %2443 = vrcp.f32 %v1352_v22  ;;  %v1362_v10 = vadd.f32 1.0, %v2442_v35 }
 0x65b   : > { %2445 = vrcp.f32 %v1362_v10 }
 0x666   : > { %v2444_v27 = vpop.eup %2443 }
 0x667   : > { %v1365_v26 = vmul.f32 %v2444_v27, %v1345_v34 }
 0x668   : > { %v2446_v28 = vpop.eup %2445 }
 0x669   : > { %v1368_v29 = vadd.f32 %v1366_v5, %v1365_v26  ;;  %v1370_v30 = vsub.f32 1.0, %v2446_v28  ;;  %v1372_v6 = vmul.f32 %v2446_v28, %v3563_v23 }
 0x66b   : > { %2447 = vtanh.f32 %v1368_v29 }
 0x678   : > { %v2448_v31 = vpop.eup %2447 }
 0x679   : > { %v1371_v32 = vmul.f32 %v2448_v31, %v1370_v30 }
 0x67b   : > { %v1373_v22 = vadd.f32 %v1372_v6, %v1371_v32 }
 0x67d   : > { %1377 = vst [vmem:[%s1376_s6] sm:$0x3] %v1373_v22  ;;  %1374 = vst [vmem:[#allocation2] sm:$0x3] %v1373_v22 }
 0x684   : > { %v3652_v35 = vld [vmem:[#allocation2] sm:$0x3] }
 0x685   : > { %1449 = vmatmul.mubr.f32.vlgmr.msra.gmra.mxu0 %v3652_v35  ;;  %2297 = vmatmul.mubr.f32.vlgmr.msra.gmra.mxu1 %v3652_v35 }
 0x686   : > { %1562 = vmatpush1.msra.mxu0 %v3350_v36  ;;  %2300 = vmatpush3.msra.mxu1 %v3354_v37  ;;  %v3833_v36 = vld [vmem:[#allocation10_spill] sm:$0xff]  ;;  %v3834_v37 = vld [vmem:[#allocation9_spill] sm:$0xff] }
 0x687   : > { %1563 = vmatprep.subr.mxu0 %v3358_v38  ;;  %2301 = vmatprep.subr.mxu1 %v3801_v54  ;;  %v3835_v38 = vld [vmem:[#allocation12_spill] sm:$0xff] }
 0x688   : > { %1564 = vmatpush1.msra.mxu0 %v3363_v39  ;;  %2302 = vmatpush3.msra.mxu1 %v3367_v40  ;;  %v3836_v39 = vld [vmem:[#allocation11_spill] sm:$0xff]  ;;  %v1382_v40 = vld [vmem:[%s1381_s21] sm:$0x3f] }
 0x689   : > { %1565 = vmatprep.subr.mxu0 %v3371_v43  ;;  %2303 = vmatprep.subr.mxu1 %v3801_v54 }
 0x68a   : > { %1566 = vmatpush1.msra.mxu0 %v3376_v45  ;;  %2304 = vmatpush3.msra.mxu1 %v3380_v46  ;;  %v3838_v46 = vld [vmem:[#allocation14_spill] sm:$0xff] }
 0x68b   : > { %1567 = vmatprep.subr.mxu0 %v3384_v47  ;;  %2305 = vmatprep.subr.mxu1 %v3801_v54 }
 0x68c   : > { %1568 = vmatpush1.msra.mxu0 %v3389_v44  ;;  %2306 = vmatpush3.msra.mxu1 %v3393_v48 }
 0x68d   : > { %1569 = vmatprep.subr.mxu0 %v3397_v52  ;;  %2307 = vmatprep.subr.mxu1 %v3801_v54 }
 0x68e   : > { %1570 = vmatpush1.msra.mxu0 %v3402_v61  ;;  %2308 = vmatpush3.msra.mxu1 %v3406_v57 }
 0x68f   : > { %1571 = vmatprep.subr.mxu0 %v3410_v63  ;;  %2309 = vmatprep.subr.mxu1 %v3801_v54  ;;  %v1533_v63 = vrot.slane %v1382_v40, 2 }
 0x690   : > { %1572 = vmatpush1.msra.mxu0 %v3415_v58  ;;  %2310 = vmatpush3.msra.mxu1 %v3419_v51 }
 0x691   : > { %1573 = vmatprep.subr.mxu0 %v3423_v62  ;;  %2311 = vmatprep.subr.mxu1 %v3801_v54 }
 0x692   : > { %1574 = vmatpush1.msra.mxu0 %v3428_v60  ;;  %2312 = vmatpush3.msra.mxu1 %v3432_v41 }
 0x693   : > { %1575 = vmatprep.subr.mxu0 %v3436_v0  ;;  %2313 = vmatprep.subr.mxu1 %v3801_v54 }
 0x694   : > { %1576 = vmatpush1.msra.mxu0 %v3441_v49  ;;  %2314 = vmatpush3.msra.mxu1 %v3445_v1  ;;  %v1543_v49 = vrot.slane %v1382_v40, 4 }
 0x695   : > { %1577 = vmatprep.subr.mxu0 %v3449_v50  ;;  %2315 = vmatprep.subr.mxu1 %v3801_v54 }
 0x696   : > { %1578 = vmatpush1.msra.mxu0 %v3454_v56  ;;  %2316 = vmatpush3.msra.mxu1 %v3458_v59 }
 0x697   : > { %1579 = vmatprep.subr.mxu0 %v3462_v53  ;;  %2317 = vmatprep.subr.mxu1 %v3801_v54 }
 0x698   : > { %1580 = vmatpush1.msra.mxu0 %v3467_v3  ;;  %2318 = vmatpush3.msra.mxu1 %v3471_v4 }
 0x699   : > { %1581 = vmatprep.subr.mxu0 %v3475_v7  ;;  %2319 = vmatprep.subr.mxu1 %v3801_v54 }
 0x69a   : > { %1582 = vmatpush1.msra.mxu0 %v3480_v8  ;;  %2320 = vmatpush3.msra.mxu1 %v3484_v9 }
 0x69b   : > { %1583 = vmatprep.subr.mxu0 %v3488_v11  ;;  %2321 = vmatprep.subr.mxu1 %v3801_v54  ;;  %v1559_v11 = vld [vmem:[%s1558_s30] sm:$0x3f] }
 0x69c   : > { %1584 = vmatpush1.msra.mxu0 %v3493_v12  ;;  %2322 = vmatpush3.msra.mxu1 %v3497_v13  ;;  %v1720_v25 = vrot.slane %v1559_v11, 4 }
 0x69d   : > { %1585 = vmatprep.subr.mxu0 %v3501_v14  ;;  %2323 = vmatprep.subr.mxu1 %v3801_v54 }
 0x69e   : > { %1586 = vmatpush1.msra.mxu0 %v3506_v15  ;;  %2324 = vmatpush3.msra.mxu1 %v3510_v16 }
 0x69f   : > { %1587 = vmatprep.subr.mxu0 %v3514_v17  ;;  %2325 = vmatprep.subr.mxu1 %v3801_v54 }
 0x6a0   : > { %1588 = vmatpush1.msra.mxu0 %v3519_v18  ;;  %2326 = vmatpush3.msra.mxu1 %v3523_v19 }
 0x6a1   : > { %1589 = vmatprep.subr.mxu0 %v3527_v20  ;;  %2327 = vmatprep.subr.mxu1 %v3801_v54  ;;  %v1710_v20 = vrot.slane %v1559_v11, 2 }
 0x6a2   : > { %1590 = vmatpush1.msra.mxu0 %v3532_v21  ;;  %2328 = vmatpush3.msra.mxu1 %v3833_v36 }
 0x6a3   : > { %1591 = vmatprep.subr.mxu0 %v3834_v37  ;;  %2329 = vmatprep.subr.mxu1 %v3801_v54 }
 0x6a4   : > { %1592 = vmatpush1.msra.mxu0 %v3835_v38  ;;  %1625 = vmatprep.mubr.f32.mxu0 %v3801_v54 }
 0x6a5   : > { %2330 = vmatpush3.msra.mxu1 %v3836_v39  ;;  %2331 = vmatprep.mubr.msk.f32.mxu1 %vm2618_vm0, %v3801_v54 }
 0x745   : > { %v1450_v43 = vpop.f32.mrf.mxu0  ;;  %v1521_v45 = vpop.f32.mrf.mxu1 }
 0x746   : > { %v1451_v47 = vadd.f32 %v1450_v43, %v3838_v46  ;;  %v1522_v0 = vadd.f32 %v1521_v45, %v3081_v55 }
 0x747   : > { %v1452_v44 = vpop.f32.mrf.mxu0  ;;  %v2298_v48 = vpop.f32.mrf.mxu1 }
 0x748   : > { %v1525_v52 = vadd.f32 %v1451_v47, %v1382_v40  ;;  %v1453_v57 = vadd.f32 %v1452_v44, %v3808_v42 }
 0x74a   : > { %v1900_v61 = vmul.f32 -1.442695, %v1525_v52  ;;  %v1535_v54 = vadd.f32 %v1533_v63, %v1453_v57 }
 0x74c   : > { %2449 = vpow2.f32 %v1900_v61  ;;  %v1901_v58 = vmul.f32 -1.442695, %v1535_v54 }
 0x74e   : > { %2451 = vpow2.f32 %v1901_v58 }
 0x759   : > { %v2450_v51 = vpop.eup %2449 }
 0x75a   : > { %v1529_v62 = vadd.f32 1.0, %v2450_v51 }
 0x75b   : > { %v2452_v60 = vpop.eup %2451 }
 0x75c   : > { %2453 = vrcp.f32 %v1529_v62  ;;  %v1539_v41 = vadd.f32 1.0, %v2452_v60 }
 0x75e   : > { %2455 = vrcp.f32 %v1539_v41 }
 0x769   : > { %v2454_v1 = vpop.eup %2453 }
 0x76a   : > { %v1542_v50 = vmul.f32 %v2454_v1, %v1522_v0 }
 0x76b   : > { %v2456_v59 = vpop.eup %2455 }
 0x76c   : > { %v1545_v56 = vadd.f32 %v1543_v49, %v1542_v50  ;;  %v1547_v53 = vsub.f32 1.0, %v2456_v59  ;;  %v1549_v7 = vmul.f32 %v2456_v59, %v3652_v35 }
 0x76e   : > { %2457 = vtanh.f32 %v1545_v56 }
 0x77b   : > { %v2458_v3 = vpop.eup %2457 }
 0x77c   : > { %v1548_v4 = vmul.f32 %v2458_v3, %v1547_v53 }
 0x77e   : > { %v1550_v8 = vadd.f32 %v1549_v7, %v1548_v4 }
 0x780   : > { %1554 = vst [vmem:[%s1553_s7] sm:$0x3] %v1550_v8  ;;  %1551 = vst [vmem:[#allocation2] sm:$0x3] %v1550_v8 }
 0x787   : > { %v1560_v9 = vld [vmem:[#allocation2] sm:$0x3] }
 0x788   : > { %1626 = vmatmul.mubr.f32.vlgmr.msra.gmra.mxu0 %v1560_v9  ;;  %2332 = vmatmul.mubr.f32.vlgmr.msra.gmra.mxu1 %v1560_v9 }
 0x848   : > { %v1627_v12 = vpop.f32.mrf.mxu0  ;;  %v1698_v13 = vpop.f32.mrf.mxu1 }
 0x849   : > { %v1628_v14 = vadd.f32 %v1627_v12, %v3838_v46  ;;  %v1699_v5 = vadd.f32 %v1698_v13, %v3081_v55 }
 0x84a   : > { %v1629_v15 = vpop.f32.mrf.mxu0  ;;  %v2333_v16 = vpop.f32.mrf.mxu1 }
 0x84b   : > { %v1702_v17 = vadd.f32 %v1628_v14, %v1559_v11  ;;  %v1630_v19 = vadd.f32 %v1629_v15, %v3808_v42 }
 0x84d   : > { %v1904_v18 = vmul.f32 -1.442695, %v1702_v17  ;;  %v1712_v21 = vadd.f32 %v1710_v20, %v1630_v19 }
 0x84f   : > { %2459 = vpow2.f32 %v1904_v18  ;;  %v1905_v23 = vmul.f32 -1.442695, %v1712_v21 }
 0x851   : > { %2461 = vpow2.f32 %v1905_v23 }
 0x85c   : > { %v2460_v10 = vpop.eup %2459 }
 0x85d   : > { %v1706_v2 = vadd.f32 1.0, %v2460_v10 }
 0x85e   : > { %v2462_v33 = vpop.eup %2461 }
 0x85f   : > { %2463 = vrcp.f32 %v1706_v2  ;;  %v1716_v24 = vadd.f32 1.0, %v2462_v33 }
 0x861   : > { %2465 = vrcp.f32 %v1716_v24 }
 0x86c   : > { %v2464_v34 = vpop.eup %2463 }
 0x86d   : > { %v1719_v27 = vmul.f32 %v2464_v34, %v1699_v5 }
 0x86e   : > { %v2466_v42 = vpop.eup %2465 }
 0x86f   : > { %v1722_v26 = vadd.f32 %v1720_v25, %v1719_v27  ;;  %v1724_v29 = vsub.f32 1.0, %v2466_v42  ;;  %v1726_v31 = vmul.f32 %v2466_v42, %v1560_v9 }
 0x871   : > { %2467 = vtanh.f32 %v1722_v26 }
 0x87e   : > { %v2468_v28 = vpop.eup %2467 }
 0x87f   : > { %v1725_v30 = vmul.f32 %v2468_v28, %v1724_v29 }
 0x881   : > { %v1727_v32 = vadd.f32 %v1726_v31, %v1725_v30 }
 0x883   : > { %1728 = vst [vmem:[#allocation2] sm:$0x3] %v1727_v32  ;;  %1731 = vst [vmem:[%s1730_s4] sm:$0x3] %v1727_v32 }
 0x884 PF: > { %p16_p5 = scmp.ge.s32.totalorder %s2661_s17, 4   ;;  %s3840_s12 = smov %s2603_s13 }
 0x885   : > { %s3841_s13 = smov %s2607_s14  ;;  %s3842_s14 = smov %s2671_s20 }
 0x886   : > { %s3843_s15 = smov %s2661_s17  ;;  %18 = sbr.rel (!%p16_p5) target bundleno = 5 (0x5), region = 104 }
 0x88b   :  { %1753 = vsyncpa [#allocation4], 1 }
 0x88c   :  { %1755 = vsyncpa [#allocation4 + $0x1], 1 }
 0x88d   :  { %1756 = vsyncpa [#allocation6], 1 }
 0x88e   :  { %1758 = vsyncpa [#allocation6 + $0x1], 1 }

// kernel: gru_module_forward.7
= control target key start
LH: loop header
LB: loop body
LE: loop exit
PB: predicated region body
PF: predicated region fallthrough
CT: control target
= control target key end

     0   :  { %11 = vsyncpa [#allocation4], 0  ;;  %s3964_s0 = inlined_call_operand.vmem [shape: f32[2,8,2,384], index: 0, kind: input, shape index: {}]   ;;  %s3965_s1 = inlined_call_operand.vmem [shape: f32[2,128,384], index: 1, kind: input, shape index: {}]   ;;  %s3966_s2 = inlined_call_operand.vmem [shape: f32[2,1,384], index: 2, kind: input, shape index: {}]   ;;  %s3967_s3 = inlined_call_operand.vmem [shape: f32[2,128,128], index: 3, kind: input, shape index: {}]   ;;  %s3968_s4 = inlined_call_operand.hbm [shape: f32[2,8,2,128], index: 4, kind: output, shape index: {0}]   ;;  %s3969_s5 = inlined_call_operand.vmem [shape: f32[2,2,128], index: 5, kind: output, shape index: {1}]  }
   0x1   :  { %13 = vsyncpa [#allocation4 + $0x1], 0  ;;  %s2835_s18 = smov 0   ;;  %s2837_s19 = smov 0  }
   0x2   :  { %s2839_s20 = smov 0   ;;  %s2841_s21 = smov 0  }
   0x3 LB: > { %s2856_s22 = sadd.s32 4294967295, %s2798_s21   ;;  %s2038_s23 = sadd.s32 4294967294, %s2798_s21   ;;  %s2798_s21 = sphi %s2841_s21, %s4041_s21   ;;  %s2794_s20 = sphi %s2839_s20, %s4040_s20   ;;  %s2790_s19 = sphi %s2837_s19, %s4039_s19   ;;  %s2786_s18 = sphi %s2835_s18, %s4038_s18  }
   0x4   : > { %s2860_s24 = sadd.s32 1, %s2798_s21   ;;  %s130_s25 = sadd.s32 1, %s2794_s20 }
   0x5   : > { %s127_s26 = ssub.s32 %s2798_s21, %s2860_s24  ;;  %p140_p0 = scmp.ne.s32.totalorder %s2794_s20, %s2790_s19 }
   0x6   : > { %p128_p1 = scmp.eq.s32.totalorder %s127_s26, 0  ;;  %p141_p2 = scmp.eq.s32.totalorder %s2856_s22, 1 }
   0x7   : > { %p146_p3 = scmp.ne.s32.totalorder %s2790_s19, %s2786_s18  ;;  %p147_p4 = scmp.eq.s32.totalorder %s2038_s23, 1 }
   0x8   : > { %s2871_s27 = scalar_select %p128_p1, %s2794_s20, %s130_s25  }
   0x9   : > { %p2873_p5 = por %p141_p2, %p140_p0  ;;  %p2877_p6 = por %p147_p4, %p146_p3 }
   0xa   : > { %p2041_p7 = scmp.ge.s32.totalorder %s2798_s21, 1  ;;  %p222_p8 = scmp.lt.s32.totalorder %s2798_s21, 3 }
   0xc   : > { %p223_p9 = pnand %p2041_p7, %p222_p8 }
   0xe   : > { %226 = sbr.rel (%p223_p9) target bundleno = 2326 (0x916), region = 36 }
  0x13   : > { %p268_p10 = scmp.lt.s32.totalorder %s2856_s22, 1  ;;  %v3970_v0 = vmov 0.0   ;;  %vm2801_vm0 = vmmov 0   ;;  %p341_p11 = scmp.eq.s32.totalorder %s2856_s22, 0  ;;  %v349_v50 = vlaneseq }
  0x14   : > { %428 = vmatprep.mubr.f32.mxu0 %v3970_v0  ;;  %291 = vst [vmem:[#allocation2] sm:$0x3] %v3970_v0  ;;  %2249 = vmatprep.subr.mxu1 %v3970_v0 }
  0x15   : > { %s2888_s30 = scalar_select %p268_p10, %s2856_s22, 1  ;;  %2281 = vmatprep.mubr.msk.f32.mxu1 %vm2801_vm0, %v3970_v0  ;;  %v350_v51 = vshrl.u32 %v349_v50, 7 }
  0x16   : > { %s3182_s11 = scalar_select %p341_p11, 0, 7 }
  0x17   : > { %s2565_s6 = smul.u32 384, %s2888_s30  ;;  %v351_v52 = vsub.s32 0, %v350_v51  ;;  %v355_v55 = vsub.s32 1, %v350_v51 }
  0x18   : > { %s2566_s10 = smul.u32 3, %s2888_s30  ;;  %s2051_s8 = sshll.u32 %s3182_s11, 1 }
  0x19   : > { %s2896_s9 = scalar_lea.vmem %s3965_s1, %s2565_s6  ;;  %s2564_s12 = smul.u32 48, %s2888_s30 }
  0x1a   : > { %v2899_v1 = vld [vmem:[%s2896_s9 + $0x170] sm:$0xff]  ;;  %v2902_v2 = vld [vmem:[%s2896_s9 + $0x168] sm:$0xff]  ;;  %v2905_v3 = vld [vmem:[%s2896_s9 + $0x158] sm:$0xff]  ;;  %s281_s15 = scalar_lea.vmem %s3966_s2, %s2566_s10  ;;  %s2087_s16 = smul.u32 6, %s3182_s11 }
  0x1b   : > { %3998 = vst [vmem:[#allocation6_spill] sm:$0xff] %v2899_v1  ;;  %364 = vmatprep.subr.mxu0 %v2899_v1  ;;  %v2909_v4 = vld [vmem:[%s2896_s9 + $0x150] sm:$0xff]  ;;  %v2913_v5 = vld [vmem:[%s2896_s9 + $0x140] sm:$0xff]  ;;  %v2917_v6 = vld [vmem:[%s2896_s9 + $0x138] sm:$0xff]  ;;  %s3192_s25 = scalar_lea.vmem %s3964_s0, %s2564_s12  ;;  %s259_s6 = sand.u32 1, %s2790_s19  }
  0x1c   : > { %365 = vmatpush1.msra.mxu0 %v2902_v2  ;;  %v2921_v7 = vld [vmem:[%s2896_s9 + $0x128] sm:$0xff]  ;;  %v2925_v8 = vld [vmem:[%s2896_s9 + $0x120] sm:$0xff]  ;;  %v2929_v9 = vld [vmem:[%s2896_s9 + $0x110] sm:$0xff]  ;;  %s345_s26 = scalar_lea.vmem %s3192_s25, %s2087_s16  ;;  %s2042_s7 = sshll.u32 %s259_s6, 4 }
  0x1d   : > { %366 = vmatprep.subr.mxu0 %v2905_v3  ;;  %v2933_v10 = vld [vmem:[%s2896_s9 + $0x108] sm:$0xff]  ;;  %v2937_v11 = vld [vmem:[%s2896_s9 + $0xf8] sm:$0xff]  ;;  %v2941_v12 = vld [vmem:[%s2896_s9 + $0xf0] sm:$0xff]  ;;  %s3209_s10 = scalar_lea.vmem [#allocation3], %s2042_s7 }
  0x1e   : > { %367 = vmatpush1.msra.mxu0 %v2909_v4  ;;  %v2945_v13 = vld [vmem:[%s2896_s9 + $0xe0] sm:$0xff]  ;;  %v2949_v14 = vld [vmem:[%s2896_s9 + $0xd8] sm:$0xff]  ;;  %v2959_v17 = vld [vmem:[%s2896_s9 + $0xc8] sm:$0xff]  ;;  %s533_s12 = scalar_lea.vmem %s3209_s10, %s2051_s8 [#allocation3] }
  0x1f   : > { %368 = vmatprep.subr.mxu0 %v2913_v5  ;;  %v2952_v15 = vld [vmem:[%s2896_s9 + $0x178] sm:$0xff]  ;;  %v2955_v16 = vld [vmem:[%s2896_s9 + $0x160] sm:$0xff]  ;;  %v2968_v19 = vld [vmem:[%s2896_s9 + $0x148] sm:$0xff]  ;;  %s3285_s11 = scalar_select %p341_p11, 1, 6 }
  0x20   : > { %369 = vmatpush1.msra.mxu0 %v2917_v6  ;;  %2250 = vmatpush3.msra.mxu1 %v2952_v15  ;;  %v2964_v18 = vld [vmem:[%s2896_s9 + $0xc0] sm:$0xff]  ;;  %v2972_v20 = vld [vmem:[%s2896_s9 + $0xb0] sm:$0xff]  ;;  %v2977_v21 = vld [vmem:[%s2896_s9 + $0xa8] sm:$0xff]  ;;  %s3368_s17 = scalar_select %p341_p11, 2, 5 }
  0x21   : > { %370 = vmatprep.subr.mxu0 %v2921_v7  ;;  %2251 = vmatprep.subr.mxu1 %v3970_v0  ;;  %v2981_v22 = vld [vmem:[%s2896_s9 + $0x130] sm:$0xff]  ;;  %v2985_v23 = vld [vmem:[%s2896_s9 + $0x98] sm:$0xff]  ;;  %v2998_v26 = vld [vmem:[%s2896_s9 + $0x80] sm:$0xff]  ;;  %s2088_s13 = smul.u32 6, %s3285_s11 }
  0x22   : > { %371 = vmatpush1.msra.mxu0 %v2925_v8  ;;  %2252 = vmatpush3.msra.mxu1 %v2955_v16  ;;  %v2990_v24 = vld [vmem:[%s2896_s9 + $0x90] sm:$0xff]  ;;  %v2994_v25 = vld [vmem:[%s2896_s9 + $0x118] sm:$0xff]  ;;  %v3007_v28 = vld [vmem:[%s2896_s9 + $0x100] sm:$0xff]  ;;  %s2089_s23 = smul.u32 6, %s3368_s17  ;;  %s2059_s7 = sshll.u32 %s3368_s17, 1 }
  0x23   : > { %372 = vmatprep.subr.mxu0 %v2929_v9  ;;  %2253 = vmatprep.subr.mxu1 %v3970_v0  ;;  %v3003_v27 = vld [vmem:[%s2896_s9 + $0x78] sm:$0xff]  ;;  %v3011_v29 = vld [vmem:[%s2896_s9 + $0x68] sm:$0xff]  ;;  %v3016_v30 = vld [vmem:[%s2896_s9 + $0x60] sm:$0xff]  ;;  %s538_s14 = scalar_lea.vmem %s3192_s25, %s2088_s13  ;;  %s887_s8 = scalar_lea.vmem %s3209_s10, %s2059_s7 [#allocation3] }
  0x24   : > { %373 = vmatpush1.msra.mxu0 %v2933_v10  ;;  %2254 = vmatpush3.msra.mxu1 %v2968_v19  ;;  %v3020_v31 = vld [vmem:[%s2896_s9 + $0xe8] sm:$0xff]  ;;  %v3024_v32 = vld [vmem:[%s2896_s9 + $0x50] sm:$0xff]  ;;  %v3037_v35 = vld [vmem:[%s2896_s9 + $0x38] sm:$0xff]  ;;  %s3761_s7 = scalar_select %p341_p11, 5, 2 }
  0x25   : > { %374 = vmatprep.subr.mxu0 %v2937_v11  ;;  %2255 = vmatprep.subr.mxu1 %v3970_v0  ;;  %v3029_v33 = vld [vmem:[%s2896_s9 + $0x48] sm:$0xff]  ;;  %v3033_v34 = vld [vmem:[%s2896_s9 + $0xd0] sm:$0xff]  ;;  %v3046_v37 = vld [vmem:[%s2896_s9 + $0xb8] sm:$0xff] }
  0x26   : > { %375 = vmatpush1.msra.mxu0 %v2941_v12  ;;  %2256 = vmatpush3.msra.mxu1 %v2981_v22  ;;  %v3042_v36 = vld [vmem:[%s2896_s9 + $0x30] sm:$0xff]  ;;  %v3050_v38 = vld [vmem:[%s2896_s9 + $0x20] sm:$0xff]  ;;  %v3055_v39 = vld [vmem:[%s2896_s9 + $0x18] sm:$0xff] }
  0x27   : > { %376 = vmatprep.subr.mxu0 %v2945_v13  ;;  %2257 = vmatprep.subr.mxu1 %v3970_v0  ;;  %v3059_v40 = vld [vmem:[%s2896_s9 + $0xa0] sm:$0xff]  ;;  %v3063_v41 = vld [vmem:[%s2896_s9 + $0x8] sm:$0xff]  ;;  %v3081_v45 = vld [vmem:[%s2896_s9 + $0x70] sm:$0xff] }
  0x28   : > { %377 = vmatpush1.msra.mxu0 %v2949_v14  ;;  %2258 = vmatpush3.msra.mxu1 %v2994_v25  ;;  %3999 = vst [vmem:[#allocation7_spill] sm:$0xff] %v3063_v41  ;;  %v3068_v42 = vld [vmem:[%s2896_s9] sm:$0xff]  ;;  %v3072_v43 = vld [vmem:[%s2896_s9 + $0x88] sm:$0xff]  ;;  %v3088_v46 = vld [vmem:[%s2896_s9 + $0x58] sm:$0xff] }
  0x29   : > { %378 = vmatprep.subr.mxu0 %v2959_v17  ;;  %2259 = vmatprep.subr.mxu1 %v3970_v0  ;;  %4000 = vst [vmem:[#allocation8_spill] sm:$0xff] %v3068_v42  ;;  %v3075_v44 = vld [vmem:[#allocation2] sm:$0x3]  ;;  %v3101_v48 = vld [vmem:[%s2896_s9 + $0x28] sm:$0xff]  ;;  %v3108_v49 = vld [vmem:[%s2896_s9 + $0x10] sm:$0xff] }
  0x2a   : > { %379 = vmatpush1.msra.mxu0 %v2964_v18  ;;  %2260 = vmatpush3.msra.mxu1 %v3007_v28  ;;  %v3094_v47 = vld [vmem:[%s2896_s9 + $0x40] sm:$0xff]  ;;  %4001 = vst [vmem:[#allocation9_spill] sm:$0xff] %v3101_v48  ;;  %4002 = vst [vmem:[#allocation10_spill] sm:$0xff] %v3108_v49 }
  0x2b   : > { %380 = vmatprep.subr.mxu0 %v2972_v20  ;;  %2261 = vmatprep.subr.mxu1 %v3970_v0  ;;  %v340_v53 = vld [vmem:[%s281_s15] sm:$0x7]  ;;  %s2055_s15 = sshll.u32 %s3285_s11, 1 }
  0x2c   : > { %381 = vmatpush1.msra.mxu0 %v2977_v21  ;;  %2262 = vmatpush3.msra.mxu1 %v3020_v31  ;;  %v3195_v54 = vrot.slane %v340_v53, %v351_v52  ;;  %v346_v56 = vld [vmem:[%s345_s26] sm:$0x3f]  ;;  %v3198_v59 = vrot.slane %v340_v53, %v355_v55  ;;  %v359_v55 = vsub.s32 2, %v350_v51  ;;  %s710_s16 = scalar_lea.vmem %s3209_s10, %s2055_s15 [#allocation3]  ;;  %s715_s26 = scalar_lea.vmem %s3192_s25, %s2089_s23 }
  0x2d   : > { %382 = vmatprep.subr.mxu0 %v2985_v23  ;;  %2263 = vmatprep.subr.mxu1 %v3970_v0  ;;  %v513_v50 = vrot.slane %v346_v56, 2 }
  0x2e   : > { %383 = vmatpush1.msra.mxu0 %v2990_v24  ;;  %2264 = vmatpush3.msra.mxu1 %v3033_v34  ;;  %4003 = vst [vmem:[#allocation11_spill] sm:$0xff] %v3195_v54  ;;  %4004 = vst [vmem:[#allocation12_spill] sm:$0xff] %v3198_v59 }
  0x2f   : > { %384 = vmatprep.subr.mxu0 %v2998_v26  ;;  %2265 = vmatprep.subr.mxu1 %v3970_v0 }
  0x30   : > { %385 = vmatpush1.msra.mxu0 %v3003_v27  ;;  %2266 = vmatpush3.msra.mxu1 %v3046_v37 }
  0x31   : > { %386 = vmatprep.subr.mxu0 %v3011_v29  ;;  %2267 = vmatprep.subr.mxu1 %v3970_v0 }
  0x32   : > { %387 = vmatpush1.msra.mxu0 %v3016_v30  ;;  %2268 = vmatpush3.msra.mxu1 %v3059_v40 }
  0x33   : > { %388 = vmatprep.subr.mxu0 %v3024_v32  ;;  %2269 = vmatprep.subr.mxu1 %v3970_v0 }
  0x34   : > { %389 = vmatpush1.msra.mxu0 %v3029_v33  ;;  %2270 = vmatpush3.msra.mxu1 %v3072_v43 }
  0x35   : > { %390 = vmatprep.subr.mxu0 %v3037_v35  ;;  %2271 = vmatprep.subr.mxu1 %v3970_v0 }
  0x36   : > { %391 = vmatpush1.msra.mxu0 %v3042_v36  ;;  %2272 = vmatpush3.msra.mxu1 %v3081_v45 }
  0x37   : > { %392 = vmatprep.subr.mxu0 %v3050_v38  ;;  %2273 = vmatprep.subr.mxu1 %v3970_v0 }
  0x38   : > { %393 = vmatpush1.msra.mxu0 %v3055_v39  ;;  %2274 = vmatpush3.msra.mxu1 %v3088_v46 }
  0x39   : > { %394 = vmatprep.subr.mxu0 %v3063_v41  ;;  %2275 = vmatprep.subr.mxu1 %v3970_v0 }
  0x3a   : > { %395 = vmatpush1.msra.mxu0 %v3068_v42  ;;  %2276 = vmatpush3.msra.mxu1 %v3094_v47 }
  0x3b   : > { %429 = vmatmul.mubr.f32.vlgmr.msra.gmra.mxu0 %v3075_v44  ;;  %541 = vmatprep.subr.mxu0 %v2899_v1 }
  0x3c   : > { %542 = vmatpush1.msra.mxu0 %v2902_v2  ;;  %2277 = vmatprep.subr.mxu1 %v3970_v0 }
  0x3d   : > { %543 = vmatprep.subr.mxu0 %v2905_v3  ;;  %2278 = vmatpush3.msra.mxu1 %v3101_v48 }
  0x3e   : > { %544 = vmatpush1.msra.mxu0 %v2909_v4  ;;  %2279 = vmatprep.subr.mxu1 %v3970_v0 }
  0x3f   : > { %545 = vmatprep.subr.mxu0 %v2913_v5  ;;  %2280 = vmatpush3.msra.mxu1 %v3108_v49 }
  0x40   : > { %546 = vmatpush1.msra.mxu0 %v2917_v6  ;;  %2282 = vmatmul.mubr.f32.vlgmr.msra.gmra.mxu1 %v3075_v44 }
  0x41   : > { %547 = vmatprep.subr.mxu0 %v2921_v7  ;;  %2284 = vmatprep.subr.mxu1 %v3970_v0 }
  0x42   : > { %548 = vmatpush1.msra.mxu0 %v2925_v8  ;;  %2285 = vmatpush3.msra.mxu1 %v2952_v15 }
  0x43   : > { %549 = vmatprep.subr.mxu0 %v2929_v9  ;;  %2286 = vmatprep.subr.mxu1 %v3970_v0 }
  0x44   : > { %550 = vmatpush1.msra.mxu0 %v2933_v10  ;;  %2287 = vmatpush3.msra.mxu1 %v2955_v16 }
  0x45   : > { %551 = vmatprep.subr.mxu0 %v2937_v11  ;;  %2288 = vmatprep.subr.mxu1 %v3970_v0 }
  0x46   : > { %552 = vmatpush1.msra.mxu0 %v2941_v12  ;;  %2289 = vmatpush3.msra.mxu1 %v2968_v19 }
  0x47   : > { %553 = vmatprep.subr.mxu0 %v2945_v13  ;;  %2290 = vmatprep.subr.mxu1 %v3970_v0 }
  0x48   : > { %554 = vmatpush1.msra.mxu0 %v2949_v14  ;;  %2291 = vmatpush3.msra.mxu1 %v2981_v22 }
  0x49   : > { %555 = vmatprep.subr.mxu0 %v2959_v17  ;;  %2292 = vmatprep.subr.mxu1 %v3970_v0 }
  0x4a   : > { %556 = vmatpush1.msra.mxu0 %v2964_v18  ;;  %2293 = vmatpush3.msra.mxu1 %v2994_v25 }
  0x4b   : > { %557 = vmatprep.subr.mxu0 %v2972_v20  ;;  %2294 = vmatprep.subr.mxu1 %v3970_v0 }
  0x4c   : > { %558 = vmatpush1.msra.mxu0 %v2977_v21  ;;  %2295 = vmatpush3.msra.mxu1 %v3007_v28 }
  0x4d   : > { %559 = vmatprep.subr.mxu0 %v2985_v23  ;;  %2296 = vmatprep.subr.mxu1 %v3970_v0 }
  0x4e   : > { %560 = vmatpush1.msra.mxu0 %v2990_v24  ;;  %2297 = vmatpush3.msra.mxu1 %v3020_v31 }
  0x4f   : > { %561 = vmatprep.subr.mxu0 %v2998_v26  ;;  %2298 = vmatprep.subr.mxu1 %v3970_v0 }
  0x50   : > { %562 = vmatpush1.msra.mxu0 %v3003_v27  ;;  %2299 = vmatpush3.msra.mxu1 %v3033_v34 }
  0x51   : > { %563 = vmatprep.subr.mxu0 %v3011_v29  ;;  %2300 = vmatprep.subr.mxu1 %v3970_v0 }
  0x52   : > { %564 = vmatpush1.msra.mxu0 %v3016_v30  ;;  %2301 = vmatpush3.msra.mxu1 %v3046_v37 }
  0x53   : > { %565 = vmatprep.subr.mxu0 %v3024_v32  ;;  %2302 = vmatprep.subr.mxu1 %v3970_v0 }
  0x54   : > { %566 = vmatpush1.msra.mxu0 %v3029_v33  ;;  %2303 = vmatpush3.msra.mxu1 %v3059_v40 }
  0x55   : > { %567 = vmatprep.subr.mxu0 %v3037_v35  ;;  %2304 = vmatprep.subr.mxu1 %v3970_v0 }
  0x56   : > { %568 = vmatpush1.msra.mxu0 %v3042_v36  ;;  %2305 = vmatpush3.msra.mxu1 %v3072_v43 }
  0x57   : > { %569 = vmatprep.subr.mxu0 %v3050_v38  ;;  %2306 = vmatprep.subr.mxu1 %v3970_v0 }
  0x58   : > { %570 = vmatpush1.msra.mxu0 %v3055_v39  ;;  %2307 = vmatpush3.msra.mxu1 %v3081_v45 }
  0x59   : > { %571 = vmatprep.subr.mxu0 %v3063_v41  ;;  %2308 = vmatprep.subr.mxu1 %v3970_v0 }
  0x5a   : > { %572 = vmatpush1.msra.mxu0 %v3068_v42  ;;  %605 = vmatprep.mubr.f32.mxu0 %v3970_v0 }
  0x5b   : > { %2309 = vmatpush3.msra.mxu1 %v3088_v46  ;;  %2316 = vmatprep.mubr.msk.f32.mxu1 %vm2801_vm0, %v3970_v0 }
  0x5c   : > { %2310 = vmatprep.subr.mxu1 %v3970_v0  ;;  %718 = vmatprep.subr.mxu0 %v2899_v1 }
  0x5d   : > { %2311 = vmatpush3.msra.mxu1 %v3094_v47 }
  0x5e   : > { %2312 = vmatprep.subr.mxu1 %v3970_v0 }
  0x5f   : > { %2313 = vmatpush3.msra.mxu1 %v3101_v48 }
  0x60   : > { %2314 = vmatprep.subr.mxu1 %v3970_v0 }
  0x61   : > { %2315 = vmatpush3.msra.mxu1 %v3108_v49 }
  0x62   : > { %2319 = vmatprep.subr.mxu1 %v3970_v0 }
  0xfb   : > { %v430_v57 = vpop.f32.mrf.mxu0 }
  0xfc   : > { %v431_v58 = vadd.f32 %v430_v57, %v3195_v54  ;;  %v3201_v57 = vrot.slane %v340_v53, %v359_v55  ;;  %v4009_v55 = vld [vmem:[#allocation6_spill] sm:$0xff] }
  0xfd   : > { %v432_v60 = vpop.f32.mrf.mxu0 }
  0xfe   : > { %v505_v61 = vadd.f32 %v431_v58, %v346_v56  ;;  %v433_v63 = vadd.f32 %v432_v60, %v3198_v59  ;;  %v523_v59 = vrot.slane %v346_v56, 4 }
 0x100   : > { %v2049_v62 = vmul.f32 -1.442695, %v505_v61  ;;  %v515_v0 = vadd.f32 %v513_v50, %v433_v63  ;;  %v501_v1 = vpop.f32.mrf.mxu1  ;;  %v4007_v50 = vld [vmem:[#allocation8_spill] sm:$0xff] }
 0x101   : > { %v502_v60 = vadd.f32 %v501_v1, %v3201_v57 }
 0x102   : > { %2610 = vpow2.f32 %v2049_v62  ;;  %v2283_v49 = vpop.f32.mrf.mxu1  ;;  %v2050_v42 = vmul.f32 -1.442695, %v515_v0 }
 0x104   : > { %2612 = vpow2.f32 %v2050_v42 }
 0x10f   : > { %v2611_v52 = vpop.eup %2610 }
 0x110   : > { %v509_v41 = vadd.f32 1.0, %v2611_v52  ;;  %v4008_v52 = vld [vmem:[#allocation10_spill] sm:$0xff] }
 0x111   : > { %v2613_v58 = vpop.eup %2612 }
 0x112   : > { %2614 = vrcp.f32 %v509_v41  ;;  %v519_v61 = vadd.f32 1.0, %v2613_v58  ;;  %v539_v58 = vld [vmem:[%s538_s14] sm:$0x3f] }
 0x114   : > { %2616 = vrcp.f32 %v519_v61 }
 0x11f   : > { %v2615_v62 = vpop.eup %2614 }
 0x120   : > { %v522_v63 = vmul.f32 %v2615_v62, %v502_v60 }
 0x121   : > { %v2617_v0 = vpop.eup %2616 }
 0x122   : > { %v525_v49 = vadd.f32 %v523_v59, %v522_v63  ;;  %v527_v42 = vsub.f32 1.0, %v2617_v0  ;;  %v529_v51 = vmul.f32 %v2617_v0, %v3075_v44  ;;  %v4005_v44 = vmov 0.0   ;;  %v4006_v59 = vld [vmem:[#allocation7_spill] sm:$0xff] }
 0x124   : > { %2618 = vtanh.f32 %v525_v49 }
 0x131   : > { %v2619_v41 = vpop.eup %2618 }
 0x132   : > { %v528_v53 = vmul.f32 %v2619_v41, %v527_v42  ;;  %v4010_v41 = vld [vmem:[#allocation12_spill] sm:$0xff] }
 0x134   : > { %v530_v1 = vadd.f32 %v529_v51, %v528_v53  ;;  %v690_v53 = vrot.slane %v539_v58, 2 }
 0x136   : > { %531 = vst [vmem:[#allocation2] sm:$0x3] %v530_v1  ;;  %534 = vst [vmem:[%s533_s12] sm:$0x3] %v530_v1  ;;  %s3454_s12 = scalar_select %p341_p11, 3, 4 }
 0x138   : > { %s2090_s11 = smul.u32 6, %s3454_s12  ;;  %s2063_s14 = sshll.u32 %s3454_s12, 1 }
 0x139   : > { %s1064_s15 = scalar_lea.vmem %s3209_s10, %s2063_s14 [#allocation3] }
 0x13a   : > { %s892_s13 = scalar_lea.vmem %s3192_s25, %s2090_s11  ;;  %s2071_s11 = sshll.u32 %s3761_s7, 1 }
 0x13b   : > { %s3843_s14 = scalar_select %p341_p11, 6, 1 }
 0x13d   : > { %v3212_v56 = vld [vmem:[#allocation2] sm:$0x3] }
 0x13e   : > { %606 = vmatmul.mubr.f32.vlgmr.msra.gmra.mxu0 %v3212_v56  ;;  %2317 = vmatmul.mubr.f32.vlgmr.msra.gmra.mxu1 %v3212_v56 }
 0x13f   : > { %719 = vmatpush1.msra.mxu0 %v2902_v2  ;;  %2320 = vmatpush3.msra.mxu1 %v2952_v15 }
 0x140   : > { %720 = vmatprep.subr.mxu0 %v2905_v3  ;;  %2321 = vmatprep.subr.mxu1 %v4005_v44 }
 0x141   : > { %721 = vmatpush1.msra.mxu0 %v2909_v4  ;;  %2322 = vmatpush3.msra.mxu1 %v2955_v16 }
 0x142   : > { %722 = vmatprep.subr.mxu0 %v2913_v5  ;;  %2323 = vmatprep.subr.mxu1 %v4005_v44 }
 0x143   : > { %723 = vmatpush1.msra.mxu0 %v2917_v6  ;;  %2324 = vmatpush3.msra.mxu1 %v2968_v19 }
 0x144   : > { %724 = vmatprep.subr.mxu0 %v2921_v7  ;;  %2325 = vmatprep.subr.mxu1 %v4005_v44 }
 0x145   : > { %725 = vmatpush1.msra.mxu0 %v2925_v8  ;;  %2326 = vmatpush3.msra.mxu1 %v2981_v22 }
 0x146   : > { %726 = vmatprep.subr.mxu0 %v2929_v9  ;;  %2327 = vmatprep.subr.mxu1 %v4005_v44 }
 0x147   : > { %727 = vmatpush1.msra.mxu0 %v2933_v10  ;;  %2328 = vmatpush3.msra.mxu1 %v2994_v25 }
 0x148   : > { %728 = vmatprep.subr.mxu0 %v2937_v11  ;;  %2329 = vmatprep.subr.mxu1 %v4005_v44 }
 0x149   : > { %729 = vmatpush1.msra.mxu0 %v2941_v12  ;;  %2330 = vmatpush3.msra.mxu1 %v3007_v28 }
 0x14a   : > { %730 = vmatprep.subr.mxu0 %v2945_v13  ;;  %2331 = vmatprep.subr.mxu1 %v4005_v44 }
 0x14b   : > { %731 = vmatpush1.msra.mxu0 %v2949_v14  ;;  %2332 = vmatpush3.msra.mxu1 %v3020_v31 }
 0x14c   : > { %732 = vmatprep.subr.mxu0 %v2959_v17  ;;  %2333 = vmatprep.subr.mxu1 %v4005_v44 }
 0x14d   : > { %733 = vmatpush1.msra.mxu0 %v2964_v18  ;;  %2334 = vmatpush3.msra.mxu1 %v3033_v34 }
 0x14e   : > { %734 = vmatprep.subr.mxu0 %v2972_v20  ;;  %2335 = vmatprep.subr.mxu1 %v4005_v44 }
 0x14f   : > { %735 = vmatpush1.msra.mxu0 %v2977_v21  ;;  %2336 = vmatpush3.msra.mxu1 %v3046_v37 }
 0x150   : > { %736 = vmatprep.subr.mxu0 %v2985_v23  ;;  %2337 = vmatprep.subr.mxu1 %v4005_v44 }
 0x151   : > { %737 = vmatpush1.msra.mxu0 %v2990_v24  ;;  %2338 = vmatpush3.msra.mxu1 %v3059_v40 }
 0x152   : > { %738 = vmatprep.subr.mxu0 %v2998_v26  ;;  %2339 = vmatprep.subr.mxu1 %v4005_v44 }
 0x153   : > { %739 = vmatpush1.msra.mxu0 %v3003_v27  ;;  %2340 = vmatpush3.msra.mxu1 %v3072_v43 }
 0x154   : > { %740 = vmatprep.subr.mxu0 %v3011_v29  ;;  %2341 = vmatprep.subr.mxu1 %v4005_v44 }
 0x155   : > { %741 = vmatpush1.msra.mxu0 %v3016_v30  ;;  %2342 = vmatpush3.msra.mxu1 %v3081_v45 }
 0x156   : > { %742 = vmatprep.subr.mxu0 %v3024_v32  ;;  %2343 = vmatprep.subr.mxu1 %v4005_v44 }
 0x157   : > { %743 = vmatpush1.msra.mxu0 %v3029_v33  ;;  %2344 = vmatpush3.msra.mxu1 %v3088_v46 }
 0x158   : > { %744 = vmatprep.subr.mxu0 %v3037_v35  ;;  %2345 = vmatprep.subr.mxu1 %v4005_v44 }
 0x159   : > { %745 = vmatpush1.msra.mxu0 %v3042_v36  ;;  %2346 = vmatpush3.msra.mxu1 %v3094_v47 }
 0x15a   : > { %746 = vmatprep.subr.mxu0 %v3050_v38  ;;  %2347 = vmatprep.subr.mxu1 %v4005_v44 }
 0x15b   : > { %747 = vmatpush1.msra.mxu0 %v3055_v39  ;;  %2348 = vmatpush3.msra.mxu1 %v3101_v48 }
 0x15c   : > { %748 = vmatprep.subr.mxu0 %v4006_v59  ;;  %2349 = vmatprep.subr.mxu1 %v4005_v44 }
 0x15d   : > { %749 = vmatpush1.msra.mxu0 %v4007_v50  ;;  %782 = vmatprep.mubr.f32.mxu0 %v4005_v44 }
 0x15e   : > { %2350 = vmatpush3.msra.mxu1 %v4008_v52  ;;  %2351 = vmatprep.mubr.msk.f32.mxu1 %vm2801_vm0, %v4005_v44 }
 0x15f   : > { %895 = vmatprep.subr.mxu0 %v4009_v55  ;;  %2354 = vmatprep.subr.mxu1 %v4005_v44 }
 0x1fe   : > { %v607_v61 = vpop.f32.mrf.mxu0  ;;  %v678_v60 = vpop.f32.mrf.mxu1 }
 0x1ff   : > { %v608_v62 = vadd.f32 %v607_v61, %v3195_v54  ;;  %v679_v61 = vadd.f32 %v678_v60, %v3201_v57  ;;  %v700_v54 = vrot.slane %v539_v58, 4  ;;  %v716_v60 = vld [vmem:[%s715_s26] sm:$0x3f] }
 0x200   : > { %v609_v63 = vpop.f32.mrf.mxu0  ;;  %v2318_v49 = vpop.f32.mrf.mxu1 }
 0x201   : > { %v682_v0 = vadd.f32 %v608_v62, %v539_v58  ;;  %v610_v51 = vadd.f32 %v609_v63, %v4010_v41  ;;  %v4015_v58 = vld [vmem:[#allocation6_spill] sm:$0xff] }
 0x203   : > { %v2053_v42 = vmul.f32 -1.442695, %v682_v0  ;;  %v692_v1 = vadd.f32 %v690_v53, %v610_v51 }
 0x205   : > { %2620 = vpow2.f32 %v2053_v42  ;;  %v2054_v55 = vmul.f32 -1.442695, %v692_v1 }
 0x207   : > { %2622 = vpow2.f32 %v2054_v55 }
 0x212   : > { %v2621_v52 = vpop.eup %2620 }
 0x213   : > { %v686_v50 = vadd.f32 1.0, %v2621_v52  ;;  %v4014_v52 = vld [vmem:[#allocation10_spill] sm:$0xff] }
 0x214   : > { %v2623_v59 = vpop.eup %2622 }
 0x215   : > { %2624 = vrcp.f32 %v686_v50  ;;  %v696_v48 = vadd.f32 1.0, %v2623_v59 }
 0x217   : > { %2626 = vrcp.f32 %v696_v48  ;;  %v4011_v48 = vld [vmem:[#allocation9_spill] sm:$0xff] }
 0x222   : > { %v2625_v49 = vpop.eup %2624 }
 0x223   : > { %v699_v62 = vmul.f32 %v2625_v49, %v679_v61  ;;  %v4016_v49 = vld [vmem:[#allocation11_spill] sm:$0xff] }
 0x224   : > { %v2627_v63 = vpop.eup %2626 }
 0x225   : > { %v702_v0 = vadd.f32 %v700_v54, %v699_v62  ;;  %v704_v42 = vsub.f32 1.0, %v2627_v63  ;;  %v706_v55 = vmul.f32 %v2627_v63, %v3212_v56  ;;  %v4012_v54 = vld [vmem:[#allocation7_spill] sm:$0xff]  ;;  %v4013_v56 = vld [vmem:[#allocation8_spill] sm:$0xff] }
 0x227   : > { %2628 = vtanh.f32 %v702_v0 }
 0x234   : > { %v2629_v51 = vpop.eup %2628 }
 0x235   : > { %v705_v53 = vmul.f32 %v2629_v51, %v704_v42 }
 0x237   : > { %v707_v50 = vadd.f32 %v706_v55, %v705_v53  ;;  %v867_v55 = vrot.slane %v716_v60, 2 }
 0x239   : > { %708 = vst [vmem:[#allocation2] sm:$0x3] %v707_v50  ;;  %711 = vst [vmem:[%s710_s16] sm:$0x3] %v707_v50  ;;  %s3678_s16 = scalar_select %p341_p11, 4, 3 }
 0x23b   : > { %s2091_s17 = smul.u32 6, %s3678_s16 }
 0x23d   : > { %s1069_s23 = scalar_lea.vmem %s3192_s25, %s2091_s17  ;;  %s2075_s17 = sshll.u32 %s3843_s14, 1 }
 0x240   : > { %v3295_v59 = vld [vmem:[#allocation2] sm:$0x3] }
 0x241   : > { %783 = vmatmul.mubr.f32.vlgmr.msra.gmra.mxu0 %v3295_v59  ;;  %2352 = vmatmul.mubr.f32.vlgmr.msra.gmra.mxu1 %v3295_v59 }
 0x242   : > { %896 = vmatpush1.msra.mxu0 %v2902_v2  ;;  %2355 = vmatpush3.msra.mxu1 %v2952_v15 }
 0x243   : > { %897 = vmatprep.subr.mxu0 %v2905_v3  ;;  %2356 = vmatprep.subr.mxu1 %v4005_v44 }
 0x244   : > { %898 = vmatpush1.msra.mxu0 %v2909_v4  ;;  %2357 = vmatpush3.msra.mxu1 %v2955_v16 }
 0x245   : > { %899 = vmatprep.subr.mxu0 %v2913_v5  ;;  %2358 = vmatprep.subr.mxu1 %v4005_v44 }
 0x246   : > { %900 = vmatpush1.msra.mxu0 %v2917_v6  ;;  %2359 = vmatpush3.msra.mxu1 %v2968_v19 }
 0x247   : > { %901 = vmatprep.subr.mxu0 %v2921_v7  ;;  %2360 = vmatprep.subr.mxu1 %v4005_v44 }
 0x248   : > { %902 = vmatpush1.msra.mxu0 %v2925_v8  ;;  %2361 = vmatpush3.msra.mxu1 %v2981_v22 }
 0x249   : > { %903 = vmatprep.subr.mxu0 %v2929_v9  ;;  %2362 = vmatprep.subr.mxu1 %v4005_v44 }
 0x24a   : > { %904 = vmatpush1.msra.mxu0 %v2933_v10  ;;  %2363 = vmatpush3.msra.mxu1 %v2994_v25 }
 0x24b   : > { %905 = vmatprep.subr.mxu0 %v2937_v11  ;;  %2364 = vmatprep.subr.mxu1 %v4005_v44 }
 0x24c   : > { %906 = vmatpush1.msra.mxu0 %v2941_v12  ;;  %2365 = vmatpush3.msra.mxu1 %v3007_v28 }
 0x24d   : > { %907 = vmatprep.subr.mxu0 %v2945_v13  ;;  %2366 = vmatprep.subr.mxu1 %v4005_v44 }
 0x24e   : > { %908 = vmatpush1.msra.mxu0 %v2949_v14  ;;  %2367 = vmatpush3.msra.mxu1 %v3020_v31 }
 0x24f   : > { %909 = vmatprep.subr.mxu0 %v2959_v17  ;;  %2368 = vmatprep.subr.mxu1 %v4005_v44 }
 0x250   : > { %910 = vmatpush1.msra.mxu0 %v2964_v18  ;;  %2369 = vmatpush3.msra.mxu1 %v3033_v34 }
 0x251   : > { %911 = vmatprep.subr.mxu0 %v2972_v20  ;;  %2370 = vmatprep.subr.mxu1 %v4005_v44 }
 0x252   : > { %912 = vmatpush1.msra.mxu0 %v2977_v21  ;;  %2371 = vmatpush3.msra.mxu1 %v3046_v37 }
 0x253   : > { %913 = vmatprep.subr.mxu0 %v2985_v23  ;;  %2372 = vmatprep.subr.mxu1 %v4005_v44 }
 0x254   : > { %914 = vmatpush1.msra.mxu0 %v2990_v24  ;;  %2373 = vmatpush3.msra.mxu1 %v3059_v40 }
 0x255   : > { %915 = vmatprep.subr.mxu0 %v2998_v26  ;;  %2374 = vmatprep.subr.mxu1 %v4005_v44 }
 0x256   : > { %916 = vmatpush1.msra.mxu0 %v3003_v27  ;;  %2375 = vmatpush3.msra.mxu1 %v3072_v43 }
 0x257   : > { %917 = vmatprep.subr.mxu0 %v3011_v29  ;;  %2376 = vmatprep.subr.mxu1 %v4005_v44 }
 0x258   : > { %918 = vmatpush1.msra.mxu0 %v3016_v30  ;;  %2377 = vmatpush3.msra.mxu1 %v3081_v45 }
 0x259   : > { %919 = vmatprep.subr.mxu0 %v3024_v32  ;;  %2378 = vmatprep.subr.mxu1 %v4005_v44 }
 0x25a   : > { %920 = vmatpush1.msra.mxu0 %v3029_v33  ;;  %2379 = vmatpush3.msra.mxu1 %v3088_v46 }
 0x25b   : > { %921 = vmatprep.subr.mxu0 %v3037_v35  ;;  %2380 = vmatprep.subr.mxu1 %v4005_v44 }
 0x25c   : > { %922 = vmatpush1.msra.mxu0 %v3042_v36  ;;  %2381 = vmatpush3.msra.mxu1 %v3094_v47 }
 0x25d   : > { %923 = vmatprep.subr.mxu0 %v3050_v38  ;;  %2382 = vmatprep.subr.mxu1 %v4005_v44 }
 0x25e   : > { %924 = vmatpush1.msra.mxu0 %v3055_v39  ;;  %2383 = vmatpush3.msra.mxu1 %v4011_v48 }
 0x25f   : > { %925 = vmatprep.subr.mxu0 %v4012_v54  ;;  %2384 = vmatprep.subr.mxu1 %v4005_v44 }
 0x260   : > { %926 = vmatpush1.msra.mxu0 %v4013_v56  ;;  %959 = vmatprep.mubr.f32.mxu0 %v4005_v44 }
 0x261   : > { %2385 = vmatpush3.msra.mxu1 %v4014_v52  ;;  %2386 = vmatprep.mubr.msk.f32.mxu1 %vm2801_vm0, %v4005_v44 }
 0x262   : > { %1072 = vmatprep.subr.mxu0 %v4015_v58  ;;  %2389 = vmatprep.subr.mxu1 %v4005_v44 }
 0x301   : > { %v784_v1 = vpop.f32.mrf.mxu0  ;;  %v855_v61 = vpop.f32.mrf.mxu1 }
 0x302   : > { %v785_v62 = vadd.f32 %v784_v1, %v4016_v49  ;;  %v856_v1 = vadd.f32 %v855_v61, %v3201_v57  ;;  %v877_v49 = vrot.slane %v716_v60, 4  ;;  %v3525_v61 = vld [vmem:[%s2896_s9 + $0x118] sm:$0xff] }
 0x303   : > { %v786_v0 = vpop.f32.mrf.mxu0  ;;  %v2353_v63 = vpop.f32.mrf.mxu1 }
 0x304   : > { %v859_v42 = vadd.f32 %v785_v62, %v716_v60  ;;  %v787_v53 = vadd.f32 %v786_v0, %v4010_v41  ;;  %v3521_v60 = vld [vmem:[%s2896_s9 + $0x108] sm:$0xff] }
 0x306   : > { %v2057_v51 = vmul.f32 -1.442695, %v859_v42  ;;  %v869_v50 = vadd.f32 %v867_v55, %v787_v53 }
 0x308   : > { %2630 = vpow2.f32 %v2057_v51  ;;  %v2058_v58 = vmul.f32 -1.442695, %v869_v50 }
 0x30a   : > { %2632 = vpow2.f32 %v2058_v58  ;;  %v3534_v58 = vld [vmem:[%s2896_s9 + $0xf0] sm:$0xff] }
 0x315   : > { %v2631_v52 = vpop.eup %2630 }
 0x316   : > { %v863_v56 = vadd.f32 1.0, %v2631_v52  ;;  %v3516_v52 = vld [vmem:[%s2896_s9 + $0x110] sm:$0xff] }
 0x317   : > { %v2633_v54 = vpop.eup %2632 }
 0x318   : > { %2634 = vrcp.f32 %v863_v56  ;;  %v873_v48 = vadd.f32 1.0, %v2633_v54 }
 0x31a   : > { %2636 = vrcp.f32 %v873_v48  ;;  %v3512_v48 = vld [vmem:[%s2896_s9 + $0x130] sm:$0xff] }
 0x325   : > { %v2635_v63 = vpop.eup %2634 }
 0x326   : > { %v876_v62 = vmul.f32 %v2635_v63, %v856_v1  ;;  %v3538_v1 = vld [vmem:[%s2896_s9 + $0x100] sm:$0xff] }
 0x327   : > { %v2637_v0 = vpop.eup %2636  ;;  %v3542_v63 = vld [vmem:[%s2896_s9 + $0xe0] sm:$0xff] }
 0x328   : > { %v879_v42 = vadd.f32 %v877_v49, %v876_v62  ;;  %v881_v51 = vsub.f32 1.0, %v2637_v0  ;;  %v883_v50 = vmul.f32 %v2637_v0, %v3295_v59  ;;  %v3508_v59 = vld [vmem:[%s2896_s9 + $0x120] sm:$0xff]  ;;  %v3529_v49 = vld [vmem:[%s2896_s9 + $0xf8] sm:$0xff]  ;;  %v3555_v0 = vld [vmem:[%s2896_s9 + $0xc8] sm:$0xff] }
 0x329   : > { %v3547_v62 = vld [vmem:[%s2896_s9 + $0xd8] sm:$0xff] }
 0x32a   : > { %2638 = vtanh.f32 %v879_v42  ;;  %v3551_v42 = vld [vmem:[%s2896_s9 + $0xe8] sm:$0xff] }
 0x337   : > { %v2639_v53 = vpop.eup %2638 }
 0x338   : > { %v882_v55 = vmul.f32 %v2639_v53, %v881_v51  ;;  %v3560_v51 = vld [vmem:[%s2896_s9 + $0xc0] sm:$0xff]  ;;  %v3564_v53 = vld [vmem:[%s2896_s9 + $0xd0] sm:$0xff] }
 0x33a   : > { %v884_v56 = vadd.f32 %v883_v50, %v882_v55  ;;  %v3568_v55 = vld [vmem:[%s2896_s9 + $0xb0] sm:$0xff]  ;;  %v3573_v50 = vld [vmem:[%s2896_s9 + $0xa8] sm:$0xff] }
 0x33c   : > { %885 = vst [vmem:[#allocation2] sm:$0x3] %v884_v56  ;;  %888 = vst [vmem:[%s887_s8] sm:$0x3] %v884_v56  ;;  %v3577_v56 = vld [vmem:[%s2896_s9 + $0xb8] sm:$0xff]  ;;  %s2092_s8 = smul.u32 6, %s3761_s7 }
 0x33e   : > { %s1246_s12 = scalar_lea.vmem %s3192_s25, %s2092_s8 }
 0x343   : > { %v3378_v54 = vld [vmem:[#allocation2] sm:$0x3] }
 0x344   : > { %960 = vmatmul.mubr.f32.vlgmr.msra.gmra.mxu0 %v3378_v54  ;;  %2387 = vmatmul.mubr.f32.vlgmr.msra.gmra.mxu1 %v3378_v54 }
 0x345   : > { %1073 = vmatpush1.msra.mxu0 %v2902_v2  ;;  %2390 = vmatpush3.msra.mxu1 %v2952_v15  ;;  %v4017_v2 = vld [vmem:[#allocation9_spill] sm:$0xff] }
 0x346   : > { %1074 = vmatprep.subr.mxu0 %v2905_v3  ;;  %2391 = vmatprep.subr.mxu1 %v4005_v44  ;;  %v4018_v3 = vld [vmem:[#allocation7_spill] sm:$0xff] }
 0x347   : > { %1075 = vmatpush1.msra.mxu0 %v2909_v4  ;;  %2392 = vmatpush3.msra.mxu1 %v2955_v16  ;;  %v4019_v4 = vld [vmem:[#allocation8_spill] sm:$0xff] }
 0x348   : > { %1076 = vmatprep.subr.mxu0 %v2913_v5  ;;  %2393 = vmatprep.subr.mxu1 %v4005_v44  ;;  %v4020_v5 = vld [vmem:[#allocation10_spill] sm:$0xff] }
 0x349   : > { %1077 = vmatpush1.msra.mxu0 %v2917_v6  ;;  %2394 = vmatpush3.msra.mxu1 %v2968_v19  ;;  %v3448_v6 = vld [vmem:[%s2896_s9 + $0x170] sm:$0xff] }
 0x34a   : > { %1078 = vmatprep.subr.mxu0 %v2921_v7  ;;  %2395 = vmatprep.subr.mxu1 %v4005_v44  ;;  %4021 = vst [vmem:[#allocation12_spill] sm:$0xff] %v3448_v6  ;;  %v893_v7 = vld [vmem:[%s892_s13] sm:$0x3f]  ;;  %s1418_s13 = scalar_lea.vmem %s3209_s10, %s2071_s11 [#allocation3] }
 0x34b   : > { %1079 = vmatpush1.msra.mxu0 %v2925_v8  ;;  %2396 = vmatpush3.msra.mxu1 %v2981_v22 }
 0x34c   : > { %1080 = vmatprep.subr.mxu0 %v2929_v9  ;;  %2397 = vmatprep.subr.mxu1 %v4005_v44 }
 0x34d   : > { %1081 = vmatpush1.msra.mxu0 %v2933_v10  ;;  %2398 = vmatpush3.msra.mxu1 %v2994_v25  ;;  %v4022_v10 = vld [vmem:[#allocation11_spill] sm:$0xff]  ;;  %v1054_v25 = vrot.slane %v893_v7, 4 }
 0x34e   : > { %1082 = vmatprep.subr.mxu0 %v2937_v11  ;;  %2399 = vmatprep.subr.mxu1 %v4005_v44 }
 0x34f   : > { %1083 = vmatpush1.msra.mxu0 %v2941_v12  ;;  %2400 = vmatpush3.msra.mxu1 %v3007_v28 }
 0x350   : > { %1084 = vmatprep.subr.mxu0 %v2945_v13  ;;  %2401 = vmatprep.subr.mxu1 %v4005_v44 }
 0x351   : > { %1085 = vmatpush1.msra.mxu0 %v2949_v14  ;;  %2402 = vmatpush3.msra.mxu1 %v3020_v31 }
 0x352   : > { %1086 = vmatprep.subr.mxu0 %v2959_v17  ;;  %2403 = vmatprep.subr.mxu1 %v4005_v44  ;;  %v1044_v17 = vrot.slane %v893_v7, 2 }
 0x353   : > { %1087 = vmatpush1.msra.mxu0 %v2964_v18  ;;  %2404 = vmatpush3.msra.mxu1 %v3033_v34 }
 0x354   : > { %1088 = vmatprep.subr.mxu0 %v2972_v20  ;;  %2405 = vmatprep.subr.mxu1 %v4005_v44 }
 0x355   : > { %1089 = vmatpush1.msra.mxu0 %v2977_v21  ;;  %2406 = vmatpush3.msra.mxu1 %v3046_v37  ;;  %v3473_v37 = vld [vmem:[%s2896_s9 + $0x178] sm:$0xff] }
 0x356   : > { %1090 = vmatprep.subr.mxu0 %v2985_v23  ;;  %2407 = vmatprep.subr.mxu1 %v4005_v44 }
 0x357   : > { %1091 = vmatpush1.msra.mxu0 %v2990_v24  ;;  %2408 = vmatpush3.msra.mxu1 %v3059_v40  ;;  %v3486_v40 = vld [vmem:[%s2896_s9 + $0x160] sm:$0xff] }
 0x358   : > { %1092 = vmatprep.subr.mxu0 %v2998_v26  ;;  %2409 = vmatprep.subr.mxu1 %v4005_v44 }
 0x359   : > { %1093 = vmatpush1.msra.mxu0 %v3003_v27  ;;  %2410 = vmatpush3.msra.mxu1 %v3072_v43  ;;  %v3490_v43 = vld [vmem:[%s2896_s9 + $0x140] sm:$0xff] }
 0x35a   : > { %1094 = vmatprep.subr.mxu0 %v3011_v29  ;;  %2411 = vmatprep.subr.mxu1 %v4005_v44 }
 0x35b   : > { %1095 = vmatpush1.msra.mxu0 %v3016_v30  ;;  %2412 = vmatpush3.msra.mxu1 %v3081_v45  ;;  %v3495_v45 = vld [vmem:[%s2896_s9 + $0x138] sm:$0xff] }
 0x35c   : > { %1096 = vmatprep.subr.mxu0 %v3024_v32  ;;  %2413 = vmatprep.subr.mxu1 %v4005_v44 }
 0x35d   : > { %1097 = vmatpush1.msra.mxu0 %v3029_v33  ;;  %2414 = vmatpush3.msra.mxu1 %v3088_v46  ;;  %v3499_v46 = vld [vmem:[%s2896_s9 + $0x148] sm:$0xff] }
 0x35e   : > { %1098 = vmatprep.subr.mxu0 %v3037_v35  ;;  %2415 = vmatprep.subr.mxu1 %v4005_v44 }
 0x35f   : > { %1099 = vmatpush1.msra.mxu0 %v3042_v36  ;;  %2416 = vmatpush3.msra.mxu1 %v3094_v47  ;;  %v3469_v36 = vld [vmem:[%s2896_s9 + $0x168] sm:$0xff] }
 0x360   : > { %1100 = vmatprep.subr.mxu0 %v3050_v38  ;;  %2417 = vmatprep.subr.mxu1 %v4005_v44  ;;  %v3477_v38 = vld [vmem:[%s2896_s9 + $0x158] sm:$0xff]  ;;  %v3503_v47 = vld [vmem:[%s2896_s9 + $0x128] sm:$0xff] }
 0x361   : > { %1101 = vmatpush1.msra.mxu0 %v3055_v39  ;;  %2418 = vmatpush3.msra.mxu1 %v4017_v2  ;;  %v3482_v39 = vld [vmem:[%s2896_s9 + $0x150] sm:$0xff] }
 0x362   : > { %1102 = vmatprep.subr.mxu0 %v4018_v3  ;;  %2419 = vmatprep.subr.mxu1 %v4005_v44  ;;  %v3586_v2 = vld [vmem:[%s2896_s9 + $0x90] sm:$0xff]  ;;  %v3590_v3 = vld [vmem:[%s2896_s9 + $0xa0] sm:$0xff] }
 0x363   : > { %1103 = vmatpush1.msra.mxu0 %v4019_v4  ;;  %1136 = vmatprep.mubr.f32.mxu0 %v4005_v44  ;;  %v3594_v4 = vld [vmem:[%s2896_s9 + $0x80] sm:$0xff] }
 0x364   : > { %2420 = vmatpush3.msra.mxu1 %v4020_v5  ;;  %2421 = vmatprep.mubr.msk.f32.mxu1 %vm2801_vm0, %v4005_v44  ;;  %v3599_v5 = vld [vmem:[%s2896_s9 + $0x78] sm:$0xff] }
 0x365   : > { %1249 = vmatprep.subr.mxu0 %v3448_v6  ;;  %2424 = vmatprep.subr.mxu1 %v4005_v44 }
 0x404   : > { %v961_v8 = vpop.f32.mrf.mxu0  ;;  %v1032_v9 = vpop.f32.mrf.mxu1 }
 0x405   : > { %v962_v11 = vadd.f32 %v961_v8, %v4022_v10  ;;  %v1033_v24 = vadd.f32 %v1032_v9, %v3201_v57  ;;  %v3607_v8 = vld [vmem:[%s2896_s9 + $0x68] sm:$0xff]  ;;  %v3612_v9 = vld [vmem:[%s2896_s9 + $0x60] sm:$0xff] }
 0x406   : > { %v963_v12 = vpop.f32.mrf.mxu0  ;;  %v2388_v13 = vpop.f32.mrf.mxu1 }
 0x407   : > { %v1036_v14 = vadd.f32 %v962_v11, %v893_v7  ;;  %v964_v16 = vadd.f32 %v963_v12, %v4010_v41  ;;  %v3603_v7 = vld [vmem:[%s2896_s9 + $0x88] sm:$0xff]  ;;  %v3616_v11 = vld [vmem:[%s2896_s9 + $0x70] sm:$0xff] }
 0x408   : > { %v3620_v12 = vld [vmem:[%s2896_s9 + $0x50] sm:$0xff]  ;;  %v3625_v13 = vld [vmem:[%s2896_s9 + $0x48] sm:$0xff] }
 0x409   : > { %v2061_v15 = vmul.f32 -1.442695, %v1036_v14  ;;  %v1046_v18 = vadd.f32 %v1044_v17, %v964_v16  ;;  %v3629_v14 = vld [vmem:[%s2896_s9 + $0x58] sm:$0xff]  ;;  %v3638_v16 = vld [vmem:[%s2896_s9 + $0x30] sm:$0xff]  ;;  %v3642_v17 = vld [vmem:[%s2896_s9 + $0x40] sm:$0xff] }
 0x40b   : > { %2640 = vpow2.f32 %v2061_v15  ;;  %v2062_v19 = vmul.f32 -1.442695, %v1046_v18  ;;  %v3633_v15 = vld [vmem:[%s2896_s9 + $0x38] sm:$0xff]  ;;  %v3646_v18 = vld [vmem:[%s2896_s9 + $0x20] sm:$0xff] }
 0x40d   : > { %2642 = vpow2.f32 %v2062_v19  ;;  %v3651_v19 = vld [vmem:[%s2896_s9 + $0x18] sm:$0xff] }
 0x418   : > { %v2641_v20 = vpop.eup %2640 }
 0x419   : > { %v1040_v21 = vadd.f32 1.0, %v2641_v20  ;;  %v3655_v20 = vld [vmem:[%s2896_s9 + $0x28] sm:$0xff] }
 0x41a   : > { %v2643_v22 = vpop.eup %2642  ;;  %4023 = vst [vmem:[#allocation6_spill] sm:$0xff] %v3655_v20 }
 0x41b   : > { %2644 = vrcp.f32 %v1040_v21  ;;  %v1050_v23 = vadd.f32 1.0, %v2643_v22  ;;  %v3659_v21 = vld [vmem:[%s2896_s9 + $0x8] sm:$0xff]  ;;  %v3664_v22 = vld [vmem:[%s2896_s9] sm:$0xff] }
 0x41c   : > { %4024 = vst [vmem:[#allocation9_spill] sm:$0xff] %v3659_v21  ;;  %4025 = vst [vmem:[#allocation7_spill] sm:$0xff] %v3664_v22 }
 0x41d   : > { %2646 = vrcp.f32 %v1050_v23  ;;  %v3669_v23 = vld [vmem:[%s2896_s9 + $0x10] sm:$0xff] }
 0x41e   : > { %4026 = vst [vmem:[#allocation8_spill] sm:$0xff] %v3669_v23 }
 0x428   : > { %v2645_v26 = vpop.eup %2644 }
 0x429   : > { %v1053_v27 = vmul.f32 %v2645_v26, %v1033_v24  ;;  %v1070_v24 = vld [vmem:[%s1069_s23] sm:$0x3f]  ;;  %s1595_s23 = scalar_lea.vmem %s3209_s10, %s2075_s17 [#allocation3] }
 0x42a   : > { %v2647_v29 = vpop.eup %2646 }
 0x42b   : > { %v1056_v28 = vadd.f32 %v1054_v25, %v1053_v27  ;;  %v1058_v30 = vsub.f32 1.0, %v2647_v29  ;;  %v1060_v33 = vmul.f32 %v2647_v29, %v3378_v54  ;;  %v3581_v54 = vld [vmem:[%s2896_s9 + $0x98] sm:$0xff]  ;;  %s2067_s9 = sshll.u32 %s3678_s16, 1 }
 0x42c   : > { %s1241_s26 = scalar_lea.vmem %s3209_s10, %s2067_s9 [#allocation3]  ;;  %s2086_s9 = sshll.u32 %s2888_s30, 7 }
 0x42d   : > { %2648 = vtanh.f32 %v1056_v28  ;;  %s3863_s8 = scalar_lea.vmem %s3967_s3, %s2086_s9 }
 0x43a   : > { %v2649_v31 = vpop.eup %2648 }
 0x43b   : > { %v1059_v32 = vmul.f32 %v2649_v31, %v1058_v30 }
 0x43d   : > { %v1061_v34 = vadd.f32 %v1060_v33, %v1059_v32  ;;  %v1221_v33 = vrot.slane %v1070_v24, 2 }
 0x43f   : > { %1062 = vst [vmem:[#allocation2] sm:$0x3] %v1061_v34  ;;  %1065 = vst [vmem:[%s1064_s15] sm:$0x3] %v1061_v34  ;;  %s2093_s15 = smul.u32 6, %s3843_s14 }
 0x441   : > { %s1423_s16 = scalar_lea.vmem %s3192_s25, %s2093_s15  ;;  %s2095_s15 = sshll.u32 %s2856_s22, 8 }
 0x442   : > { %s3914_s9 = scalar_lea.hbm %s3968_s4, %s2095_s15  ;;  %s2802_s22 = smov [#allocation3]  }
 0x446   : > { %v3464_v35 = vld [vmem:[#allocation2] sm:$0x3] }
 0x447   : > { %1137 = vmatmul.mubr.f32.vlgmr.msra.gmra.mxu0 %v3464_v35  ;;  %2422 = vmatmul.mubr.f32.vlgmr.msra.gmra.mxu1 %v3464_v35 }
 0x448   : > { %1250 = vmatpush1.msra.mxu0 %v3469_v36  ;;  %2425 = vmatpush3.msra.mxu1 %v3473_v37 }
 0x449   : > { %1251 = vmatprep.subr.mxu0 %v3477_v38  ;;  %2426 = vmatprep.subr.mxu1 %v4005_v44 }
 0x44a   : > { %1252 = vmatpush1.msra.mxu0 %v3482_v39  ;;  %2427 = vmatpush3.msra.mxu1 %v3486_v40 }
 0x44b   : > { %1253 = vmatprep.subr.mxu0 %v3490_v43  ;;  %2428 = vmatprep.subr.mxu1 %v4005_v44 }
 0x44c   : > { %1254 = vmatpush1.msra.mxu0 %v3495_v45  ;;  %2429 = vmatpush3.msra.mxu1 %v3499_v46 }
 0x44d   : > { %1255 = vmatprep.subr.mxu0 %v3503_v47  ;;  %2430 = vmatprep.subr.mxu1 %v4005_v44 }
 0x44e   : > { %1256 = vmatpush1.msra.mxu0 %v3508_v59  ;;  %2431 = vmatpush3.msra.mxu1 %v3512_v48 }
 0x44f   : > { %1257 = vmatprep.subr.mxu0 %v3516_v52  ;;  %2432 = vmatprep.subr.mxu1 %v4005_v44 }
 0x450   : > { %1258 = vmatpush1.msra.mxu0 %v3521_v60  ;;  %2433 = vmatpush3.msra.mxu1 %v3525_v61 }
 0x451   : > { %1259 = vmatprep.subr.mxu0 %v3529_v49  ;;  %2434 = vmatprep.subr.mxu1 %v4005_v44 }
 0x452   : > { %1260 = vmatpush1.msra.mxu0 %v3534_v58  ;;  %2435 = vmatpush3.msra.mxu1 %v3538_v1 }
 0x453   : > { %1261 = vmatprep.subr.mxu0 %v3542_v63  ;;  %2436 = vmatprep.subr.mxu1 %v4005_v44 }
 0x454   : > { %1262 = vmatpush1.msra.mxu0 %v3547_v62  ;;  %2437 = vmatpush3.msra.mxu1 %v3551_v42 }
 0x455   : > { %1263 = vmatprep.subr.mxu0 %v3555_v0  ;;  %2438 = vmatprep.subr.mxu1 %v4005_v44 }
 0x456   : > { %1264 = vmatpush1.msra.mxu0 %v3560_v51  ;;  %2439 = vmatpush3.msra.mxu1 %v3564_v53 }
 0x457   : > { %1265 = vmatprep.subr.mxu0 %v3568_v55  ;;  %2440 = vmatprep.subr.mxu1 %v4005_v44 }
 0x458   : > { %1266 = vmatpush1.msra.mxu0 %v3573_v50  ;;  %2441 = vmatpush3.msra.mxu1 %v3577_v56 }
 0x459   : > { %1267 = vmatprep.subr.mxu0 %v3581_v54  ;;  %2442 = vmatprep.subr.mxu1 %v4005_v44 }
 0x45a   : > { %1268 = vmatpush1.msra.mxu0 %v3586_v2  ;;  %2443 = vmatpush3.msra.mxu1 %v3590_v3 }
 0x45b   : > { %1269 = vmatprep.subr.mxu0 %v3594_v4  ;;  %2444 = vmatprep.subr.mxu1 %v4005_v44 }
 0x45c   : > { %1270 = vmatpush1.msra.mxu0 %v3599_v5  ;;  %2445 = vmatpush3.msra.mxu1 %v3603_v7 }
 0x45d   : > { %1271 = vmatprep.subr.mxu0 %v3607_v8  ;;  %2446 = vmatprep.subr.mxu1 %v4005_v44 }
 0x45e   : > { %1272 = vmatpush1.msra.mxu0 %v3612_v9  ;;  %2447 = vmatpush3.msra.mxu1 %v3616_v11 }
 0x45f   : > { %1273 = vmatprep.subr.mxu0 %v3620_v12  ;;  %2448 = vmatprep.subr.mxu1 %v4005_v44 }
 0x460   : > { %1274 = vmatpush1.msra.mxu0 %v3625_v13  ;;  %2449 = vmatpush3.msra.mxu1 %v3629_v14 }
 0x461   : > { %1275 = vmatprep.subr.mxu0 %v3633_v15  ;;  %2450 = vmatprep.subr.mxu1 %v4005_v44 }
 0x462   : > { %1276 = vmatpush1.msra.mxu0 %v3638_v16  ;;  %2451 = vmatpush3.msra.mxu1 %v3642_v17 }
 0x463   : > { %1277 = vmatprep.subr.mxu0 %v3646_v18  ;;  %2452 = vmatprep.subr.mxu1 %v4005_v44 }
 0x464   : > { %1278 = vmatpush1.msra.mxu0 %v3651_v19  ;;  %2453 = vmatpush3.msra.mxu1 %v3655_v20 }
 0x465   : > { %1279 = vmatprep.subr.mxu0 %v3659_v21  ;;  %2454 = vmatprep.subr.mxu1 %v4005_v44 }
 0x466   : > { %1280 = vmatpush1.msra.mxu0 %v3664_v22  ;;  %1313 = vmatprep.mubr.f32.mxu0 %v4005_v44 }
 0x467   : > { %2455 = vmatpush3.msra.mxu1 %v3669_v23  ;;  %2456 = vmatprep.mubr.msk.f32.mxu1 %vm2801_vm0, %v4005_v44 }
 0x468   : > { %1426 = vmatprep.subr.mxu0 %v3448_v6  ;;  %2459 = vmatprep.subr.mxu1 %v4005_v44 }
 0x507   : > { %v1138_v25 = vpop.f32.mrf.mxu0  ;;  %v1209_v26 = vpop.f32.mrf.mxu1 }
 0x508   : > { %v1139_v27 = vadd.f32 %v1138_v25, %v4022_v10  ;;  %v1210_v25 = vadd.f32 %v1209_v26, %v3201_v57  ;;  %v1231_v10 = vrot.slane %v1070_v24, 4  ;;  %v1247_v26 = vld [vmem:[%s1246_s12] sm:$0x3f]  ;;  %s3898_s12 = scalar_select %p341_p11, 7, 0 }
 0x509   : > { %v1140_v28 = vpop.f32.mrf.mxu0  ;;  %v2423_v29 = vpop.f32.mrf.mxu1 }
 0x50a   : > { %v1213_v30 = vadd.f32 %v1139_v27, %v1070_v24  ;;  %v1141_v32 = vadd.f32 %v1140_v28, %v4010_v41  ;;  %v4031_v24 = vld [vmem:[#allocation12_spill] sm:$0xff]  ;;  %s2094_s11 = smul.u32 6, %s3898_s12 }
 0x50c   : > { %v2065_v31 = vmul.f32 -1.442695, %v1213_v30  ;;  %v1223_v34 = vadd.f32 %v1221_v33, %v1141_v32 }
 0x50e   : > { %2650 = vpow2.f32 %v2065_v31  ;;  %v2066_v6 = vmul.f32 -1.442695, %v1223_v34 }
 0x510   : > { %2652 = vpow2.f32 %v2066_v6 }
 0x51b   : > { %v2651_v23 = vpop.eup %2650 }
 0x51c   : > { %v1217_v22 = vadd.f32 1.0, %v2651_v23  ;;  %v4030_v23 = vld [vmem:[#allocation8_spill] sm:$0xff] }
 0x51d   : > { %v2653_v21 = vpop.eup %2652 }
 0x51e   : > { %2654 = vrcp.f32 %v1217_v22  ;;  %v1227_v20 = vadd.f32 1.0, %v2653_v21 }
 0x520   : > { %2656 = vrcp.f32 %v1227_v20  ;;  %v4029_v20 = vld [vmem:[#allocation7_spill] sm:$0xff] }
 0x52b   : > { %v2655_v29 = vpop.eup %2654 }
 0x52c   : > { %v1230_v27 = vmul.f32 %v2655_v29, %v1210_v25  ;;  %v4032_v29 = vld [vmem:[#allocation11_spill] sm:$0xff] }
 0x52d   : > { %v2657_v28 = vpop.eup %2656 }
 0x52e   : > { %v1233_v30 = vadd.f32 %v1231_v10, %v1230_v27  ;;  %v1235_v31 = vsub.f32 1.0, %v2657_v28  ;;  %v1237_v6 = vmul.f32 %v2657_v28, %v3464_v35  ;;  %v4027_v10 = vld [vmem:[#allocation6_spill] sm:$0xff]  ;;  %v4028_v35 = vld [vmem:[#allocation9_spill] sm:$0xff] }
 0x530   : > { %2658 = vtanh.f32 %v1233_v30 }
 0x53d   : > { %v2659_v32 = vpop.eup %2658 }
 0x53e   : > { %v1236_v33 = vmul.f32 %v2659_v32, %v1235_v31 }
 0x540   : > { %v1238_v22 = vadd.f32 %v1237_v6, %v1236_v33  ;;  %v1398_v6 = vrot.slane %v1247_v26, 2 }
 0x542   : > { %1239 = vst [vmem:[#allocation2] sm:$0x3] %v1238_v22  ;;  %1242 = vst [vmem:[%s1241_s26] sm:$0x3] %v1238_v22  ;;  %s3920_s26 = scalar_lea.sflag [#allocation4], %s259_s6 }
 0x549   : > { %v3688_v21 = vld [vmem:[#allocation2] sm:$0x3] }
 0x54a   : > { %1314 = vmatmul.mubr.f32.vlgmr.msra.gmra.mxu0 %v3688_v21  ;;  %2457 = vmatmul.mubr.f32.vlgmr.msra.gmra.mxu1 %v3688_v21 }
 0x54b   : > { %1427 = vmatpush1.msra.mxu0 %v3469_v36  ;;  %2460 = vmatpush3.msra.mxu1 %v3473_v37 }
 0x54c   : > { %1428 = vmatprep.subr.mxu0 %v3477_v38  ;;  %2461 = vmatprep.subr.mxu1 %v4005_v44 }
 0x54d   : > { %1429 = vmatpush1.msra.mxu0 %v3482_v39  ;;  %2462 = vmatpush3.msra.mxu1 %v3486_v40 }
 0x54e   : > { %1430 = vmatprep.subr.mxu0 %v3490_v43  ;;  %2463 = vmatprep.subr.mxu1 %v4005_v44 }
 0x54f   : > { %1431 = vmatpush1.msra.mxu0 %v3495_v45  ;;  %2464 = vmatpush3.msra.mxu1 %v3499_v46 }
 0x550   : > { %1432 = vmatprep.subr.mxu0 %v3503_v47  ;;  %2465 = vmatprep.subr.mxu1 %v4005_v44 }
 0x551   : > { %1433 = vmatpush1.msra.mxu0 %v3508_v59  ;;  %2466 = vmatpush3.msra.mxu1 %v3512_v48 }
 0x552   : > { %1434 = vmatprep.subr.mxu0 %v3516_v52  ;;  %2467 = vmatprep.subr.mxu1 %v4005_v44 }
 0x553   : > { %1435 = vmatpush1.msra.mxu0 %v3521_v60  ;;  %2468 = vmatpush3.msra.mxu1 %v3525_v61 }
 0x554   : > { %1436 = vmatprep.subr.mxu0 %v3529_v49  ;;  %2469 = vmatprep.subr.mxu1 %v4005_v44 }
 0x555   : > { %1437 = vmatpush1.msra.mxu0 %v3534_v58  ;;  %2470 = vmatpush3.msra.mxu1 %v3538_v1 }
 0x556   : > { %1438 = vmatprep.subr.mxu0 %v3542_v63  ;;  %2471 = vmatprep.subr.mxu1 %v4005_v44 }
 0x557   : > { %1439 = vmatpush1.msra.mxu0 %v3547_v62  ;;  %2472 = vmatpush3.msra.mxu1 %v3551_v42 }
 0x558   : > { %1440 = vmatprep.subr.mxu0 %v3555_v0  ;;  %2473 = vmatprep.subr.mxu1 %v4005_v44 }
 0x559   : > { %1441 = vmatpush1.msra.mxu0 %v3560_v51  ;;  %2474 = vmatpush3.msra.mxu1 %v3564_v53 }
 0x55a   : > { %1442 = vmatprep.subr.mxu0 %v3568_v55  ;;  %2475 = vmatprep.subr.mxu1 %v4005_v44 }
 0x55b   : > { %1443 = vmatpush1.msra.mxu0 %v3573_v50  ;;  %2476 = vmatpush3.msra.mxu1 %v3577_v56 }
 0x55c   : > { %1444 = vmatprep.subr.mxu0 %v3581_v54  ;;  %2477 = vmatprep.subr.mxu1 %v4005_v44 }
 0x55d   : > { %1445 = vmatpush1.msra.mxu0 %v3586_v2  ;;  %2478 = vmatpush3.msra.mxu1 %v3590_v3 }
 0x55e   : > { %1446 = vmatprep.subr.mxu0 %v3594_v4  ;;  %2479 = vmatprep.subr.mxu1 %v4005_v44 }
 0x55f   : > { %1447 = vmatpush1.msra.mxu0 %v3599_v5  ;;  %2480 = vmatpush3.msra.mxu1 %v3603_v7 }
 0x560   : > { %1448 = vmatprep.subr.mxu0 %v3607_v8  ;;  %2481 = vmatprep.subr.mxu1 %v4005_v44 }
 0x561   : > { %1449 = vmatpush1.msra.mxu0 %v3612_v9  ;;  %2482 = vmatpush3.msra.mxu1 %v3616_v11 }
 0x562   : > { %1450 = vmatprep.subr.mxu0 %v3620_v12  ;;  %2483 = vmatprep.subr.mxu1 %v4005_v44 }
 0x563   : > { %1451 = vmatpush1.msra.mxu0 %v3625_v13  ;;  %2484 = vmatpush3.msra.mxu1 %v3629_v14 }
 0x564   : > { %1452 = vmatprep.subr.mxu0 %v3633_v15  ;;  %2485 = vmatprep.subr.mxu1 %v4005_v44 }
 0x565   : > { %1453 = vmatpush1.msra.mxu0 %v3638_v16  ;;  %2486 = vmatpush3.msra.mxu1 %v3642_v17 }
 0x566   : > { %1454 = vmatprep.subr.mxu0 %v3646_v18  ;;  %2487 = vmatprep.subr.mxu1 %v4005_v44 }
 0x567   : > { %1455 = vmatpush1.msra.mxu0 %v3651_v19  ;;  %2488 = vmatpush3.msra.mxu1 %v4027_v10 }
 0x568   : > { %1456 = vmatprep.subr.mxu0 %v4028_v35  ;;  %2489 = vmatprep.subr.mxu1 %v4005_v44 }
 0x569   : > { %1457 = vmatpush1.msra.mxu0 %v4029_v20  ;;  %1490 = vmatprep.mubr.f32.mxu0 %v4005_v44 }
 0x56a   : > { %2490 = vmatpush3.msra.mxu1 %v4030_v23  ;;  %2491 = vmatprep.mubr.msk.f32.mxu1 %vm2801_vm0, %v4005_v44 }
 0x56b   : > { %1603 = vmatprep.subr.mxu0 %v4031_v24  ;;  %2494 = vmatprep.subr.mxu1 %v4005_v44 }
 0x60a   : > { %v1315_v34 = vpop.f32.mrf.mxu0  ;;  %v1386_v25 = vpop.f32.mrf.mxu1 }
 0x60b   : > { %v1316_v27 = vadd.f32 %v1315_v34, %v4032_v29  ;;  %v1387_v34 = vadd.f32 %v1386_v25, %v3201_v57  ;;  %v1408_v29 = vrot.slane %v1247_v26, 4  ;;  %v1777_v25 = vld [vmem:[%s3863_s8 + $0x8] sm:$0xff] }
 0x60c   : > { %v1317_v30 = vpop.f32.mrf.mxu0  ;;  %v2458_v28 = vpop.f32.mrf.mxu1 }
 0x60d   : > { %v1390_v31 = vadd.f32 %v1316_v27, %v1247_v26  ;;  %v1318_v33 = vadd.f32 %v1317_v30, %v4010_v41  ;;  %v1778_v26 = vld [vmem:[%s3863_s8 + $0x10] sm:$0xff] }
 0x60f   : > { %v2069_v32 = vmul.f32 -1.442695, %v1390_v31  ;;  %v1400_v22 = vadd.f32 %v1398_v6, %v1318_v33 }
 0x611   : > { %2660 = vpow2.f32 %v2069_v32  ;;  %v2070_v24 = vmul.f32 -1.442695, %v1400_v22 }
 0x613   : > { %2662 = vpow2.f32 %v2070_v24 }
 0x61e   : > { %v2661_v23 = vpop.eup %2660 }
 0x61f   : > { %v1394_v20 = vadd.f32 1.0, %v2661_v23  ;;  %v1779_v23 = vld [vmem:[%s3863_s8 + $0x18] sm:$0xff] }
 0x620   : > { %v2663_v35 = vpop.eup %2662 }
 0x621   : > { %2664 = vrcp.f32 %v1394_v20  ;;  %v1404_v10 = vadd.f32 1.0, %v2663_v35 }
 0x623   : > { %2666 = vrcp.f32 %v1404_v10  ;;  %v1780_v10 = vld [vmem:[%s3863_s8 + $0x20] sm:$0xff] }
 0x62e   : > { %v2665_v28 = vpop.eup %2664 }
 0x62f   : > { %v1407_v27 = vmul.f32 %v2665_v28, %v1387_v34 }
 0x630   : > { %v2667_v30 = vpop.eup %2666 }
 0x631   : > { %v1410_v31 = vadd.f32 %v1408_v29, %v1407_v27  ;;  %v1412_v32 = vsub.f32 1.0, %v2667_v30  ;;  %v1414_v22 = vmul.f32 %v2667_v30, %v3688_v21  ;;  %v1781_v21 = vld [vmem:[%s3863_s8 + $0x28] sm:$0xff]  ;;  %v1776_v29 = vld [vmem:[%s3863_s8] sm:$0xff] }
 0x633   : > { %2668 = vtanh.f32 %v1410_v31 }
 0x640   : > { %v2669_v33 = vpop.eup %2668 }
 0x641   : > { %v1413_v6 = vmul.f32 %v2669_v33, %v1412_v32 }
 0x643   : > { %v1415_v20 = vadd.f32 %v1414_v22, %v1413_v6 }
 0x645   : > { %1416 = vst [vmem:[#allocation2] sm:$0x3] %v1415_v20  ;;  %1419 = vst [vmem:[%s1418_s13] sm:$0x3] %v1415_v20  ;;  %s1600_s13 = scalar_lea.vmem %s3192_s25, %s2094_s11  ;;  %s2079_s25 = sshll.u32 %s3898_s12, 1 }
 0x646   : > { %v1601_v24 = vld [vmem:[%s1600_s13] sm:$0x3f]  ;;  %s1772_s14 = scalar_lea.vmem %s3209_s10, %s2079_s25 [#allocation3] }
 0x647   : > { %v1752_v22 = vrot.slane %v1601_v24, 2 }
 0x64c   : > { %v3771_v35 = vld [vmem:[#allocation2] sm:$0x3] }
 0x64d   : > { %1491 = vmatmul.mubr.f32.vlgmr.msra.gmra.mxu0 %v3771_v35  ;;  %2492 = vmatmul.mubr.f32.vlgmr.msra.gmra.mxu1 %v3771_v35 }
 0x64e   : > { %1604 = vmatpush1.msra.mxu0 %v3469_v36  ;;  %2495 = vmatpush3.msra.mxu1 %v3473_v37  ;;  %v4033_v36 = vld [vmem:[#allocation6_spill] sm:$0xff]  ;;  %v4034_v37 = vld [vmem:[#allocation9_spill] sm:$0xff] }
 0x64f   : > { %1605 = vmatprep.subr.mxu0 %v3477_v38  ;;  %2496 = vmatprep.subr.mxu1 %v4005_v44  ;;  %v4035_v38 = vld [vmem:[#allocation7_spill] sm:$0xff] }
 0x650   : > { %1606 = vmatpush1.msra.mxu0 %v3482_v39  ;;  %2497 = vmatpush3.msra.mxu1 %v3486_v40  ;;  %v4036_v39 = vld [vmem:[#allocation8_spill] sm:$0xff]  ;;  %v1424_v40 = vld [vmem:[%s1423_s16] sm:$0x3f]  ;;  %s1881_s16 = sshll.u32 %s3209_s10, 4  ;;  %s3916_s16 = int_to_ptr.vmem [resolvable:$true] %s1881_s16 }
 0x651   : > { %1607 = vmatprep.subr.mxu0 %v3490_v43  ;;  %2498 = vmatprep.subr.mxu1 %v4005_v44  ;;  %s2738_s7 = scalar_lea.vmem %s3916_s16, 256 }
 0x652   : > { %1608 = vmatpush1.msra.mxu0 %v3495_v45  ;;  %2499 = vmatpush3.msra.mxu1 %v3499_v46  ;;  %v4037_v46 = vld [vmem:[#allocation11_spill] sm:$0xff]  ;;  %p2739_p12 = scmp.ne.s32.totalorder %s3916_s16, %s2738_s7 }
 0x653   : > { %1609 = vmatprep.subr.mxu0 %v3503_v47  ;;  %2500 = vmatprep.subr.mxu1 %v4005_v44 }
 0x654   : > { %1610 = vmatpush1.msra.mxu0 %v3508_v59  ;;  %2501 = vmatpush3.msra.mxu1 %v3512_v48  ;;  %p2740_p13 = pnand %p2739_p12, %p2873_p5 }
 0x655   : > { %1611 = vmatprep.subr.mxu0 %v3516_v52  ;;  %2502 = vmatprep.subr.mxu1 %v4005_v44 }
 0x656   : > { %1612 = vmatpush1.msra.mxu0 %v3521_v60  ;;  %2503 = vmatpush3.msra.mxu1 %v3525_v61  ;;  %p2741_p0 = pneg %p2740_p13 }
 0x657   : > { %1613 = vmatprep.subr.mxu0 %v3529_v49  ;;  %2504 = vmatprep.subr.mxu1 %v4005_v44  ;;  %v1575_v49 = vrot.slane %v1424_v40, 2 }
 0x658   : > { %1614 = vmatpush1.msra.mxu0 %v3534_v58  ;;  %2505 = vmatpush3.msra.mxu1 %v3538_v1 }
 0x659   : > { %1615 = vmatprep.subr.mxu0 %v3542_v63  ;;  %2506 = vmatprep.subr.mxu1 %v4005_v44 }
 0x65a   : > { %1616 = vmatpush1.msra.mxu0 %v3547_v62  ;;  %2507 = vmatpush3.msra.mxu1 %v3551_v42 }
 0x65b   : > { %1617 = vmatprep.subr.mxu0 %v3555_v0  ;;  %2508 = vmatprep.subr.mxu1 %v4005_v44 }
 0x65c   : > { %1618 = vmatpush1.msra.mxu0 %v3560_v51  ;;  %2509 = vmatpush3.msra.mxu1 %v3564_v53  ;;  %v1585_v53 = vrot.slane %v1424_v40, 4 }
 0x65d   : > { %1619 = vmatprep.subr.mxu0 %v3568_v55  ;;  %2510 = vmatprep.subr.mxu1 %v4005_v44 }
 0x65e   : > { %1620 = vmatpush1.msra.mxu0 %v3573_v50  ;;  %2511 = vmatpush3.msra.mxu1 %v3577_v56 }
 0x65f   : > { %1621 = vmatprep.subr.mxu0 %v3581_v54  ;;  %2512 = vmatprep.subr.mxu1 %v4005_v44 }
 0x660   : > { %1622 = vmatpush1.msra.mxu0 %v3586_v2  ;;  %2513 = vmatpush3.msra.mxu1 %v3590_v3 }
 0x661   : > { %1623 = vmatprep.subr.mxu0 %v3594_v4  ;;  %2514 = vmatprep.subr.mxu1 %v4005_v44 }
 0x662   : > { %1624 = vmatpush1.msra.mxu0 %v3599_v5  ;;  %2515 = vmatpush3.msra.mxu1 %v3603_v7 }
 0x663   : > { %1625 = vmatprep.subr.mxu0 %v3607_v8  ;;  %2516 = vmatprep.subr.mxu1 %v4005_v44 }
 0x664   : > { %1626 = vmatpush1.msra.mxu0 %v3612_v9  ;;  %2517 = vmatpush3.msra.mxu1 %v3616_v11  ;;  %v1791_v9 = vld [vmem:[%s3863_s8 + $0x78] sm:$0xff]  ;;  %v1790_v11 = vld [vmem:[%s3863_s8 + $0x70] sm:$0xff] }
 0x665   : > { %1627 = vmatprep.subr.mxu0 %v3620_v12  ;;  %2518 = vmatprep.subr.mxu1 %v4005_v44  ;;  %v1789_v12 = vld [vmem:[%s3863_s8 + $0x68] sm:$0xff] }
 0x666   : > { %1628 = vmatpush1.msra.mxu0 %v3625_v13  ;;  %2519 = vmatpush3.msra.mxu1 %v3629_v14  ;;  %v1788_v13 = vld [vmem:[%s3863_s8 + $0x60] sm:$0xff]  ;;  %v1787_v14 = vld [vmem:[%s3863_s8 + $0x58] sm:$0xff] }
 0x667   : > { %1629 = vmatprep.subr.mxu0 %v3633_v15  ;;  %2520 = vmatprep.subr.mxu1 %v4005_v44  ;;  %v1786_v15 = vld [vmem:[%s3863_s8 + $0x50] sm:$0xff] }
 0x668   : > { %1630 = vmatpush1.msra.mxu0 %v3638_v16  ;;  %2521 = vmatpush3.msra.mxu1 %v3642_v17  ;;  %v1785_v16 = vld [vmem:[%s3863_s8 + $0x48] sm:$0xff]  ;;  %v1784_v17 = vld [vmem:[%s3863_s8 + $0x40] sm:$0xff] }
 0x669   : > { %1631 = vmatprep.subr.mxu0 %v3646_v18  ;;  %2522 = vmatprep.subr.mxu1 %v4005_v44  ;;  %v1783_v18 = vld [vmem:[%s3863_s8 + $0x38] sm:$0xff] }
 0x66a   : > { %1632 = vmatpush1.msra.mxu0 %v3651_v19  ;;  %2523 = vmatpush3.msra.mxu1 %v4033_v36  ;;  %v1782_v19 = vld [vmem:[%s3863_s8 + $0x30] sm:$0xff] }
 0x66b   : > { %1633 = vmatprep.subr.mxu0 %v4034_v37  ;;  %2524 = vmatprep.subr.mxu1 %v4005_v44 }
 0x66c   : > { %1634 = vmatpush1.msra.mxu0 %v4035_v38  ;;  %1667 = vmatprep.mubr.f32.mxu0 %v4005_v44 }
 0x66d   : > { %2525 = vmatpush3.msra.mxu1 %v4036_v39  ;;  %2526 = vmatprep.mubr.msk.f32.mxu1 %vm2801_vm0, %v4005_v44 }
 0x66e   : > { %2529 = vmatprep.subr.mxu0 %v4005_v44 }
 0x70d   : > { %v1492_v43 = vpop.f32.mrf.mxu0  ;;  %v1563_v45 = vpop.f32.mrf.mxu1 }
 0x70e   : > { %v1493_v47 = vadd.f32 %v1492_v43, %v4037_v46  ;;  %v1564_v51 = vadd.f32 %v1563_v45, %v3201_v57 }
 0x70f   : > { %v1494_v59 = vpop.f32.mrf.mxu0  ;;  %v2493_v48 = vpop.f32.mrf.mxu1 }
 0x710   : > { %v1567_v52 = vadd.f32 %v1493_v47, %v1424_v40  ;;  %v1495_v61 = vadd.f32 %v1494_v59, %v4010_v41  ;;  %v1762_v40 = vrot.slane %v1601_v24, 4 }
 0x712   : > { %v2073_v60 = vmul.f32 -1.442695, %v1567_v52  ;;  %v1577_v58 = vadd.f32 %v1575_v49, %v1495_v61 }
 0x714   : > { %2670 = vpow2.f32 %v2073_v60  ;;  %v2074_v1 = vmul.f32 -1.442695, %v1577_v58 }
 0x716   : > { %2672 = vpow2.f32 %v2074_v1 }
 0x721   : > { %v2671_v63 = vpop.eup %2670 }
 0x722   : > { %v1571_v62 = vadd.f32 1.0, %v2671_v63 }
 0x723   : > { %v2673_v42 = vpop.eup %2672 }
 0x724   : > { %2674 = vrcp.f32 %v1571_v62  ;;  %v1581_v0 = vadd.f32 1.0, %v2673_v42 }
 0x726   : > { %2676 = vrcp.f32 %v1581_v0 }
 0x731   : > { %v2675_v55 = vpop.eup %2674 }
 0x732   : > { %v1584_v50 = vmul.f32 %v2675_v55, %v1564_v51 }
 0x733   : > { %v2677_v54 = vpop.eup %2676 }
 0x734   : > { %v1587_v56 = vadd.f32 %v1585_v53, %v1584_v50  ;;  %v1589_v2 = vsub.f32 1.0, %v2677_v54  ;;  %v1591_v5 = vmul.f32 %v2677_v54, %v3771_v35 }
 0x736   : > { %2678 = vtanh.f32 %v1587_v56 }
 0x743   : > { %v2679_v3 = vpop.eup %2678 }
 0x744   : > { %v1590_v4 = vmul.f32 %v2679_v3, %v1589_v2 }
 0x746   : > { %v1592_v7 = vadd.f32 %v1591_v5, %v1590_v4 }
 0x748   : > { %1593 = vst [vmem:[#allocation2] sm:$0x3] %v1592_v7  ;;  %1596 = vst [vmem:[%s1595_s23] sm:$0x3] %v1592_v7 }
 0x74f   : > { %v3853_v8 = vld [vmem:[#allocation2] sm:$0x3] }
 0x750   : > { %1668 = vmatmul.mubr.f32.vlgmr.msra.gmra.mxu0 %v3853_v8  ;;  %2527 = vmatmul.mubr.f32.vlgmr.msra.gmra.mxu1 %v3853_v8 }
 0x751   : > { %2561 = vmatprep.mubr.msk.f32.mxu0 %vm2801_vm0, %v4005_v44  ;;  %2530 = vmatpush3.msra.mxu0 %v1791_v9 }
 0x752   : > { %2531 = vmatprep.subr.mxu0 %v4005_v44 }
 0x753   : > { %2532 = vmatpush3.msra.mxu0 %v1790_v11 }
 0x754   : > { %2533 = vmatprep.subr.mxu0 %v4005_v44 }
 0x755   : > { %2534 = vmatpush3.msra.mxu0 %v1789_v12 }
 0x756   : > { %2535 = vmatprep.subr.mxu0 %v4005_v44 }
 0x757   : > { %2536 = vmatpush3.msra.mxu0 %v1788_v13 }
 0x758   : > { %2537 = vmatprep.subr.mxu0 %v4005_v44 }
 0x759   : > { %2538 = vmatpush3.msra.mxu0 %v1787_v14 }
 0x75a   : > { %2539 = vmatprep.subr.mxu0 %v4005_v44 }
 0x75b   : > { %2540 = vmatpush3.msra.mxu0 %v1786_v15 }
 0x75c   : > { %2541 = vmatprep.subr.mxu0 %v4005_v44 }
 0x75d   : > { %2542 = vmatpush3.msra.mxu0 %v1785_v16 }
 0x75e   : > { %2543 = vmatprep.subr.mxu0 %v4005_v44 }
 0x75f   : > { %2544 = vmatpush3.msra.mxu0 %v1784_v17 }
 0x760   : > { %2545 = vmatprep.subr.mxu0 %v4005_v44 }
 0x761   : > { %2546 = vmatpush3.msra.mxu0 %v1783_v18 }
 0x762   : > { %2547 = vmatprep.subr.mxu0 %v4005_v44 }
 0x763   : > { %2548 = vmatpush3.msra.mxu0 %v1782_v19 }
 0x764   : > { %2549 = vmatprep.subr.mxu0 %v4005_v44 }
 0x765   : > { %2550 = vmatpush3.msra.mxu0 %v1781_v21 }
 0x766   : > { %2551 = vmatprep.subr.mxu0 %v4005_v44 }
 0x767   : > { %2552 = vmatpush3.msra.mxu0 %v1780_v10 }
 0x768   : > { %2553 = vmatprep.subr.mxu0 %v4005_v44 }
 0x769   : > { %2554 = vmatpush3.msra.mxu0 %v1779_v23 }
 0x76a   : > { %2555 = vmatprep.subr.mxu0 %v4005_v44 }
 0x76b   : > { %2556 = vmatpush3.msra.mxu0 %v1778_v26 }
 0x76c   : > { %2557 = vmatprep.subr.mxu0 %v4005_v44 }
 0x76d   : > { %2558 = vmatpush3.msra.mxu0 %v1777_v25 }
 0x76e   : > { %2559 = vmatprep.subr.mxu0 %v4005_v44 }
 0x76f   : > { %2560 = vmatpush3.msra.mxu0 %v1776_v29 }
 0x810   : > { %v1669_v34 = vpop.f32.mrf.mxu0  ;;  %v1740_v28 = vpop.f32.mrf.mxu1 }
 0x811   : > { %v1670_v27 = vadd.f32 %v1669_v34, %v4037_v46  ;;  %v1741_v39 = vadd.f32 %v1740_v28, %v3201_v57 }
 0x812   : > { %v1671_v31 = vpop.f32.mrf.mxu0  ;;  %v2528_v30 = vpop.f32.mrf.mxu1 }
 0x813   : > { %v1744_v32 = vadd.f32 %v1670_v27, %v1601_v24  ;;  %v1672_v6 = vadd.f32 %v1671_v31, %v4010_v41 }
 0x815   : > { %v2077_v33 = vmul.f32 -1.442695, %v1744_v32  ;;  %v1754_v44 = vadd.f32 %v1752_v22, %v1672_v6 }
 0x817   : > { %2680 = vpow2.f32 %v2077_v33  ;;  %v2078_v20 = vmul.f32 -1.442695, %v1754_v44 }
 0x819   : > { %2682 = vpow2.f32 %v2078_v20 }
 0x824   : > { %v2681_v35 = vpop.eup %2680 }
 0x825   : > { %v1748_v36 = vadd.f32 1.0, %v2681_v35 }
 0x826   : > { %v2683_v37 = vpop.eup %2682 }
 0x827   : > { %2684 = vrcp.f32 %v1748_v36  ;;  %v1758_v38 = vadd.f32 1.0, %v2683_v37 }
 0x829   : > { %2686 = vrcp.f32 %v1758_v38 }
 0x834   : > { %v2685_v43 = vpop.eup %2684 }
 0x835   : > { %v1761_v45 = vmul.f32 %v2685_v43, %v1741_v39 }
 0x836   : > { %v2687_v46 = vpop.eup %2686 }
 0x837   : > { %v1764_v41 = vadd.f32 %v1762_v40, %v1761_v45  ;;  %v1766_v47 = vsub.f32 1.0, %v2687_v46  ;;  %v1768_v52 = vmul.f32 %v2687_v46, %v3853_v8 }
 0x839   : > { %2688 = vtanh.f32 %v1764_v41 }
 0x846   : > { %v2689_v59 = vpop.eup %2688 }
 0x847   : > { %v1767_v48 = vmul.f32 %v2689_v59, %v1766_v47 }
 0x849   : > { %v1769_v57 = vadd.f32 %v1768_v52, %v1767_v48 }
 0x84b   : > { %1770 = vst [vmem:[#allocation2] sm:$0x3] %v1769_v57  ;;  %1773 = vst [vmem:[%s1772_s14] sm:$0x3] %v1769_v57 }
 0x852   : > { %v2080_v60 = vld [vmem:[%s3209_s10 + $0xe] sm:$0x3]  ;;  %s2742_s10 = sshll.u32 %s2802_s22, 4  ;;  %s2743_s10 = int_to_ptr.vmem [resolvable:$false] %s2742_s10 }
 0x853   : > { %2562 = vmatmul.mubr.f32.vlgmr.msra.gmra.mxu0 %v2080_v60  ;;  %s2744_s8 = scalar_lea.vmem %s2743_s10, 512  ;;  %p2745_p1 = scmp.lt.s32.totalorder %s3916_s16, %s2743_s10 }
 0x854   : > { %p2746_p2 = scmp.lt.s32.totalorder %s2744_s8, %s2738_s7 }
 0x856   : > { %p2747_p3 = por %p2746_p2, %p2745_p1 }
 0x858   : > { %p2748_p4 = pnand %p2747_p3, %p2741_p0 }
 0x85a   : > { %2751 = shalt.err (!%p2748_p4)
}
 0x85b   : > { %s2752_s6 = scalar_lea.hbm %s3914_s9, 256  ;;  %s2756_s13 = scalar_lea.hbm %s3968_s4, 512 }
 0x85c   : > { %p2753_p7 = scmp.ne.s32.totalorder %s3914_s9, %s2752_s6  ;;  %p2757_p10 = scmp.lt.s32.totalorder %s3914_s9, %s3968_s4 }
 0x85d   : > { %p2758_p11 = scmp.lt.s32.totalorder %s2756_s13, %s2752_s6 }
 0x85e   : > { %p2754_p8 = pnand %p2753_p7, %p2873_p5 }
 0x85f   : > { %p2759_p12 = por %p2758_p11, %p2757_p10 }
 0x860   : > { %p2755_p9 = pneg %p2754_p8 }
 0x862   : > { %p2760_p13 = pnand %p2759_p12, %p2755_p9 }
 0x864   : > { %2763 = shalt.err (!%p2760_p13)
}
 0x865   : > { %s2803_s15 = smov 32   ;;  %s2804_s17 = smov 2  }
 0x866   : > { %2567 = dma.vmem_to_hbm [thread:$0]  (%p2873_p5), %s3916_s16, 256, %s3914_s9, %s3920_s26, %s2803_s15, %s2803_s15, %s2804_s17  }
 0x867   : > { %s2047_s23 = sshll.u32 %s2888_s30, 1 }
 0x868   : > { %s290_s10 = scalar_lea.vmem %s3969_s5, %s2047_s23 }
 0x913   : > { %v1858_v61 = vpop.f32.mrf.mxu0 }
 0x914   : > { %1862 = vst [vmem:[%s290_s10] sm:$0x3] %v1858_v61 }
 0x915   : > { %v2563_v49 = vpop.f32.mrf.mxu0 }
 0x916 PF: > { %p2573_p0 = scmp.ge.s32.totalorder %s2798_s21, 2  ;;  %s1899_s8 = sand.u32 1, %s2786_s18  }
 0x917   : > { %s1900_s6 = scalar_lea.sflag [#allocation4], %s1899_s8 }
 0x918   : > { %p2570_p1 = pnand %p2573_p0, %p2877_p6 }
 0x91a   : > { %p2571_p2 = pneg %p2570_p1 }
 0x91c   : > { %2781 = dma.done.wait (%p2571_p2), %s1900_s6, 256  }
 0x91d   : > { %2783 = vsyncadd (%p2571_p2), %s1900_s6, 4294967040  ;;  %p16_p5 = scmp.ge.s32.totalorder %s2860_s24, 4   ;;  %s4038_s18 = smov %s2790_s19 }
 0x91e   : > { %s4039_s19 = smov %s2794_s20  ;;  %s4040_s20 = smov %s2871_s27 }
 0x91f   : > { %s4041_s21 = smov %s2860_s24  ;;  %18 = sbr.rel (!%p16_p5) target bundleno = 3 (0x3), region = 109 }
 0x924   :  { %1912 = vsyncpa [#allocation4], 1 }
 0x925   :  { %1914 = vsyncpa [#allocation4 + $0x1], 1 }

</bundles_post_ra>
